<compile_context>
chip_gen: v6e
topology: v6e:2x2x1
jax: 0.10.0
libtpu: 0.0.40
codegen_flags: <defaults>
</compile_context>

<pallas_src>
import jax
import jax.numpy as jnp
from jax.experimental import pallas as pl
from jax.experimental.pallas import tpu as pltpu


# ----------------------------------------------------------------------------
# Parameter packing (done once, outside the per-call jit path).
# PyTorch packs gates as [i; f; g; o] blocks of H rows along dim 0 of (4H, in),
# so a plain transpose gives the (in, 4H) layout with gate blocks along lanes.
# ----------------------------------------------------------------------------
def pack_lstm_params(layer_params, weight_dtype=jnp.float32):
    packed = []
    for p in layer_params:
        packed.append({
            "wih": jnp.asarray(p["w_ih"].T, dtype=weight_dtype),      # (in, 4H)
            "whh": jnp.asarray(p["w_hh"].T, dtype=weight_dtype),      # (H, 4H)
            "b":   (p["b_ih"] + p["b_hh"]).astype(jnp.float32)[None, :],  # (1, 4H)
        })
    return packed


# ----------------------------------------------------------------------------
# Fused multi-layer LSTM kernel: whole sequence resident in VMEM, one
# invocation (no grid).  All refs are 2-D (rows = T*B, lanes = feature).
#   refs = x(T*B,E), [wih_l, whh_l, b_l]*L, out(T*B,H), gate_scr(T*B,4H)
#          [, inter_scr(T*B,H) if L > 1]
# Gate order follows PyTorch: i, f, g, o.
# ----------------------------------------------------------------------------
def _make_fused_lstm_kernel(num_layers, T, B, H):
    def kernel(*refs):
        x_ref = refs[0]
        w_refs = refs[1:1 + 3 * num_layers]
        out_ref = refs[1 + 3 * num_layers]
        gate_scr = refs[2 + 3 * num_layers]
        inter_scr = refs[3 + 3 * num_layers] if num_layers > 1 else None

        src_ref = x_ref
        for layer in range(num_layers):
            wih_ref = w_refs[3 * layer + 0]
            whh_ref = w_refs[3 * layer + 1]
            b_ref = w_refs[3 * layer + 2]
            dst_ref = out_ref if layer == num_layers - 1 else inter_scr
            cdt = wih_ref.dtype   # MXU operand dtype (f32 demo / bf16 option)

            # ---- Prologue: hoisted input projection for ALL timesteps, one
            # wide (T*B, in) @ (in, 4H) matmul, bias folded in.
            gate_scr[...] = (
                jnp.dot(src_ref[...].astype(cdt), wih_ref[...],
                        preferred_element_type=jnp.float32)
                + b_ref[...])

            # ---- Recurrence: one fused h @ (H, 4H) dot per step on the serial
            # chain; i/f/g/o are 128-aligned lane slices of the (B, 4H) result.
            def step(t, carry):
                h, c = carry
                row = pl.ds(pl.multiple_of(t * B, B), B)
                gates = gate_scr[row, :] + jnp.dot(
                    h.astype(cdt), whh_ref[...],
                    preferred_element_type=jnp.float32)
                i = jax.nn.sigmoid(gates[:, 0 * H:1 * H])
                f = jax.nn.sigmoid(gates[:, 1 * H:2 * H])
                g = jnp.tanh(gates[:, 2 * H:3 * H])
                o = jax.nn.sigmoid(gates[:, 3 * H:4 * H])
                c_new = f * c + i * g
                h_new = o * jnp.tanh(c_new)
                dst_ref[row, :] = h_new          # lane-dense (B, H) store
                return (h_new, c_new)

            zeros = jnp.zeros((B, H), jnp.float32)
            jax.lax.fori_loop(0, T, step, (zeros, zeros),
                              unroll=min(T, 8))   # capped: avoid vreg spills
            src_ref = dst_ref

    return kernel


def _vmem_budget_bytes(T, B, E, H, num_layers, w_itemsize):
    n = T * B
    total = n * E * 4                    # input
    total += n * H * 4                   # output
    total += n * 4 * H * 4               # gate scratch
    total += n * H * 4 if num_layers > 1 else 0   # inter-layer scratch
    in_dim = E
    for _ in range(num_layers):
        total += (in_dim * 4 * H + H * 4 * H) * w_itemsize + 4 * H * 4
        in_dim = H
    return total


def fused_lstm(x2d, packed_params, T, B, E, H):
    """x2d: (T*B, E) f32 time-major rows -> all hidden states (T*B, H) f32."""
    num_layers = len(packed_params)
    flat = []
    for p in packed_params:
        flat += [p["wih"], p["whh"], p["b"]]
    w_itemsize = jnp.dtype(packed_params[0]["wih"].dtype).itemsize

    vmem = pl.BlockSpec(memory_space=pltpu.MemorySpace.VMEM)
    scratch = [pltpu.VMEM((T * B, 4 * H), jnp.float32)]
    if num_layers > 1:
        scratch.append(pltpu.VMEM((T * B, H), jnp.float32))

    need = _vmem_budget_bytes(T, B, E, H, num_layers, w_itemsize)
    vmem_limit = int(min(128 << 20, max(32 << 20, 2 * need)))

    return pl.pallas_call(
        _make_fused_lstm_kernel(num_layers, T, B, H),
        out_shape=jax.ShapeDtypeStruct((T * B, H), jnp.float32),
        in_specs=[vmem] * (1 + 3 * num_layers),
        out_specs=vmem,
        scratch_shapes=scratch,
        compiler_params=pltpu.CompilerParams(vmem_limit_bytes=vmem_limit),
    )(x2d, *flat)


# ----------------------------------------------------------------------------
# Full forward (glue: concat / drop-last / transposes; compute: Pallas kernel)
# ----------------------------------------------------------------------------
def question_caption_decoder_forward(features, captions, packed_params):
    """features (B, E), captions (B, T, E) -> hiddens (B, T, H)."""
    B, E = features.shape
    T = captions.shape[1]
    H = packed_params[0]["whh"].shape[0]
    assert B % 8 == 0, "batch must be a sublane multiple for the resident layout"
    assert H % 128 == 0, "hidden must be lane-aligned for free gate slicing"

    emb = jnp.concatenate([features[:, None, :], captions[:, :-1, :]], axis=1)
    x2d = jnp.transpose(emb, (1, 0, 2)).reshape(T * B, E)   # time-major rows
    out2d = fused_lstm(x2d, packed_params, T, B, E, H)       # (T*B, H)
    return jnp.transpose(out2d.reshape(T, B, H), (1, 0, 2))  # (B, T, H)


# ----------------------------------------------------------------------------
# Pure-JAX reference (HIGHEST-precision matmuls) for the correctness check
# ----------------------------------------------------------------------------
_HI = jax.lax.Precision.HIGHEST


def _lstm_layer_ref(x_tm, w_ih, w_hh, b_ih, b_hh):
    B = x_tm.shape[1]
    H = w_hh.shape[1]

    def step(carry, x_t):
        h, c = carry
        gates = (jnp.dot(x_t, w_ih.T, precision=_HI) + b_ih
                 + jnp.dot(h, w_hh.T, precision=_HI) + b_hh)
        i, f, g, o = jnp.split(gates, 4, axis=-1)
        i, f, o = jax.nn.sigmoid(i), jax.nn.sigmoid(f), jax.nn.sigmoid(o)
        g = jnp.tanh(g)
        c = f * c + i * g
        h = o * jnp.tanh(c)
        return (h, c), h

    init = (jnp.zeros((B, H), jnp.float32), jnp.zeros((B, H), jnp.float32))
    _, hs = jax.lax.scan(step, init, x_tm)
    return hs                                       # (T, B, H)


def _ref_forward(features, captions, layer_params):
    emb = jnp.concatenate([features[:, None, :], captions[:, :-1, :]], axis=1)
    x_tm = jnp.transpose(emb, (1, 0, 2))
    for p in layer_params:
        x_tm = _lstm_layer_ref(x_tm, p["w_ih"], p["w_hh"], p["b_ih"], p["b_hh"])
    return jnp.transpose(x_tm, (1, 0, 2))


if __name__ == "__main__":
    # Small shapes consistent with the module: batch 8 (full sublane tile),
    # 8 caption tokens, embed 64, hidden 128 (lane-dense), 2 stacked layers.
    B, T, E, H, L = 8, 8, 64, 128, 2

    key = jax.random.PRNGKey(0)
    k_feat, k_cap, k_w = jax.random.split(key, 3)

    def uniform(k, shape):
        return jax.random.uniform(k, shape, jnp.float32, -0.1, 0.1)

    layer_params = []
    in_dim = E
    wkeys = jax.random.split(k_w, 4 * L)
    for layer in range(L):
        kw = wkeys[4 * layer: 4 * layer + 4]
        layer_params.append({
            "w_ih": uniform(kw[0], (4 * H, in_dim)),   # PyTorch layout (4H, in)
            "w_hh": uniform(kw[1], (4 * H, H)),
            "b_ih": uniform(kw[2], (4 * H,)),
            "b_hh": uniform(kw[3], (4 * H,)),
        })
        in_dim = H

    # Pre-pack weights ONCE (parameter-load time, outside the jitted forward).
    # For v6e/v7x production shapes use weight_dtype=jnp.bfloat16 (and loosen
    # the tolerance); kept f32 here for a tight correctness check.
    packed = pack_lstm_params(layer_params, weight_dtype=jnp.float32)

    features = jax.random.normal(k_feat, (B, E), jnp.float32)
    captions = jax.random.normal(k_cap, (B, T, E), jnp.float32)

    fwd = jax.jit(question_caption_decoder_forward)
    out = jax.block_until_ready(fwd(features, captions, packed))

    ref = jax.block_until_ready(_ref_forward(features, captions, layer_params))
    assert out.shape == (B, T, H), out.shape
    max_err = float(jnp.max(jnp.abs(out - ref)))
    assert jnp.allclose(out, ref, atol=1e-4, rtol=1e-4), max_err

    print("KERNEL_OK")
</pallas_src>

<mosaic_0001>
module attributes {stable_mosaic.version = 11 : i64} {
  func.func @kernel(%arg0: memref<64x64xf32, #tpu.memory_space<vmem>>, %arg1: memref<64x512xf32, #tpu.memory_space<vmem>>, %arg2: memref<128x512xf32, #tpu.memory_space<vmem>>, %arg3: memref<1x512xf32, #tpu.memory_space<vmem>>, %arg4: memref<128x512xf32, #tpu.memory_space<vmem>>, %arg5: memref<128x512xf32, #tpu.memory_space<vmem>>, %arg6: memref<1x512xf32, #tpu.memory_space<vmem>>, %arg7: memref<64x128xf32, #tpu.memory_space<vmem>>, %arg8: memref<64x512xf32, #tpu.memory_space<vmem>>, %arg9: memref<64x128xf32, #tpu.memory_space<vmem>>) attributes {dimension_semantics = [], scalar_prefetch = 0 : i64, scratch_operands = 2 : i64, tpu.core_type = #tpu.core_type<tc>} {
    %c0 = arith.constant 0 : index
    %c0_0 = arith.constant 0 : index
    %0 = vector.load %arg0[%c0, %c0_0] : memref<64x64xf32, #tpu.memory_space<vmem>>, vector<64x64xf32>
    %c0_1 = arith.constant 0 : index
    %c0_2 = arith.constant 0 : index
    %1 = vector.load %arg1[%c0_1, %c0_2] : memref<64x512xf32, #tpu.memory_space<vmem>>, vector<64x512xf32>
    %cst = arith.constant dense<0.000000e+00> : vector<64x512xf32>
    %2 = tpu.matmul %0, %1, %cst {dimension_numbers = #tpu.dot_dimension_numbers<[1], [0], [0], [1], [0, 0, 1, 1], [], []>} : vector<64x64xf32>, vector<64x512xf32>, vector<64x512xf32> -> vector<64x512xf32>
    %c0_3 = arith.constant 0 : index
    %c0_4 = arith.constant 0 : index
    %3 = vector.load %arg3[%c0_3, %c0_4] : memref<1x512xf32, #tpu.memory_space<vmem>>, vector<1x512xf32>
    %4 = vector.broadcast %3 : vector<1x512xf32> to vector<64x512xf32>
    %5 = arith.addf %2, %4 : vector<64x512xf32>
    %c0_5 = arith.constant 0 : index
    %c0_6 = arith.constant 0 : index
    %6 = vector.load %arg8[%c0_5, %c0_6] : memref<64x512xf32, #tpu.memory_space<vmem>>, vector<64x512xf32>
    tpu.vector_store %arg8[%c0_5, %c0_6], %5 {strides = array<i32>} : memref<64x512xf32, #tpu.memory_space<vmem>>, vector<64x512xf32>,
    %cst_7 = arith.constant 0.000000e+00 : f32
    %7 = vector.broadcast %cst_7 : f32 to vector<8x128xf32>
    %c0_i32 = arith.constant 0 : i32
    %c8_i32 = arith.constant 8 : i32
    %8 = arith.muli %c0_i32, %c8_i32 : i32
    %9 = tpu.assume_multiple %8, 8 : i32
    %10 = arith.index_cast %9 : i32 to index
    %c0_8 = arith.constant 0 : index
    %11 = vector.load %arg8[%10, %c0_8] : memref<64x512xf32, #tpu.memory_space<vmem>>, vector<8x512xf32>
    %c0_9 = arith.constant 0 : index
    %c0_10 = arith.constant 0 : index
    %12 = vector.load %arg2[%c0_9, %c0_10] : memref<128x512xf32, #tpu.memory_space<vmem>>, vector<128x512xf32>
    %cst_11 = arith.constant dense<0.000000e+00> : vector<8x512xf32>
    %13 = tpu.matmul %7, %12, %cst_11 {dimension_numbers = #tpu.dot_dimension_numbers<[1], [0], [0], [1], [0, 0, 1, 1], [], []>} : vector<8x128xf32>, vector<128x512xf32>, vector<8x512xf32> -> vector<8x512xf32>
    %14 = arith.addf %11, %13 : vector<8x512xf32>
    %15 = vector.extract_strided_slice %14 {offsets = [0, 0], sizes = [8, 128], strides = [1, 1]} : vector<8x512xf32> to vector<8x128xf32>
    %16 = arith.negf %15 : vector<8x128xf32>
    %17 = math.exp %16 : vector<8x128xf32>
    %cst_12 = arith.constant 1.000000e+00 : f32
    %18 = vector.broadcast %cst_12 : f32 to vector<8x128xf32>
    %19 = arith.addf %18, %17 : vector<8x128xf32>
    %20 = arith.divf %18, %19 : vector<8x128xf32>
    %21 = vector.extract_strided_slice %14 {offsets = [0, 128], sizes = [8, 128], strides = [1, 1]} : vector<8x512xf32> to vector<8x128xf32>
    %22 = arith.negf %21 : vector<8x128xf32>
    %23 = math.exp %22 : vector<8x128xf32>
    %cst_13 = arith.constant 1.000000e+00 : f32
    %24 = vector.broadcast %cst_13 : f32 to vector<8x128xf32>
    %25 = arith.addf %24, %23 : vector<8x128xf32>
    %26 = arith.divf %24, %25 : vector<8x128xf32>
    %27 = vector.extract_strided_slice %14 {offsets = [0, 256], sizes = [8, 128], strides = [1, 1]} : vector<8x512xf32> to vector<8x128xf32>
    %28 = math.tanh %27 : vector<8x128xf32>
    %29 = vector.extract_strided_slice %14 {offsets = [0, 384], sizes = [8, 128], strides = [1, 1]} : vector<8x512xf32> to vector<8x128xf32>
    %30 = arith.negf %29 : vector<8x128xf32>
    %31 = math.exp %30 : vector<8x128xf32>
    %cst_14 = arith.constant 1.000000e+00 : f32
    %32 = vector.broadcast %cst_14 : f32 to vector<8x128xf32>
    %33 = arith.addf %32, %31 : vector<8x128xf32>
    %34 = arith.divf %32, %33 : vector<8x128xf32>
    %35 = arith.mulf %26, %7 : vector<8x128xf32>
    %36 = arith.mulf %20, %28 : vector<8x128xf32>
    %37 = arith.addf %35, %36 : vector<8x128xf32>
    %38 = math.tanh %37 : vector<8x128xf32>
    %39 = arith.mulf %34, %38 : vector<8x128xf32>
    %40 = arith.index_cast %9 : i32 to index
    %c0_15 = arith.constant 0 : index
    %41 = vector.load %arg9[%40, %c0_15] : memref<64x128xf32, #tpu.memory_space<vmem>>, vector<8x128xf32>
    tpu.vector_store %arg9[%40, %c0_15], %39 {strides = array<i32>} : memref<64x128xf32, #tpu.memory_space<vmem>>, vector<8x128xf32>,
    %c1_i32 = arith.constant 1 : i32
    %c8_i32_16 = arith.constant 8 : i32
    %42 = arith.muli %c1_i32, %c8_i32_16 : i32
    %43 = tpu.assume_multiple %42, 8 : i32
    %44 = arith.index_cast %43 : i32 to index
    %c0_17 = arith.constant 0 : index
    %45 = vector.load %arg8[%44, %c0_17] : memref<64x512xf32, #tpu.memory_space<vmem>>, vector<8x512xf32>
    %c0_18 = arith.constant 0 : index
    %c0_19 = arith.constant 0 : index
    %46 = vector.load %arg2[%c0_18, %c0_19] : memref<128x512xf32, #tpu.memory_space<vmem>>, vector<128x512xf32>
    %cst_20 = arith.constant dense<0.000000e+00> : vector<8x512xf32>
    %47 = tpu.matmul %39, %46, %cst_20 {dimension_numbers = #tpu.dot_dimension_numbers<[1], [0], [0], [1], [0, 0, 1, 1], [], []>} : vector<8x128xf32>, vector<128x512xf32>, vector<8x512xf32> -> vector<8x512xf32>
    %48 = arith.addf %45, %47 : vector<8x512xf32>
    %49 = vector.extract_strided_slice %48 {offsets = [0, 0], sizes = [8, 128], strides = [1, 1]} : vector<8x512xf32> to vector<8x128xf32>
    %50 = arith.negf %49 : vector<8x128xf32>
    %51 = math.exp %50 : vector<8x128xf32>
    %cst_21 = arith.constant 1.000000e+00 : f32
    %52 = vector.broadcast %cst_21 : f32 to vector<8x128xf32>
    %53 = arith.addf %52, %51 : vector<8x128xf32>
    %54 = arith.divf %52, %53 : vector<8x128xf32>
    %55 = vector.extract_strided_slice %48 {offsets = [0, 128], sizes = [8, 128], strides = [1, 1]} : vector<8x512xf32> to vector<8x128xf32>
    %56 = arith.negf %55 : vector<8x128xf32>
    %57 = math.exp %56 : vector<8x128xf32>
    %cst_22 = arith.constant 1.000000e+00 : f32
    %58 = vector.broadcast %cst_22 : f32 to vector<8x128xf32>
    %59 = arith.addf %58, %57 : vector<8x128xf32>
    %60 = arith.divf %58, %59 : vector<8x128xf32>
    %61 = vector.extract_strided_slice %48 {offsets = [0, 256], sizes = [8, 128], strides = [1, 1]} : vector<8x512xf32> to vector<8x128xf32>
    %62 = math.tanh %61 : vector<8x128xf32>
    %63 = vector.extract_strided_slice %48 {offsets = [0, 384], sizes = [8, 128], strides = [1, 1]} : vector<8x512xf32> to vector<8x128xf32>
    %64 = arith.negf %63 : vector<8x128xf32>
    %65 = math.exp %64 : vector<8x128xf32>
    %cst_23 = arith.constant 1.000000e+00 : f32
    %66 = vector.broadcast %cst_23 : f32 to vector<8x128xf32>
    %67 = arith.addf %66, %65 : vector<8x128xf32>
    %68 = arith.divf %66, %67 : vector<8x128xf32>
    %69 = arith.mulf %60, %37 : vector<8x128xf32>
    %70 = arith.mulf %54, %62 : vector<8x128xf32>
    %71 = arith.addf %69, %70 : vector<8x128xf32>
    %72 = math.tanh %71 : vector<8x128xf32>
    %73 = arith.mulf %68, %72 : vector<8x128xf32>
    %74 = arith.index_cast %43 : i32 to index
    %c0_24 = arith.constant 0 : index
    %75 = vector.load %arg9[%74, %c0_24] : memref<64x128xf32, #tpu.memory_space<vmem>>, vector<8x128xf32>
    tpu.vector_store %arg9[%74, %c0_24], %73 {strides = array<i32>} : memref<64x128xf32, #tpu.memory_space<vmem>>, vector<8x128xf32>,
    %c2_i32 = arith.constant 2 : i32
    %c8_i32_25 = arith.constant 8 : i32
    %76 = arith.muli %c2_i32, %c8_i32_25 : i32
    %77 = tpu.assume_multiple %76, 8 : i32
    %78 = arith.index_cast %77 : i32 to index
    %c0_26 = arith.constant 0 : index
    %79 = vector.load %arg8[%78, %c0_26] : memref<64x512xf32, #tpu.memory_space<vmem>>, vector<8x512xf32>
    %c0_27 = arith.constant 0 : index
    %c0_28 = arith.constant 0 : index
    %80 = vector.load %arg2[%c0_27, %c0_28] : memref<128x512xf32, #tpu.memory_space<vmem>>, vector<128x512xf32>
    %cst_29 = arith.constant dense<0.000000e+00> : vector<8x512xf32>
    %81 = tpu.matmul %73, %80, %cst_29 {dimension_numbers = #tpu.dot_dimension_numbers<[1], [0], [0], [1], [0, 0, 1, 1], [], []>} : vector<8x128xf32>, vector<128x512xf32>, vector<8x512xf32> -> vector<8x512xf32>
    %82 = arith.addf %79, %81 : vector<8x512xf32>
    %83 = vector.extract_strided_slice %82 {offsets = [0, 0], sizes = [8, 128], strides = [1, 1]} : vector<8x512xf32> to vector<8x128xf32>
    %84 = arith.negf %83 : vector<8x128xf32>
    %85 = math.exp %84 : vector<8x128xf32>
    %cst_30 = arith.constant 1.000000e+00 : f32
    %86 = vector.broadcast %cst_30 : f32 to vector<8x128xf32>
    %87 = arith.addf %86, %85 : vector<8x128xf32>
    %88 = arith.divf %86, %87 : vector<8x128xf32>
    %89 = vector.extract_strided_slice %82 {offsets = [0, 128], sizes = [8, 128], strides = [1, 1]} : vector<8x512xf32> to vector<8x128xf32>
    %90 = arith.negf %89 : vector<8x128xf32>
    %91 = math.exp %90 : vector<8x128xf32>
    %cst_31 = arith.constant 1.000000e+00 : f32
    %92 = vector.broadcast %cst_31 : f32 to vector<8x128xf32>
    %93 = arith.addf %92, %91 : vector<8x128xf32>
    %94 = arith.divf %92, %93 : vector<8x128xf32>
    %95 = vector.extract_strided_slice %82 {offsets = [0, 256], sizes = [8, 128], strides = [1, 1]} : vector<8x512xf32> to vector<8x128xf32>
    %96 = math.tanh %95 : vector<8x128xf32>
    %97 = vector.extract_strided_slice %82 {offsets = [0, 384], sizes = [8, 128], strides = [1, 1]} : vector<8x512xf32> to vector<8x128xf32>
    %98 = arith.negf %97 : vector<8x128xf32>
    %99 = math.exp %98 : vector<8x128xf32>
    %cst_32 = arith.constant 1.000000e+00 : f32
    %100 = vector.broadcast %cst_32 : f32 to vector<8x128xf32>
    %101 = arith.addf %100, %99 : vector<8x128xf32>
    %102 = arith.divf %100, %101 : vector<8x128xf32>
    %103 = arith.mulf %94, %71 : vector<8x128xf32>
    %104 = arith.mulf %88, %96 : vector<8x128xf32>
    %105 = arith.addf %103, %104 : vector<8x128xf32>
    %106 = math.tanh %105 : vector<8x128xf32>
    %107 = arith.mulf %102, %106 : vector<8x128xf32>
    %108 = arith.index_cast %77 : i32 to index
    %c0_33 = arith.constant 0 : index
    %109 = vector.load %arg9[%108, %c0_33] : memref<64x128xf32, #tpu.memory_space<vmem>>, vector<8x128xf32>
    tpu.vector_store %arg9[%108, %c0_33], %107 {strides = array<i32>} : memref<64x128xf32, #tpu.memory_space<vmem>>, vector<8x128xf32>,
    %c3_i32 = arith.constant 3 : i32
    %c8_i32_34 = arith.constant 8 : i32
    %110 = arith.muli %c3_i32, %c8_i32_34 : i32
    %111 = tpu.assume_multiple %110, 8 : i32
    %112 = arith.index_cast %111 : i32 to index
    %c0_35 = arith.constant 0 : index
    %113 = vector.load %arg8[%112, %c0_35] : memref<64x512xf32, #tpu.memory_space<vmem>>, vector<8x512xf32>
    %c0_36 = arith.constant 0 : index
    %c0_37 = arith.constant 0 : index
    %114 = vector.load %arg2[%c0_36, %c0_37] : memref<128x512xf32, #tpu.memory_space<vmem>>, vector<128x512xf32>
    %cst_38 = arith.constant dense<0.000000e+00> : vector<8x512xf32>
    %115 = tpu.matmul %107, %114, %cst_38 {dimension_numbers = #tpu.dot_dimension_numbers<[1], [0], [0], [1], [0, 0, 1, 1], [], []>} : vector<8x128xf32>, vector<128x512xf32>, vector<8x512xf32> -> vector<8x512xf32>
    %116 = arith.addf %113, %115 : vector<8x512xf32>
    %117 = vector.extract_strided_slice %116 {offsets = [0, 0], sizes = [8, 128], strides = [1, 1]} : vector<8x512xf32> to vector<8x128xf32>
    %118 = arith.negf %117 : vector<8x128xf32>
    %119 = math.exp %118 : vector<8x128xf32>
    %cst_39 = arith.constant 1.000000e+00 : f32
    %120 = vector.broadcast %cst_39 : f32 to vector<8x128xf32>
    %121 = arith.addf %120, %119 : vector<8x128xf32>
    %122 = arith.divf %120, %121 : vector<8x128xf32>
    %123 = vector.extract_strided_slice %116 {offsets = [0, 128], sizes = [8, 128], strides = [1, 1]} : vector<8x512xf32> to vector<8x128xf32>
    %124 = arith.negf %123 : vector<8x128xf32>
    %125 = math.exp %124 : vector<8x128xf32>
    %cst_40 = arith.constant 1.000000e+00 : f32
    %126 = vector.broadcast %cst_40 : f32 to vector<8x128xf32>
    %127 = arith.addf %126, %125 : vector<8x128xf32>
    %128 = arith.divf %126, %127 : vector<8x128xf32>
    %129 = vector.extract_strided_slice %116 {offsets = [0, 256], sizes = [8, 128], strides = [1, 1]} : vector<8x512xf32> to vector<8x128xf32>
    %130 = math.tanh %129 : vector<8x128xf32>
    %131 = vector.extract_strided_slice %116 {offsets = [0, 384], sizes = [8, 128], strides = [1, 1]} : vector<8x512xf32> to vector<8x128xf32>
    %132 = arith.negf %131 : vector<8x128xf32>
    %133 = math.exp %132 : vector<8x128xf32>
    %cst_41 = arith.constant 1.000000e+00 : f32
    %134 = vector.broadcast %cst_41 : f32 to vector<8x128xf32>
    %135 = arith.addf %134, %133 : vector<8x128xf32>
    %136 = arith.divf %134, %135 : vector<8x128xf32>
    %137 = arith.mulf %128, %105 : vector<8x128xf32>
    %138 = arith.mulf %122, %130 : vector<8x128xf32>
    %139 = arith.addf %137, %138 : vector<8x128xf32>
    %140 = math.tanh %139 : vector<8x128xf32>
    %141 = arith.mulf %136, %140 : vector<8x128xf32>
    %142 = arith.index_cast %111 : i32 to index
    %c0_42 = arith.constant 0 : index
    %143 = vector.load %arg9[%142, %c0_42] : memref<64x128xf32, #tpu.memory_space<vmem>>, vector<8x128xf32>
    tpu.vector_store %arg9[%142, %c0_42], %141 {strides = array<i32>} : memref<64x128xf32, #tpu.memory_space<vmem>>, vector<8x128xf32>,
    %c4_i32 = arith.constant 4 : i32
    %c8_i32_43 = arith.constant 8 : i32
    %144 = arith.muli %c4_i32, %c8_i32_43 : i32
    %145 = tpu.assume_multiple %144, 8 : i32
    %146 = arith.index_cast %145 : i32 to index
    %c0_44 = arith.constant 0 : index
    %147 = vector.load %arg8[%146, %c0_44] : memref<64x512xf32, #tpu.memory_space<vmem>>, vector<8x512xf32>
    %c0_45 = arith.constant 0 : index
    %c0_46 = arith.constant 0 : index
    %148 = vector.load %arg2[%c0_45, %c0_46] : memref<128x512xf32, #tpu.memory_space<vmem>>, vector<128x512xf32>
    %cst_47 = arith.constant dense<0.000000e+00> : vector<8x512xf32>
    %149 = tpu.matmul %141, %148, %cst_47 {dimension_numbers = #tpu.dot_dimension_numbers<[1], [0], [0], [1], [0, 0, 1, 1], [], []>} : vector<8x128xf32>, vector<128x512xf32>, vector<8x512xf32> -> vector<8x512xf32>
    %150 = arith.addf %147, %149 : vector<8x512xf32>
    %151 = vector.extract_strided_slice %150 {offsets = [0, 0], sizes = [8, 128], strides = [1, 1]} : vector<8x512xf32> to vector<8x128xf32>
    %152 = arith.negf %151 : vector<8x128xf32>
    %153 = math.exp %152 : vector<8x128xf32>
    %cst_48 = arith.constant 1.000000e+00 : f32
    %154 = vector.broadcast %cst_48 : f32 to vector<8x128xf32>
    %155 = arith.addf %154, %153 : vector<8x128xf32>
    %156 = arith.divf %154, %155 : vector<8x128xf32>
    %157 = vector.extract_strided_slice %150 {offsets = [0, 128], sizes = [8, 128], strides = [1, 1]} : vector<8x512xf32> to vector<8x128xf32>
    %158 = arith.negf %157 : vector<8x128xf32>
    %159 = math.exp %158 : vector<8x128xf32>
    %cst_49 = arith.constant 1.000000e+00 : f32
    %160 = vector.broadcast %cst_49 : f32 to vector<8x128xf32>
    %161 = arith.addf %160, %159 : vector<8x128xf32>
    %162 = arith.divf %160, %161 : vector<8x128xf32>
    %163 = vector.extract_strided_slice %150 {offsets = [0, 256], sizes = [8, 128], strides = [1, 1]} : vector<8x512xf32> to vector<8x128xf32>
    %164 = math.tanh %163 : vector<8x128xf32>
    %165 = vector.extract_strided_slice %150 {offsets = [0, 384], sizes = [8, 128], strides = [1, 1]} : vector<8x512xf32> to vector<8x128xf32>
    %166 = arith.negf %165 : vector<8x128xf32>
    %167 = math.exp %166 : vector<8x128xf32>
    %cst_50 = arith.constant 1.000000e+00 : f32
    %168 = vector.broadcast %cst_50 : f32 to vector<8x128xf32>
    %169 = arith.addf %168, %167 : vector<8x128xf32>
    %170 = arith.divf %168, %169 : vector<8x128xf32>
    %171 = arith.mulf %162, %139 : vector<8x128xf32>
    %172 = arith.mulf %156, %164 : vector<8x128xf32>
    %173 = arith.addf %171, %172 : vector<8x128xf32>
    %174 = math.tanh %173 : vector<8x128xf32>
    %175 = arith.mulf %170, %174 : vector<8x128xf32>
    %176 = arith.index_cast %145 : i32 to index
    %c0_51 = arith.constant 0 : index
    %177 = vector.load %arg9[%176, %c0_51] : memref<64x128xf32, #tpu.memory_space<vmem>>, vector<8x128xf32>
    tpu.vector_store %arg9[%176, %c0_51], %175 {strides = array<i32>} : memref<64x128xf32, #tpu.memory_space<vmem>>, vector<8x128xf32>,
    %c5_i32 = arith.constant 5 : i32
    %c8_i32_52 = arith.constant 8 : i32
    %178 = arith.muli %c5_i32, %c8_i32_52 : i32
    %179 = tpu.assume_multiple %178, 8 : i32
    %180 = arith.index_cast %179 : i32 to index
    %c0_53 = arith.constant 0 : index
    %181 = vector.load %arg8[%180, %c0_53] : memref<64x512xf32, #tpu.memory_space<vmem>>, vector<8x512xf32>
    %c0_54 = arith.constant 0 : index
    %c0_55 = arith.constant 0 : index
    %182 = vector.load %arg2[%c0_54, %c0_55] : memref<128x512xf32, #tpu.memory_space<vmem>>, vector<128x512xf32>
    %cst_56 = arith.constant dense<0.000000e+00> : vector<8x512xf32>
    %183 = tpu.matmul %175, %182, %cst_56 {dimension_numbers = #tpu.dot_dimension_numbers<[1], [0], [0], [1], [0, 0, 1, 1], [], []>} : vector<8x128xf32>, vector<128x512xf32>, vector<8x512xf32> -> vector<8x512xf32>
    %184 = arith.addf %181, %183 : vector<8x512xf32>
    %185 = vector.extract_strided_slice %184 {offsets = [0, 0], sizes = [8, 128], strides = [1, 1]} : vector<8x512xf32> to vector<8x128xf32>
    %186 = arith.negf %185 : vector<8x128xf32>
    %187 = math.exp %186 : vector<8x128xf32>
    %cst_57 = arith.constant 1.000000e+00 : f32
    %188 = vector.broadcast %cst_57 : f32 to vector<8x128xf32>
    %189 = arith.addf %188, %187 : vector<8x128xf32>
    %190 = arith.divf %188, %189 : vector<8x128xf32>
    %191 = vector.extract_strided_slice %184 {offsets = [0, 128], sizes = [8, 128], strides = [1, 1]} : vector<8x512xf32> to vector<8x128xf32>
    %192 = arith.negf %191 : vector<8x128xf32>
    %193 = math.exp %192 : vector<8x128xf32>
    %cst_58 = arith.constant 1.000000e+00 : f32
    %194 = vector.broadcast %cst_58 : f32 to vector<8x128xf32>
    %195 = arith.addf %194, %193 : vector<8x128xf32>
    %196 = arith.divf %194, %195 : vector<8x128xf32>
    %197 = vector.extract_strided_slice %184 {offsets = [0, 256], sizes = [8, 128], strides = [1, 1]} : vector<8x512xf32> to vector<8x128xf32>
    %198 = math.tanh %197 : vector<8x128xf32>
    %199 = vector.extract_strided_slice %184 {offsets = [0, 384], sizes = [8, 128], strides = [1, 1]} : vector<8x512xf32> to vector<8x128xf32>
    %200 = arith.negf %199 : vector<8x128xf32>
    %201 = math.exp %200 : vector<8x128xf32>
    %cst_59 = arith.constant 1.000000e+00 : f32
    %202 = vector.broadcast %cst_59 : f32 to vector<8x128xf32>
    %203 = arith.addf %202, %201 : vector<8x128xf32>
    %204 = arith.divf %202, %203 : vector<8x128xf32>
    %205 = arith.mulf %196, %173 : vector<8x128xf32>
    %206 = arith.mulf %190, %198 : vector<8x128xf32>
    %207 = arith.addf %205, %206 : vector<8x128xf32>
    %208 = math.tanh %207 : vector<8x128xf32>
    %209 = arith.mulf %204, %208 : vector<8x128xf32>
    %210 = arith.index_cast %179 : i32 to index
    %c0_60 = arith.constant 0 : index
    %211 = vector.load %arg9[%210, %c0_60] : memref<64x128xf32, #tpu.memory_space<vmem>>, vector<8x128xf32>
    tpu.vector_store %arg9[%210, %c0_60], %209 {strides = array<i32>} : memref<64x128xf32, #tpu.memory_space<vmem>>, vector<8x128xf32>,
    %c6_i32 = arith.constant 6 : i32
    %c8_i32_61 = arith.constant 8 : i32
    %212 = arith.muli %c6_i32, %c8_i32_61 : i32
    %213 = tpu.assume_multiple %212, 8 : i32
    %214 = arith.index_cast %213 : i32 to index
    %c0_62 = arith.constant 0 : index
    %215 = vector.load %arg8[%214, %c0_62] : memref<64x512xf32, #tpu.memory_space<vmem>>, vector<8x512xf32>
    %c0_63 = arith.constant 0 : index
    %c0_64 = arith.constant 0 : index
    %216 = vector.load %arg2[%c0_63, %c0_64] : memref<128x512xf32, #tpu.memory_space<vmem>>, vector<128x512xf32>
    %cst_65 = arith.constant dense<0.000000e+00> : vector<8x512xf32>
    %217 = tpu.matmul %209, %216, %cst_65 {dimension_numbers = #tpu.dot_dimension_numbers<[1], [0], [0], [1], [0, 0, 1, 1], [], []>} : vector<8x128xf32>, vector<128x512xf32>, vector<8x512xf32> -> vector<8x512xf32>
    %218 = arith.addf %215, %217 : vector<8x512xf32>
    %219 = vector.extract_strided_slice %218 {offsets = [0, 0], sizes = [8, 128], strides = [1, 1]} : vector<8x512xf32> to vector<8x128xf32>
    %220 = arith.negf %219 : vector<8x128xf32>
    %221 = math.exp %220 : vector<8x128xf32>
    %cst_66 = arith.constant 1.000000e+00 : f32
    %222 = vector.broadcast %cst_66 : f32 to vector<8x128xf32>
    %223 = arith.addf %222, %221 : vector<8x128xf32>
    %224 = arith.divf %222, %223 : vector<8x128xf32>
    %225 = vector.extract_strided_slice %218 {offsets = [0, 128], sizes = [8, 128], strides = [1, 1]} : vector<8x512xf32> to vector<8x128xf32>
    %226 = arith.negf %225 : vector<8x128xf32>
    %227 = math.exp %226 : vector<8x128xf32>
    %cst_67 = arith.constant 1.000000e+00 : f32
    %228 = vector.broadcast %cst_67 : f32 to vector<8x128xf32>
    %229 = arith.addf %228, %227 : vector<8x128xf32>
    %230 = arith.divf %228, %229 : vector<8x128xf32>
    %231 = vector.extract_strided_slice %218 {offsets = [0, 256], sizes = [8, 128], strides = [1, 1]} : vector<8x512xf32> to vector<8x128xf32>
    %232 = math.tanh %231 : vector<8x128xf32>
    %233 = vector.extract_strided_slice %218 {offsets = [0, 384], sizes = [8, 128], strides = [1, 1]} : vector<8x512xf32> to vector<8x128xf32>
    %234 = arith.negf %233 : vector<8x128xf32>
    %235 = math.exp %234 : vector<8x128xf32>
    %cst_68 = arith.constant 1.000000e+00 : f32
    %236 = vector.broadcast %cst_68 : f32 to vector<8x128xf32>
    %237 = arith.addf %236, %235 : vector<8x128xf32>
    %238 = arith.divf %236, %237 : vector<8x128xf32>
    %239 = arith.mulf %230, %207 : vector<8x128xf32>
    %240 = arith.mulf %224, %232 : vector<8x128xf32>
    %241 = arith.addf %239, %240 : vector<8x128xf32>
    %242 = math.tanh %241 : vector<8x128xf32>
    %243 = arith.mulf %238, %242 : vector<8x128xf32>
    %244 = arith.index_cast %213 : i32 to index
    %c0_69 = arith.constant 0 : index
    %245 = vector.load %arg9[%244, %c0_69] : memref<64x128xf32, #tpu.memory_space<vmem>>, vector<8x128xf32>
    tpu.vector_store %arg9[%244, %c0_69], %243 {strides = array<i32>} : memref<64x128xf32, #tpu.memory_space<vmem>>, vector<8x128xf32>,
    %c7_i32 = arith.constant 7 : i32
    %c8_i32_70 = arith.constant 8 : i32
    %246 = arith.muli %c7_i32, %c8_i32_70 : i32
    %247 = tpu.assume_multiple %246, 8 : i32
    %248 = arith.index_cast %247 : i32 to index
    %c0_71 = arith.constant 0 : index
    %249 = vector.load %arg8[%248, %c0_71] : memref<64x512xf32, #tpu.memory_space<vmem>>, vector<8x512xf32>
    %c0_72 = arith.constant 0 : index
    %c0_73 = arith.constant 0 : index
    %250 = vector.load %arg2[%c0_72, %c0_73] : memref<128x512xf32, #tpu.memory_space<vmem>>, vector<128x512xf32>
    %cst_74 = arith.constant dense<0.000000e+00> : vector<8x512xf32>
    %251 = tpu.matmul %243, %250, %cst_74 {dimension_numbers = #tpu.dot_dimension_numbers<[1], [0], [0], [1], [0, 0, 1, 1], [], []>} : vector<8x128xf32>, vector<128x512xf32>, vector<8x512xf32> -> vector<8x512xf32>
    %252 = arith.addf %249, %251 : vector<8x512xf32>
    %253 = vector.extract_strided_slice %252 {offsets = [0, 0], sizes = [8, 128], strides = [1, 1]} : vector<8x512xf32> to vector<8x128xf32>
    %254 = arith.negf %253 : vector<8x128xf32>
    %255 = math.exp %254 : vector<8x128xf32>
    %cst_75 = arith.constant 1.000000e+00 : f32
    %256 = vector.broadcast %cst_75 : f32 to vector<8x128xf32>
    %257 = arith.addf %256, %255 : vector<8x128xf32>
    %258 = arith.divf %256, %257 : vector<8x128xf32>
    %259 = vector.extract_strided_slice %252 {offsets = [0, 128], sizes = [8, 128], strides = [1, 1]} : vector<8x512xf32> to vector<8x128xf32>
    %260 = arith.negf %259 : vector<8x128xf32>
    %261 = math.exp %260 : vector<8x128xf32>
    %cst_76 = arith.constant 1.000000e+00 : f32
    %262 = vector.broadcast %cst_76 : f32 to vector<8x128xf32>
    %263 = arith.addf %262, %261 : vector<8x128xf32>
    %264 = arith.divf %262, %263 : vector<8x128xf32>
    %265 = vector.extract_strided_slice %252 {offsets = [0, 256], sizes = [8, 128], strides = [1, 1]} : vector<8x512xf32> to vector<8x128xf32>
    %266 = math.tanh %265 : vector<8x128xf32>
    %267 = vector.extract_strided_slice %252 {offsets = [0, 384], sizes = [8, 128], strides = [1, 1]} : vector<8x512xf32> to vector<8x128xf32>
    %268 = arith.negf %267 : vector<8x128xf32>
    %269 = math.exp %268 : vector<8x128xf32>
    %cst_77 = arith.constant 1.000000e+00 : f32
    %270 = vector.broadcast %cst_77 : f32 to vector<8x128xf32>
    %271 = arith.addf %270, %269 : vector<8x128xf32>
    %272 = arith.divf %270, %271 : vector<8x128xf32>
    %273 = arith.mulf %264, %241 : vector<8x128xf32>
    %274 = arith.mulf %258, %266 : vector<8x128xf32>
    %275 = arith.addf %273, %274 : vector<8x128xf32>
    %276 = math.tanh %275 : vector<8x128xf32>
    %277 = arith.mulf %272, %276 : vector<8x128xf32>
    %278 = arith.index_cast %247 : i32 to index
    %c0_78 = arith.constant 0 : index
    %279 = vector.load %arg9[%278, %c0_78] : memref<64x128xf32, #tpu.memory_space<vmem>>, vector<8x128xf32>
    tpu.vector_store %arg9[%278, %c0_78], %277 {strides = array<i32>} : memref<64x128xf32, #tpu.memory_space<vmem>>, vector<8x128xf32>,
    %c8_i32_79 = arith.constant 8 : i32
    %c0_80 = arith.constant 0 : index
    %c0_81 = arith.constant 0 : index
    %280 = vector.load %arg9[%c0_80, %c0_81] : memref<64x128xf32, #tpu.memory_space<vmem>>, vector<64x128xf32>
    %c0_82 = arith.constant 0 : index
    %c0_83 = arith.constant 0 : index
    %281 = vector.load %arg4[%c0_82, %c0_83] : memref<128x512xf32, #tpu.memory_space<vmem>>, vector<128x512xf32>
    %cst_84 = arith.constant dense<0.000000e+00> : vector<64x512xf32>
    %282 = tpu.matmul %280, %281, %cst_84 {dimension_numbers = #tpu.dot_dimension_numbers<[1], [0], [0], [1], [0, 0, 1, 1], [], []>} : vector<64x128xf32>, vector<128x512xf32>, vector<64x512xf32> -> vector<64x512xf32>
    %c0_85 = arith.constant 0 : index
    %c0_86 = arith.constant 0 : index
    %283 = vector.load %arg6[%c0_85, %c0_86] : memref<1x512xf32, #tpu.memory_space<vmem>>, vector<1x512xf32>
    %284 = vector.broadcast %283 : vector<1x512xf32> to vector<64x512xf32>
    %285 = arith.addf %282, %284 : vector<64x512xf32>
    %c0_87 = arith.constant 0 : index
    %c0_88 = arith.constant 0 : index
    %286 = vector.load %arg8[%c0_87, %c0_88] : memref<64x512xf32, #tpu.memory_space<vmem>>, vector<64x512xf32>
    tpu.vector_store %arg8[%c0_87, %c0_88], %285 {strides = array<i32>} : memref<64x512xf32, #tpu.memory_space<vmem>>, vector<64x512xf32>,
    %cst_89 = arith.constant 0.000000e+00 : f32
    %287 = vector.broadcast %cst_89 : f32 to vector<8x128xf32>
    %c0_i32_90 = arith.constant 0 : i32
    %c8_i32_91 = arith.constant 8 : i32
    %288 = arith.muli %c0_i32_90, %c8_i32_91 : i32
    %289 = tpu.assume_multiple %288, 8 : i32
    %290 = arith.index_cast %289 : i32 to index
    %c0_92 = arith.constant 0 : index
    %291 = vector.load %arg8[%290, %c0_92] : memref<64x512xf32, #tpu.memory_space<vmem>>, vector<8x512xf32>
    %c0_93 = arith.constant 0 : index
    %c0_94 = arith.constant 0 : index
    %292 = vector.load %arg5[%c0_93, %c0_94] : memref<128x512xf32, #tpu.memory_space<vmem>>, vector<128x512xf32>
    %cst_95 = arith.constant dense<0.000000e+00> : vector<8x512xf32>
    %293 = tpu.matmul %287, %292, %cst_95 {dimension_numbers = #tpu.dot_dimension_numbers<[1], [0], [0], [1], [0, 0, 1, 1], [], []>} : vector<8x128xf32>, vector<128x512xf32>, vector<8x512xf32> -> vector<8x512xf32>
    %294 = arith.addf %291, %293 : vector<8x512xf32>
    %295 = vector.extract_strided_slice %294 {offsets = [0, 0], sizes = [8, 128], strides = [1, 1]} : vector<8x512xf32> to vector<8x128xf32>
    %296 = arith.negf %295 : vector<8x128xf32>
    %297 = math.exp %296 : vector<8x128xf32>
    %cst_96 = arith.constant 1.000000e+00 : f32
    %298 = vector.broadcast %cst_96 : f32 to vector<8x128xf32>
    %299 = arith.addf %298, %297 : vector<8x128xf32>
    %300 = arith.divf %298, %299 : vector<8x128xf32>
    %301 = vector.extract_strided_slice %294 {offsets = [0, 128], sizes = [8, 128], strides = [1, 1]} : vector<8x512xf32> to vector<8x128xf32>
    %302 = arith.negf %301 : vector<8x128xf32>
    %303 = math.exp %302 : vector<8x128xf32>
    %cst_97 = arith.constant 1.000000e+00 : f32
    %304 = vector.broadcast %cst_97 : f32 to vector<8x128xf32>
    %305 = arith.addf %304, %303 : vector<8x128xf32>
    %306 = arith.divf %304, %305 : vector<8x128xf32>
    %307 = vector.extract_strided_slice %294 {offsets = [0, 256], sizes = [8, 128], strides = [1, 1]} : vector<8x512xf32> to vector<8x128xf32>
    %308 = math.tanh %307 : vector<8x128xf32>
    %309 = vector.extract_strided_slice %294 {offsets = [0, 384], sizes = [8, 128], strides = [1, 1]} : vector<8x512xf32> to vector<8x128xf32>
    %310 = arith.negf %309 : vector<8x128xf32>
    %311 = math.exp %310 : vector<8x128xf32>
    %cst_98 = arith.constant 1.000000e+00 : f32
    %312 = vector.broadcast %cst_98 : f32 to vector<8x128xf32>
    %313 = arith.addf %312, %311 : vector<8x128xf32>
    %314 = arith.divf %312, %313 : vector<8x128xf32>
    %315 = arith.mulf %306, %287 : vector<8x128xf32>
    %316 = arith.mulf %300, %308 : vector<8x128xf32>
    %317 = arith.addf %315, %316 : vector<8x128xf32>
    %318 = math.tanh %317 : vector<8x128xf32>
    %319 = arith.mulf %314, %318 : vector<8x128xf32>
    %320 = arith.index_cast %289 : i32 to index
    %c0_99 = arith.constant 0 : index
    %321 = vector.load %arg7[%320, %c0_99] : memref<64x128xf32, #tpu.memory_space<vmem>>, vector<8x128xf32>
    tpu.vector_store %arg7[%320, %c0_99], %319 {strides = array<i32>} : memref<64x128xf32, #tpu.memory_space<vmem>>, vector<8x128xf32>,
    %c1_i32_100 = arith.constant 1 : i32
    %c8_i32_101 = arith.constant 8 : i32
    %322 = arith.muli %c1_i32_100, %c8_i32_101 : i32
    %323 = tpu.assume_multiple %322, 8 : i32
    %324 = arith.index_cast %323 : i32 to index
    %c0_102 = arith.constant 0 : index
    %325 = vector.load %arg8[%324, %c0_102] : memref<64x512xf32, #tpu.memory_space<vmem>>, vector<8x512xf32>
    %c0_103 = arith.constant 0 : index
    %c0_104 = arith.constant 0 : index
    %326 = vector.load %arg5[%c0_103, %c0_104] : memref<128x512xf32, #tpu.memory_space<vmem>>, vector<128x512xf32>
    %cst_105 = arith.constant dense<0.000000e+00> : vector<8x512xf32>
    %327 = tpu.matmul %319, %326, %cst_105 {dimension_numbers = #tpu.dot_dimension_numbers<[1], [0], [0], [1], [0, 0, 1, 1], [], []>} : vector<8x128xf32>, vector<128x512xf32>, vector<8x512xf32> -> vector<8x512xf32>
    %328 = arith.addf %325, %327 : vector<8x512xf32>
    %329 = vector.extract_strided_slice %328 {offsets = [0, 0], sizes = [8, 128], strides = [1, 1]} : vector<8x512xf32> to vector<8x128xf32>
    %330 = arith.negf %329 : vector<8x128xf32>
    %331 = math.exp %330 : vector<8x128xf32>
    %cst_106 = arith.constant 1.000000e+00 : f32
    %332 = vector.broadcast %cst_106 : f32 to vector<8x128xf32>
    %333 = arith.addf %332, %331 : vector<8x128xf32>
    %334 = arith.divf %332, %333 : vector<8x128xf32>
    %335 = vector.extract_strided_slice %328 {offsets = [0, 128], sizes = [8, 128], strides = [1, 1]} : vector<8x512xf32> to vector<8x128xf32>
    %336 = arith.negf %335 : vector<8x128xf32>
    %337 = math.exp %336 : vector<8x128xf32>
    %cst_107 = arith.constant 1.000000e+00 : f32
    %338 = vector.broadcast %cst_107 : f32 to vector<8x128xf32>
    %339 = arith.addf %338, %337 : vector<8x128xf32>
    %340 = arith.divf %338, %339 : vector<8x128xf32>
    %341 = vector.extract_strided_slice %328 {offsets = [0, 256], sizes = [8, 128], strides = [1, 1]} : vector<8x512xf32> to vector<8x128xf32>
    %342 = math.tanh %341 : vector<8x128xf32>
    %343 = vector.extract_strided_slice %328 {offsets = [0, 384], sizes = [8, 128], strides = [1, 1]} : vector<8x512xf32> to vector<8x128xf32>
    %344 = arith.negf %343 : vector<8x128xf32>
    %345 = math.exp %344 : vector<8x128xf32>
    %cst_108 = arith.constant 1.000000e+00 : f32
    %346 = vector.broadcast %cst_108 : f32 to vector<8x128xf32>
    %347 = arith.addf %346, %345 : vector<8x128xf32>
    %348 = arith.divf %346, %347 : vector<8x128xf32>
    %349 = arith.mulf %340, %317 : vector<8x128xf32>
    %350 = arith.mulf %334, %342 : vector<8x128xf32>
    %351 = arith.addf %349, %350 : vector<8x128xf32>
    %352 = math.tanh %351 : vector<8x128xf32>
    %353 = arith.mulf %348, %352 : vector<8x128xf32>
    %354 = arith.index_cast %323 : i32 to index
    %c0_109 = arith.constant 0 : index
    %355 = vector.load %arg7[%354, %c0_109] : memref<64x128xf32, #tpu.memory_space<vmem>>, vector<8x128xf32>
    tpu.vector_store %arg7[%354, %c0_109], %353 {strides = array<i32>} : memref<64x128xf32, #tpu.memory_space<vmem>>, vector<8x128xf32>,
    %c2_i32_110 = arith.constant 2 : i32
    %c8_i32_111 = arith.constant 8 : i32
    %356 = arith.muli %c2_i32_110, %c8_i32_111 : i32
    %357 = tpu.assume_multiple %356, 8 : i32
    %358 = arith.index_cast %357 : i32 to index
    %c0_112 = arith.constant 0 : index
    %359 = vector.load %arg8[%358, %c0_112] : memref<64x512xf32, #tpu.memory_space<vmem>>, vector<8x512xf32>
    %c0_113 = arith.constant 0 : index
    %c0_114 = arith.constant 0 : index
    %360 = vector.load %arg5[%c0_113, %c0_114] : memref<128x512xf32, #tpu.memory_space<vmem>>, vector<128x512xf32>
    %cst_115 = arith.constant dense<0.000000e+00> : vector<8x512xf32>
    %361 = tpu.matmul %353, %360, %cst_115 {dimension_numbers = #tpu.dot_dimension_numbers<[1], [0], [0], [1], [0, 0, 1, 1], [], []>} : vector<8x128xf32>, vector<128x512xf32>, vector<8x512xf32> -> vector<8x512xf32>
    %362 = arith.addf %359, %361 : vector<8x512xf32>
    %363 = vector.extract_strided_slice %362 {offsets = [0, 0], sizes = [8, 128], strides = [1, 1]} : vector<8x512xf32> to vector<8x128xf32>
    %364 = arith.negf %363 : vector<8x128xf32>
    %365 = math.exp %364 : vector<8x128xf32>
    %cst_116 = arith.constant 1.000000e+00 : f32
    %366 = vector.broadcast %cst_116 : f32 to vector<8x128xf32>
    %367 = arith.addf %366, %365 : vector<8x128xf32>
    %368 = arith.divf %366, %367 : vector<8x128xf32>
    %369 = vector.extract_strided_slice %362 {offsets = [0, 128], sizes = [8, 128], strides = [1, 1]} : vector<8x512xf32> to vector<8x128xf32>
    %370 = arith.negf %369 : vector<8x128xf32>
    %371 = math.exp %370 : vector<8x128xf32>
    %cst_117 = arith.constant 1.000000e+00 : f32
    %372 = vector.broadcast %cst_117 : f32 to vector<8x128xf32>
    %373 = arith.addf %372, %371 : vector<8x128xf32>
    %374 = arith.divf %372, %373 : vector<8x128xf32>
    %375 = vector.extract_strided_slice %362 {offsets = [0, 256], sizes = [8, 128], strides = [1, 1]} : vector<8x512xf32> to vector<8x128xf32>
    %376 = math.tanh %375 : vector<8x128xf32>
    %377 = vector.extract_strided_slice %362 {offsets = [0, 384], sizes = [8, 128], strides = [1, 1]} : vector<8x512xf32> to vector<8x128xf32>
    %378 = arith.negf %377 : vector<8x128xf32>
    %379 = math.exp %378 : vector<8x128xf32>
    %cst_118 = arith.constant 1.000000e+00 : f32
    %380 = vector.broadcast %cst_118 : f32 to vector<8x128xf32>
    %381 = arith.addf %380, %379 : vector<8x128xf32>
    %382 = arith.divf %380, %381 : vector<8x128xf32>
    %383 = arith.mulf %374, %351 : vector<8x128xf32>
    %384 = arith.mulf %368, %376 : vector<8x128xf32>
    %385 = arith.addf %383, %384 : vector<8x128xf32>
    %386 = math.tanh %385 : vector<8x128xf32>
    %387 = arith.mulf %382, %386 : vector<8x128xf32>
    %388 = arith.index_cast %357 : i32 to index
    %c0_119 = arith.constant 0 : index
    %389 = vector.load %arg7[%388, %c0_119] : memref<64x128xf32, #tpu.memory_space<vmem>>, vector<8x128xf32>
    tpu.vector_store %arg7[%388, %c0_119], %387 {strides = array<i32>} : memref<64x128xf32, #tpu.memory_space<vmem>>, vector<8x128xf32>,
    %c3_i32_120 = arith.constant 3 : i32
    %c8_i32_121 = arith.constant 8 : i32
    %390 = arith.muli %c3_i32_120, %c8_i32_121 : i32
    %391 = tpu.assume_multiple %390, 8 : i32
    %392 = arith.index_cast %391 : i32 to index
    %c0_122 = arith.constant 0 : index
    %393 = vector.load %arg8[%392, %c0_122] : memref<64x512xf32, #tpu.memory_space<vmem>>, vector<8x512xf32>
    %c0_123 = arith.constant 0 : index
    %c0_124 = arith.constant 0 : index
    %394 = vector.load %arg5[%c0_123, %c0_124] : memref<128x512xf32, #tpu.memory_space<vmem>>, vector<128x512xf32>
    %cst_125 = arith.constant dense<0.000000e+00> : vector<8x512xf32>
    %395 = tpu.matmul %387, %394, %cst_125 {dimension_numbers = #tpu.dot_dimension_numbers<[1], [0], [0], [1], [0, 0, 1, 1], [], []>} : vector<8x128xf32>, vector<128x512xf32>, vector<8x512xf32> -> vector<8x512xf32>
    %396 = arith.addf %393, %395 : vector<8x512xf32>
    %397 = vector.extract_strided_slice %396 {offsets = [0, 0], sizes = [8, 128], strides = [1, 1]} : vector<8x512xf32> to vector<8x128xf32>
    %398 = arith.negf %397 : vector<8x128xf32>
    %399 = math.exp %398 : vector<8x128xf32>
    %cst_126 = arith.constant 1.000000e+00 : f32
    %400 = vector.broadcast %cst_126 : f32 to vector<8x128xf32>
    %401 = arith.addf %400, %399 : vector<8x128xf32>
    %402 = arith.divf %400, %401 : vector<8x128xf32>
    %403 = vector.extract_strided_slice %396 {offsets = [0, 128], sizes = [8, 128], strides = [1, 1]} : vector<8x512xf32> to vector<8x128xf32>
    %404 = arith.negf %403 : vector<8x128xf32>
    %405 = math.exp %404 : vector<8x128xf32>
    %cst_127 = arith.constant 1.000000e+00 : f32
    %406 = vector.broadcast %cst_127 : f32 to vector<8x128xf32>
    %407 = arith.addf %406, %405 : vector<8x128xf32>
    %408 = arith.divf %406, %407 : vector<8x128xf32>
    %409 = vector.extract_strided_slice %396 {offsets = [0, 256], sizes = [8, 128], strides = [1, 1]} : vector<8x512xf32> to vector<8x128xf32>
    %410 = math.tanh %409 : vector<8x128xf32>
    %411 = vector.extract_strided_slice %396 {offsets = [0, 384], sizes = [8, 128], strides = [1, 1]} : vector<8x512xf32> to vector<8x128xf32>
    %412 = arith.negf %411 : vector<8x128xf32>
    %413 = math.exp %412 : vector<8x128xf32>
    %cst_128 = arith.constant 1.000000e+00 : f32
    %414 = vector.broadcast %cst_128 : f32 to vector<8x128xf32>
    %415 = arith.addf %414, %413 : vector<8x128xf32>
    %416 = arith.divf %414, %415 : vector<8x128xf32>
    %417 = arith.mulf %408, %385 : vector<8x128xf32>
    %418 = arith.mulf %402, %410 : vector<8x128xf32>
    %419 = arith.addf %417, %418 : vector<8x128xf32>
    %420 = math.tanh %419 : vector<8x128xf32>
    %421 = arith.mulf %416, %420 : vector<8x128xf32>
    %422 = arith.index_cast %391 : i32 to index
    %c0_129 = arith.constant 0 : index
    %423 = vector.load %arg7[%422, %c0_129] : memref<64x128xf32, #tpu.memory_space<vmem>>, vector<8x128xf32>
    tpu.vector_store %arg7[%422, %c0_129], %421 {strides = array<i32>} : memref<64x128xf32, #tpu.memory_space<vmem>>, vector<8x128xf32>,
    %c4_i32_130 = arith.constant 4 : i32
    %c8_i32_131 = arith.constant 8 : i32
    %424 = arith.muli %c4_i32_130, %c8_i32_131 : i32
    %425 = tpu.assume_multiple %424, 8 : i32
    %426 = arith.index_cast %425 : i32 to index
    %c0_132 = arith.constant 0 : index
    %427 = vector.load %arg8[%426, %c0_132] : memref<64x512xf32, #tpu.memory_space<vmem>>, vector<8x512xf32>
    %c0_133 = arith.constant 0 : index
    %c0_134 = arith.constant 0 : index
    %428 = vector.load %arg5[%c0_133, %c0_134] : memref<128x512xf32, #tpu.memory_space<vmem>>, vector<128x512xf32>
    %cst_135 = arith.constant dense<0.000000e+00> : vector<8x512xf32>
    %429 = tpu.matmul %421, %428, %cst_135 {dimension_numbers = #tpu.dot_dimension_numbers<[1], [0], [0], [1], [0, 0, 1, 1], [], []>} : vector<8x128xf32>, vector<128x512xf32>, vector<8x512xf32> -> vector<8x512xf32>
    %430 = arith.addf %427, %429 : vector<8x512xf32>
    %431 = vector.extract_strided_slice %430 {offsets = [0, 0], sizes = [8, 128], strides = [1, 1]} : vector<8x512xf32> to vector<8x128xf32>
    %432 = arith.negf %431 : vector<8x128xf32>
    %433 = math.exp %432 : vector<8x128xf32>
    %cst_136 = arith.constant 1.000000e+00 : f32
    %434 = vector.broadcast %cst_136 : f32 to vector<8x128xf32>
    %435 = arith.addf %434, %433 : vector<8x128xf32>
    %436 = arith.divf %434, %435 : vector<8x128xf32>
    %437 = vector.extract_strided_slice %430 {offsets = [0, 128], sizes = [8, 128], strides = [1, 1]} : vector<8x512xf32> to vector<8x128xf32>
    %438 = arith.negf %437 : vector<8x128xf32>
    %439 = math.exp %438 : vector<8x128xf32>
    %cst_137 = arith.constant 1.000000e+00 : f32
    %440 = vector.broadcast %cst_137 : f32 to vector<8x128xf32>
    %441 = arith.addf %440, %439 : vector<8x128xf32>
    %442 = arith.divf %440, %441 : vector<8x128xf32>
    %443 = vector.extract_strided_slice %430 {offsets = [0, 256], sizes = [8, 128], strides = [1, 1]} : vector<8x512xf32> to vector<8x128xf32>
    %444 = math.tanh %443 : vector<8x128xf32>
    %445 = vector.extract_strided_slice %430 {offsets = [0, 384], sizes = [8, 128], strides = [1, 1]} : vector<8x512xf32> to vector<8x128xf32>
    %446 = arith.negf %445 : vector<8x128xf32>
    %447 = math.exp %446 : vector<8x128xf32>
    %cst_138 = arith.constant 1.000000e+00 : f32
    %448 = vector.broadcast %cst_138 : f32 to vector<8x128xf32>
    %449 = arith.addf %448, %447 : vector<8x128xf32>
    %450 = arith.divf %448, %449 : vector<8x128xf32>
    %451 = arith.mulf %442, %419 : vector<8x128xf32>
    %452 = arith.mulf %436, %444 : vector<8x128xf32>
    %453 = arith.addf %451, %452 : vector<8x128xf32>
    %454 = math.tanh %453 : vector<8x128xf32>
    %455 = arith.mulf %450, %454 : vector<8x128xf32>
    %456 = arith.index_cast %425 : i32 to index
    %c0_139 = arith.constant 0 : index
    %457 = vector.load %arg7[%456, %c0_139] : memref<64x128xf32, #tpu.memory_space<vmem>>, vector<8x128xf32>
    tpu.vector_store %arg7[%456, %c0_139], %455 {strides = array<i32>} : memref<64x128xf32, #tpu.memory_space<vmem>>, vector<8x128xf32>,
    %c5_i32_140 = arith.constant 5 : i32
    %c8_i32_141 = arith.constant 8 : i32
    %458 = arith.muli %c5_i32_140, %c8_i32_141 : i32
    %459 = tpu.assume_multiple %458, 8 : i32
    %460 = arith.index_cast %459 : i32 to index
    %c0_142 = arith.constant 0 : index
    %461 = vector.load %arg8[%460, %c0_142] : memref<64x512xf32, #tpu.memory_space<vmem>>, vector<8x512xf32>
    %c0_143 = arith.constant 0 : index
    %c0_144 = arith.constant 0 : index
    %462 = vector.load %arg5[%c0_143, %c0_144] : memref<128x512xf32, #tpu.memory_space<vmem>>, vector<128x512xf32>
    %cst_145 = arith.constant dense<0.000000e+00> : vector<8x512xf32>
    %463 = tpu.matmul %455, %462, %cst_145 {dimension_numbers = #tpu.dot_dimension_numbers<[1], [0], [0], [1], [0, 0, 1, 1], [], []>} : vector<8x128xf32>, vector<128x512xf32>, vector<8x512xf32> -> vector<8x512xf32>
    %464 = arith.addf %461, %463 : vector<8x512xf32>
    %465 = vector.extract_strided_slice %464 {offsets = [0, 0], sizes = [8, 128], strides = [1, 1]} : vector<8x512xf32> to vector<8x128xf32>
    %466 = arith.negf %465 : vector<8x128xf32>
    %467 = math.exp %466 : vector<8x128xf32>
    %cst_146 = arith.constant 1.000000e+00 : f32
    %468 = vector.broadcast %cst_146 : f32 to vector<8x128xf32>
    %469 = arith.addf %468, %467 : vector<8x128xf32>
    %470 = arith.divf %468, %469 : vector<8x128xf32>
    %471 = vector.extract_strided_slice %464 {offsets = [0, 128], sizes = [8, 128], strides = [1, 1]} : vector<8x512xf32> to vector<8x128xf32>
    %472 = arith.negf %471 : vector<8x128xf32>
    %473 = math.exp %472 : vector<8x128xf32>
    %cst_147 = arith.constant 1.000000e+00 : f32
    %474 = vector.broadcast %cst_147 : f32 to vector<8x128xf32>
    %475 = arith.addf %474, %473 : vector<8x128xf32>
    %476 = arith.divf %474, %475 : vector<8x128xf32>
    %477 = vector.extract_strided_slice %464 {offsets = [0, 256], sizes = [8, 128], strides = [1, 1]} : vector<8x512xf32> to vector<8x128xf32>
    %478 = math.tanh %477 : vector<8x128xf32>
    %479 = vector.extract_strided_slice %464 {offsets = [0, 384], sizes = [8, 128], strides = [1, 1]} : vector<8x512xf32> to vector<8x128xf32>
    %480 = arith.negf %479 : vector<8x128xf32>
    %481 = math.exp %480 : vector<8x128xf32>
    %cst_148 = arith.constant 1.000000e+00 : f32
    %482 = vector.broadcast %cst_148 : f32 to vector<8x128xf32>
    %483 = arith.addf %482, %481 : vector<8x128xf32>
    %484 = arith.divf %482, %483 : vector<8x128xf32>
    %485 = arith.mulf %476, %453 : vector<8x128xf32>
    %486 = arith.mulf %470, %478 : vector<8x128xf32>
    %487 = arith.addf %485, %486 : vector<8x128xf32>
    %488 = math.tanh %487 : vector<8x128xf32>
    %489 = arith.mulf %484, %488 : vector<8x128xf32>
    %490 = arith.index_cast %459 : i32 to index
    %c0_149 = arith.constant 0 : index
    %491 = vector.load %arg7[%490, %c0_149] : memref<64x128xf32, #tpu.memory_space<vmem>>, vector<8x128xf32>
    tpu.vector_store %arg7[%490, %c0_149], %489 {strides = array<i32>} : memref<64x128xf32, #tpu.memory_space<vmem>>, vector<8x128xf32>,
    %c6_i32_150 = arith.constant 6 : i32
    %c8_i32_151 = arith.constant 8 : i32
    %492 = arith.muli %c6_i32_150, %c8_i32_151 : i32
    %493 = tpu.assume_multiple %492, 8 : i32
    %494 = arith.index_cast %493 : i32 to index
    %c0_152 = arith.constant 0 : index
    %495 = vector.load %arg8[%494, %c0_152] : memref<64x512xf32, #tpu.memory_space<vmem>>, vector<8x512xf32>
    %c0_153 = arith.constant 0 : index
    %c0_154 = arith.constant 0 : index
    %496 = vector.load %arg5[%c0_153, %c0_154] : memref<128x512xf32, #tpu.memory_space<vmem>>, vector<128x512xf32>
    %cst_155 = arith.constant dense<0.000000e+00> : vector<8x512xf32>
    %497 = tpu.matmul %489, %496, %cst_155 {dimension_numbers = #tpu.dot_dimension_numbers<[1], [0], [0], [1], [0, 0, 1, 1], [], []>} : vector<8x128xf32>, vector<128x512xf32>, vector<8x512xf32> -> vector<8x512xf32>
    %498 = arith.addf %495, %497 : vector<8x512xf32>
    %499 = vector.extract_strided_slice %498 {offsets = [0, 0], sizes = [8, 128], strides = [1, 1]} : vector<8x512xf32> to vector<8x128xf32>
    %500 = arith.negf %499 : vector<8x128xf32>
    %501 = math.exp %500 : vector<8x128xf32>
    %cst_156 = arith.constant 1.000000e+00 : f32
    %502 = vector.broadcast %cst_156 : f32 to vector<8x128xf32>
    %503 = arith.addf %502, %501 : vector<8x128xf32>
    %504 = arith.divf %502, %503 : vector<8x128xf32>
    %505 = vector.extract_strided_slice %498 {offsets = [0, 128], sizes = [8, 128], strides = [1, 1]} : vector<8x512xf32> to vector<8x128xf32>
    %506 = arith.negf %505 : vector<8x128xf32>
    %507 = math.exp %506 : vector<8x128xf32>
    %cst_157 = arith.constant 1.000000e+00 : f32
    %508 = vector.broadcast %cst_157 : f32 to vector<8x128xf32>
    %509 = arith.addf %508, %507 : vector<8x128xf32>
    %510 = arith.divf %508, %509 : vector<8x128xf32>
    %511 = vector.extract_strided_slice %498 {offsets = [0, 256], sizes = [8, 128], strides = [1, 1]} : vector<8x512xf32> to vector<8x128xf32>
    %512 = math.tanh %511 : vector<8x128xf32>
    %513 = vector.extract_strided_slice %498 {offsets = [0, 384], sizes = [8, 128], strides = [1, 1]} : vector<8x512xf32> to vector<8x128xf32>
    %514 = arith.negf %513 : vector<8x128xf32>
    %515 = math.exp %514 : vector<8x128xf32>
    %cst_158 = arith.constant 1.000000e+00 : f32
    %516 = vector.broadcast %cst_158 : f32 to vector<8x128xf32>
    %517 = arith.addf %516, %515 : vector<8x128xf32>
    %518 = arith.divf %516, %517 : vector<8x128xf32>
    %519 = arith.mulf %510, %487 : vector<8x128xf32>
    %520 = arith.mulf %504, %512 : vector<8x128xf32>
    %521 = arith.addf %519, %520 : vector<8x128xf32>
    %522 = math.tanh %521 : vector<8x128xf32>
    %523 = arith.mulf %518, %522 : vector<8x128xf32>
    %524 = arith.index_cast %493 : i32 to index
    %c0_159 = arith.constant 0 : index
    %525 = vector.load %arg7[%524, %c0_159] : memref<64x128xf32, #tpu.memory_space<vmem>>, vector<8x128xf32>
    tpu.vector_store %arg7[%524, %c0_159], %523 {strides = array<i32>} : memref<64x128xf32, #tpu.memory_space<vmem>>, vector<8x128xf32>,
    %c7_i32_160 = arith.constant 7 : i32
    %c8_i32_161 = arith.constant 8 : i32
    %526 = arith.muli %c7_i32_160, %c8_i32_161 : i32
    %527 = tpu.assume_multiple %526, 8 : i32
    %528 = arith.index_cast %527 : i32 to index
    %c0_162 = arith.constant 0 : index
    %529 = vector.load %arg8[%528, %c0_162] : memref<64x512xf32, #tpu.memory_space<vmem>>, vector<8x512xf32>
    %c0_163 = arith.constant 0 : index
    %c0_164 = arith.constant 0 : index
    %530 = vector.load %arg5[%c0_163, %c0_164] : memref<128x512xf32, #tpu.memory_space<vmem>>, vector<128x512xf32>
    %cst_165 = arith.constant dense<0.000000e+00> : vector<8x512xf32>
    %531 = tpu.matmul %523, %530, %cst_165 {dimension_numbers = #tpu.dot_dimension_numbers<[1], [0], [0], [1], [0, 0, 1, 1], [], []>} : vector<8x128xf32>, vector<128x512xf32>, vector<8x512xf32> -> vector<8x512xf32>
    %532 = arith.addf %529, %531 : vector<8x512xf32>
    %533 = vector.extract_strided_slice %532 {offsets = [0, 0], sizes = [8, 128], strides = [1, 1]} : vector<8x512xf32> to vector<8x128xf32>
    %534 = arith.negf %533 : vector<8x128xf32>
    %535 = math.exp %534 : vector<8x128xf32>
    %cst_166 = arith.constant 1.000000e+00 : f32
    %536 = vector.broadcast %cst_166 : f32 to vector<8x128xf32>
    %537 = arith.addf %536, %535 : vector<8x128xf32>
    %538 = arith.divf %536, %537 : vector<8x128xf32>
    %539 = vector.extract_strided_slice %532 {offsets = [0, 128], sizes = [8, 128], strides = [1, 1]} : vector<8x512xf32> to vector<8x128xf32>
    %540 = arith.negf %539 : vector<8x128xf32>
    %541 = math.exp %540 : vector<8x128xf32>
    %cst_167 = arith.constant 1.000000e+00 : f32
    %542 = vector.broadcast %cst_167 : f32 to vector<8x128xf32>
    %543 = arith.addf %542, %541 : vector<8x128xf32>
    %544 = arith.divf %542, %543 : vector<8x128xf32>
    %545 = vector.extract_strided_slice %532 {offsets = [0, 256], sizes = [8, 128], strides = [1, 1]} : vector<8x512xf32> to vector<8x128xf32>
    %546 = math.tanh %545 : vector<8x128xf32>
    %547 = vector.extract_strided_slice %532 {offsets = [0, 384], sizes = [8, 128], strides = [1, 1]} : vector<8x512xf32> to vector<8x128xf32>
    %548 = arith.negf %547 : vector<8x128xf32>
    %549 = math.exp %548 : vector<8x128xf32>
    %cst_168 = arith.constant 1.000000e+00 : f32
    %550 = vector.broadcast %cst_168 : f32 to vector<8x128xf32>
    %551 = arith.addf %550, %549 : vector<8x128xf32>
    %552 = arith.divf %550, %551 : vector<8x128xf32>
    %553 = arith.mulf %544, %521 : vector<8x128xf32>
    %554 = arith.mulf %538, %546 : vector<8x128xf32>
    %555 = arith.addf %553, %554 : vector<8x128xf32>
    %556 = math.tanh %555 : vector<8x128xf32>
    %557 = arith.mulf %552, %556 : vector<8x128xf32>
    %558 = arith.index_cast %527 : i32 to index
    %c0_169 = arith.constant 0 : index
    %559 = vector.load %arg7[%558, %c0_169] : memref<64x128xf32, #tpu.memory_space<vmem>>, vector<8x128xf32>
    tpu.vector_store %arg7[%558, %c0_169], %557 {strides = array<i32>} : memref<64x128xf32, #tpu.memory_space<vmem>>, vector<8x128xf32>,
    %c8_i32_170 = arith.constant 8 : i32
    return
  }
}

</mosaic_0001>

<bundles_post_ra>
// kernel: question_caption_decoder_forward.1
= control target key start
LH: loop header
LB: loop body
LE: loop exit
PB: predicated region body
PF: predicated region fallthrough
CT: control target
= control target key end

     0   :  { %12 = vsyncpa [#allocation5], 0  ;;  %s7117_s0 = inlined_call_operand.vmem [shape: f32[64,64], index: 0, kind: input, shape index: {}]   ;;  %s7118_s1 = inlined_call_operand.vmem [shape: f32[64,512], index: 1, kind: input, shape index: {}]   ;;  %s7119_s2 = inlined_call_operand.hbm [shape: f32[128,512], index: 2, kind: input, shape index: {}]   ;;  %s7120_s3 = inlined_call_operand.vmem [shape: f32[1,512], index: 3, kind: input, shape index: {}]   ;;  %s7121_s4 = inlined_call_operand.hbm [shape: f32[128,512], index: 4, kind: input, shape index: {}]   ;;  %s7122_s5 = inlined_call_operand.hbm [shape: f32[128,512], index: 5, kind: input, shape index: {}]   ;;  %s7123_s6 = inlined_call_operand.vmem [shape: f32[1,512], index: 6, kind: input, shape index: {}]   ;;  %s7124_s7 = inlined_call_operand.vmem [shape: f32[64,128], index: 7, kind: output, shape index: {}]  }
   0x1   :  { %13 = vsyncpa [#allocation7], 0  ;;  %s5036_s24 = smov [#allocation6]   ;;  %s5037_s26 = smov [#allocation4]  }
   0x2   :  { %s37_s25 = sshll.u32 %s5036_s24, 4  ;;  %s23_s27 = sshll.u32 %s5037_s26, 4  ;;  %s38_s25 = int_to_ptr.vmem [resolvable:$true] %s37_s25  ;;  %s24_s27 = int_to_ptr.vmem [resolvable:$true] %s23_s27 }
   0x3   :  { %s4980_s28 = scalar_lea.vmem %s38_s25, 8192  ;;  %p4985_p1 = scmp.lt.s32.totalorder %s38_s25, %s38_s25 }
   0x4   :  { %p4981_p0 = scmp.ne.s32.totalorder %s38_s25, %s4980_s28  ;;  %p4986_p2 = scmp.lt.s32.totalorder %s4980_s28, %s4980_s28 }
   0x6   :  { %p4987_p3 = por %p4986_p2, %p4985_p1 }
   0x8   :  { %p4988_p4 = pnand %p4987_p3, %p4981_p0 }
   0xa   :  { %4991 = shalt.err (!%p4988_p4)
}
   0xb   :  { %s5038_s29 = smov 512   ;;  %s5039_s30 = smov 32  }
   0xc   :  { %43 = dma.hbm_to_vmem [thread:$0]  %s7121_s4, 8192, %s38_s25, [#allocation7], %s5038_s29, %s5038_s29, %s5039_s30  }
   0xd   :  { %s5000_s10 = scalar_lea.vmem %s24_s27, 8192  ;;  %p5005_p6 = scmp.lt.s32.totalorder %s24_s27, %s24_s27 }
   0xe   :  { %p5001_p5 = scmp.ne.s32.totalorder %s24_s27, %s5000_s10  ;;  %p5006_p7 = scmp.lt.s32.totalorder %s5000_s10, %s5000_s10 }
  0x10   :  { %p5007_p8 = por %p5006_p7, %p5005_p6 }
  0x12   :  { %p5008_p9 = pnand %p5007_p8, %p5001_p5 }
  0x14   :  { %5011 = shalt.err (!%p5008_p9)
}
  0x15   :  { %29 = dma.hbm_to_vmem [thread:$0]  %s7119_s2, 8192, %s24_s27, [#allocation5], %s5038_s29, %s5038_s29, %s5039_s30  }
  0x16   :  { %s5040_s13 = smov [#allocation8]  }
  0x17   :  { %s49_s14 = sshll.u32 %s5040_s13, 4  ;;  %s50_s14 = int_to_ptr.vmem [resolvable:$true] %s49_s14 }
  0x18   :  { %s5020_s15 = scalar_lea.vmem %s50_s14, 8192  ;;  %p5025_p11 = scmp.lt.s32.totalorder %s50_s14, %s50_s14 }
  0x19   :  { %p5021_p10 = scmp.ne.s32.totalorder %s50_s14, %s5020_s15  ;;  %p5026_p12 = scmp.lt.s32.totalorder %s5020_s15, %s5020_s15 }
  0x1b   :  { %p5027_p13 = por %p5026_p12, %p5025_p11 }
  0x1d   :  { %p5028_p0 = pnand %p5027_p13, %p5021_p10 }
  0x1f   :  { %5031 = shalt.err (!%p5028_p0)
}
  0x20   :  { %55 = dma.hbm_to_vmem [thread:$0]  %s7122_s5, 8192, %s50_s14, [#allocation7], %s5038_s29, %s5038_s29, %s5039_s30  }
  0x21   :  { %5032 = dma.done.wait [#allocation5], 8192  }
  0x22   :  { %5033 = vsyncadd [#allocation5], 4294959104 }
  0x23   :  { %5034 = dma.done.wait [#allocation7], 16384  }
  0x24   :  { %5035 = vsyncadd [#allocation7], 4294950912  ;;  %v7125_v0 = vmov 0.0   ;;  %v104_v1 = vld [vmem:[%s7118_s1 + $0xe8] sm:$0xff]  ;;  %v106_v2 = vld [vmem:[%s7118_s1 + $0xf8] sm:$0xff]  ;;  %vm129_vm0 = vcmask 523264  }
  0x25   :  { %218 = vmatprep.mubr.f32.mxu0 %v7125_v0  ;;  %331 = vmatprep.mubr.f32.mxu1 %v7125_v0  ;;  %v103_v3 = vld [vmem:[%s7118_s1 + $0xe0] sm:$0xff]  ;;  %v105_v4 = vld [vmem:[%s7118_s1 + $0xf0] sm:$0xff]  ;;  %v100_v5 = vld [vmem:[%s7118_s1 + $0xc8] sm:$0xff] }
  0x26   :  { %170 = vmatprep.subr.mxu0 %v104_v1  ;;  %283 = vmatprep.subr.mxu1 %v106_v2  ;;  %v102_v6 = vld [vmem:[%s7118_s1 + $0xd8] sm:$0xff]  ;;  %v99_v7 = vld [vmem:[%s7118_s1 + $0xc0] sm:$0xff]  ;;  %v101_v8 = vld [vmem:[%s7118_s1 + $0xd0] sm:$0xff] }
  0x27   :  { %171 = vmatpush1.msra.mxu0 %v103_v3  ;;  %284 = vmatpush1.msra.mxu1 %v105_v4  ;;  %v96_v9 = vld [vmem:[%s7118_s1 + $0xa8] sm:$0xff]  ;;  %v98_v10 = vld [vmem:[%s7118_s1 + $0xb8] sm:$0xff]  ;;  %v95_v11 = vld [vmem:[%s7118_s1 + $0xa0] sm:$0xff] }
  0x28   :  { %172 = vmatprep.subr.mxu0 %v100_v5  ;;  %285 = vmatprep.subr.mxu1 %v102_v6  ;;  %v97_v12 = vld [vmem:[%s7118_s1 + $0xb0] sm:$0xff]  ;;  %v92_v13 = vld [vmem:[%s7118_s1 + $0x88] sm:$0xff]  ;;  %v94_v14 = vld [vmem:[%s7118_s1 + $0x98] sm:$0xff] }
  0x29   :  { %173 = vmatpush1.msra.mxu0 %v99_v7  ;;  %286 = vmatpush1.msra.mxu1 %v101_v8  ;;  %v91_v15 = vld [vmem:[%s7118_s1 + $0x80] sm:$0xff]  ;;  %v93_v16 = vld [vmem:[%s7118_s1 + $0x90] sm:$0xff]  ;;  %v88_v17 = vld [vmem:[%s7118_s1 + $0x68] sm:$0xff] }
  0x2a   :  { %174 = vmatprep.subr.mxu0 %v96_v9  ;;  %287 = vmatprep.subr.mxu1 %v98_v10  ;;  %v90_v18 = vld [vmem:[%s7118_s1 + $0x78] sm:$0xff]  ;;  %v87_v19 = vld [vmem:[%s7118_s1 + $0x60] sm:$0xff]  ;;  %v89_v20 = vld [vmem:[%s7118_s1 + $0x70] sm:$0xff] }
  0x2b   :  { %175 = vmatpush1.msra.mxu0 %v95_v11  ;;  %288 = vmatpush1.msra.mxu1 %v97_v12  ;;  %v84_v21 = vld [vmem:[%s7118_s1 + $0x48] sm:$0xff]  ;;  %v86_v22 = vld [vmem:[%s7118_s1 + $0x58] sm:$0xff]  ;;  %v83_v23 = vld [vmem:[%s7118_s1 + $0x40] sm:$0xff] }
  0x2c   :  { %176 = vmatprep.subr.mxu0 %v92_v13  ;;  %289 = vmatprep.subr.mxu1 %v94_v14  ;;  %v85_v24 = vld [vmem:[%s7118_s1 + $0x50] sm:$0xff]  ;;  %v80_v25 = vld [vmem:[%s7118_s1 + $0x28] sm:$0xff]  ;;  %v82_v26 = vld [vmem:[%s7118_s1 + $0x38] sm:$0xff] }
  0x2d   :  { %177 = vmatpush1.msra.mxu0 %v91_v15  ;;  %290 = vmatpush1.msra.mxu1 %v93_v16  ;;  %v79_v27 = vld [vmem:[%s7118_s1 + $0x20] sm:$0xff]  ;;  %v81_v28 = vld [vmem:[%s7118_s1 + $0x30] sm:$0xff]  ;;  %v76_v29 = vld [vmem:[%s7118_s1 + $0x8] sm:$0xff] }
  0x2e   :  { %178 = vmatprep.subr.mxu0 %v88_v17  ;;  %291 = vmatprep.subr.mxu1 %v90_v18  ;;  %v78_v30 = vld [vmem:[%s7118_s1 + $0x18] sm:$0xff]  ;;  %v75_v31 = vld [vmem:[%s7118_s1] sm:$0xff]  ;;  %v77_v32 = vld [vmem:[%s7118_s1 + $0x10] sm:$0xff] }
  0x2f   :  { %179 = vmatpush1.msra.mxu0 %v87_v19  ;;  %292 = vmatpush1.msra.mxu1 %v89_v20  ;;  %v67_v33 = vld [vmem:[%s7117_s0] sm:$0xff]  ;;  %v5192_v34 = vld [vmem:[#allocation4 + $0x1e8] sm:$0xff]  ;;  %v5194_v35 = vld [vmem:[#allocation4 + $0x1f8] sm:$0xff] }
  0x30   :  { %180 = vmatprep.subr.mxu0 %v84_v21  ;;  %293 = vmatprep.subr.mxu1 %v86_v22  ;;  %v5196_v36 = vld [vmem:[#allocation4 + $0x1e0] sm:$0xff]  ;;  %v5198_v37 = vld [vmem:[#allocation4 + $0x1f0] sm:$0xff]  ;;  %v5202_v38 = vld [vmem:[#allocation4 + $0x1c8] sm:$0xff] }
  0x31   :  { %181 = vmatpush1.msra.mxu0 %v83_v23  ;;  %294 = vmatpush1.msra.mxu1 %v85_v24  ;;  %v5204_v39 = vld [vmem:[#allocation4 + $0x1d8] sm:$0xff]  ;;  %v5210_v40 = vld [vmem:[#allocation4 + $0x1c0] sm:$0xff]  ;;  %v5212_v41 = vld [vmem:[#allocation4 + $0x1d0] sm:$0xff] }
  0x32   :  { %182 = vmatprep.subr.mxu0 %v80_v25  ;;  %295 = vmatprep.subr.mxu1 %v82_v26  ;;  %v68_v42 = vld [vmem:[%s7117_s0 + $0x8] sm:$0xff]  ;;  %v5223_v44 = vld [vmem:[#allocation4 + $0x1b8] sm:$0xff]  ;;  %v5227_v45 = vld [vmem:[#allocation4 + $0x1a0] sm:$0xff] }
  0x33   :  { %183 = vmatpush1.msra.mxu0 %v79_v27  ;;  %296 = vmatpush1.msra.mxu1 %v81_v28  ;;  %v5221_v43 = vld [vmem:[#allocation4 + $0x1a8] sm:$0xff]  ;;  %v5229_v46 = vld [vmem:[#allocation4 + $0x1b0] sm:$0xff]  ;;  %v5235_v48 = vld [vmem:[#allocation4 + $0x198] sm:$0xff] }
  0x34   :  { %184 = vmatprep.subr.mxu0 %v76_v29  ;;  %297 = vmatprep.subr.mxu1 %v78_v30  ;;  %v5233_v47 = vld [vmem:[#allocation4 + $0x188] sm:$0xff]  ;;  %v5241_v49 = vld [vmem:[#allocation4 + $0x180] sm:$0xff]  ;;  %v5243_v50 = vld [vmem:[#allocation4 + $0x190] sm:$0xff] }
  0x35   :  { %185 = vmatpush1.msra.mxu0 %v75_v31  ;;  %298 = vmatpush1.msra.mxu1 %v77_v32  ;;  %v69_v51 = vld [vmem:[%s7117_s0 + $0x10] sm:$0xff]  ;;  %v5252_v52 = vld [vmem:[#allocation4 + $0x168] sm:$0xff]  ;;  %v5254_v53 = vld [vmem:[#allocation4 + $0x178] sm:$0xff] }
  0x36   :  { %4639 = vmatmul.mubr.msk.f32.vlgmr.msra.gmra.mxu0 %vm129_vm0, %v67_v33  ;;  %4647 = vmatmul.mubr.msk.f32.vlgmr.msra.gmra.mxu1 %vm129_vm0, %v67_v33  ;;  %v5258_v54 = vld [vmem:[#allocation4 + $0x160] sm:$0xff]  ;;  %v5260_v55 = vld [vmem:[#allocation4 + $0x170] sm:$0xff]  ;;  %v5264_v56 = vld [vmem:[#allocation4 + $0x148] sm:$0xff] }
  0x37   :  { %483 = vmatprep.subr.mxu0 %v5192_v34  ;;  %554 = vmatprep.subr.mxu1 %v5194_v35  ;;  %v5266_v57 = vld [vmem:[#allocation4 + $0x158] sm:$0xff]  ;;  %v5272_v58 = vld [vmem:[#allocation4 + $0x140] sm:$0xff]  ;;  %v5274_v59 = vld [vmem:[#allocation4 + $0x150] sm:$0xff] }
  0x38   :  { %484 = vmatpush1.msra.mxu0 %v5196_v36  ;;  %555 = vmatpush1.msra.mxu1 %v5198_v37  ;;  %v70_v60 = vld [vmem:[%s7117_s0 + $0x18] sm:$0xff]  ;;  %v5283_v61 = vld [vmem:[#allocation4 + $0x128] sm:$0xff]  ;;  %v5289_v63 = vld [vmem:[#allocation4 + $0x120] sm:$0xff] }
  0x39   :  { %485 = vmatprep.subr.mxu0 %v5202_v38  ;;  %556 = vmatprep.subr.mxu1 %v5204_v39  ;;  %v5285_v62 = vld [vmem:[#allocation4 + $0x138] sm:$0xff]  ;;  %v5291_v1 = vld [vmem:[#allocation4 + $0x130] sm:$0xff]  ;;  %v5295_v2 = vld [vmem:[#allocation4 + $0x108] sm:$0xff] }
  0x3a   :  { %224 = vmatprep.mubr.f32.mxu0 %v7125_v0  ;;  %337 = vmatprep.mubr.f32.mxu1 %v7125_v0  ;;  %v5297_v3 = vld [vmem:[#allocation4 + $0x118] sm:$0xff]  ;;  %v5303_v4 = vld [vmem:[#allocation4 + $0x100] sm:$0xff]  ;;  %v5305_v5 = vld [vmem:[#allocation4 + $0x110] sm:$0xff] }
  0x3b   :  { %486 = vmatpush1.msra.mxu0 %v5210_v40  ;;  %557 = vmatpush1.msra.mxu1 %v5212_v41  ;;  %v71_v6 = vld [vmem:[%s7117_s0 + $0x20] sm:$0xff]  ;;  %v5314_v7 = vld [vmem:[#allocation4 + $0xe8] sm:$0xff]  ;;  %v5316_v8 = vld [vmem:[#allocation4 + $0xf8] sm:$0xff] }
  0x3c   :  { %4640 = vmatmul.mubr.msk.f32.gmra.mxu0 %vm129_vm0, %v68_v42  ;;  %4648 = vmatmul.mubr.msk.f32.gmra.mxu1 %vm129_vm0, %v68_v42  ;;  %v5320_v9 = vld [vmem:[#allocation4 + $0xe0] sm:$0xff]  ;;  %v5322_v10 = vld [vmem:[#allocation4 + $0xf0] sm:$0xff]  ;;  %v5326_v11 = vld [vmem:[#allocation4 + $0xc8] sm:$0xff] }
  0x3d   :  { %487 = vmatprep.subr.mxu0 %v5221_v43  ;;  %558 = vmatprep.subr.mxu1 %v5223_v44  ;;  %v5328_v12 = vld [vmem:[#allocation4 + $0xd8] sm:$0xff]  ;;  %v5334_v13 = vld [vmem:[#allocation4 + $0xc0] sm:$0xff]  ;;  %v5336_v14 = vld [vmem:[#allocation4 + $0xd0] sm:$0xff] }
  0x3e   :  { %488 = vmatpush1.msra.mxu0 %v5227_v45  ;;  %559 = vmatpush1.msra.mxu1 %v5229_v46  ;;  %v72_v15 = vld [vmem:[%s7117_s0 + $0x28] sm:$0xff]  ;;  %v5347_v17 = vld [vmem:[#allocation4 + $0xb8] sm:$0xff]  ;;  %v5351_v18 = vld [vmem:[#allocation4 + $0xa0] sm:$0xff] }
  0x3f   :  { %489 = vmatprep.subr.mxu0 %v5233_v47  ;;  %560 = vmatprep.subr.mxu1 %v5235_v48  ;;  %v5345_v16 = vld [vmem:[#allocation4 + $0xa8] sm:$0xff]  ;;  %v5353_v19 = vld [vmem:[#allocation4 + $0xb0] sm:$0xff]  ;;  %v5359_v21 = vld [vmem:[#allocation4 + $0x98] sm:$0xff] }
  0x40   :  { %230 = vmatprep.mubr.f32.mxu0 %v7125_v0  ;;  %343 = vmatprep.mubr.f32.mxu1 %v7125_v0  ;;  %7309 = vst [vmem:[#allocation11_spill] sm:$0xff] %v5353_v19  ;;  %v5357_v20 = vld [vmem:[#allocation4 + $0x88] sm:$0xff]  ;;  %7311 = vst [vmem:[#allocation13_spill] sm:$0xff] %v5359_v21  ;;  %v5365_v22 = vld [vmem:[#allocation4 + $0x80] sm:$0xff] }
  0x41   :  { %490 = vmatpush1.msra.mxu0 %v5241_v49  ;;  %561 = vmatpush1.msra.mxu1 %v5243_v50  ;;  %7310 = vst [vmem:[#allocation12_spill] sm:$0xff] %v5357_v20  ;;  %7312 = vst [vmem:[#allocation14_spill] sm:$0xff] %v5365_v22  ;;  %v5367_v23 = vld [vmem:[#allocation4 + $0x90] sm:$0xff]  ;;  %v5376_v25 = vld [vmem:[#allocation4 + $0x68] sm:$0xff] }
  0x42   :  { %4641 = vmatmul.mubr.msk.f32.gmra.mxu0 %vm129_vm0, %v69_v51  ;;  %4649 = vmatmul.mubr.msk.f32.gmra.mxu1 %vm129_vm0, %v69_v51  ;;  %7313 = vst [vmem:[#allocation15_spill] sm:$0xff] %v5367_v23  ;;  %v73_v24 = vld [vmem:[%s7117_s0 + $0x30] sm:$0xff]  ;;  %7314 = vst [vmem:[#allocation16_spill] sm:$0xff] %v5376_v25  ;;  %v5378_v26 = vld [vmem:[#allocation4 + $0x78] sm:$0xff] }
  0x43   :  { %491 = vmatprep.subr.mxu0 %v5252_v52  ;;  %562 = vmatprep.subr.mxu1 %v5254_v53  ;;  %7315 = vst [vmem:[#allocation17_spill] sm:$0xff] %v5378_v26  ;;  %v5382_v27 = vld [vmem:[#allocation4 + $0x60] sm:$0xff]  ;;  %v5384_v28 = vld [vmem:[#allocation4 + $0x70] sm:$0xff]  ;;  %v5388_v29 = vld [vmem:[#allocation4 + $0x48] sm:$0xff] }
  0x44   :  { %492 = vmatpush1.msra.mxu0 %v5258_v54  ;;  %563 = vmatpush1.msra.mxu1 %v5260_v55  ;;  %7316 = vst [vmem:[#allocation18_spill] sm:$0xff] %v5382_v27  ;;  %7317 = vst [vmem:[#allocation19_spill] sm:$0xff] %v5384_v28  ;;  %v5390_v30 = vld [vmem:[#allocation4 + $0x58] sm:$0xff]  ;;  %v5396_v31 = vld [vmem:[#allocation4 + $0x40] sm:$0xff] }
  0x45   :  { %493 = vmatprep.subr.mxu0 %v5264_v56  ;;  %564 = vmatprep.subr.mxu1 %v5266_v57  ;;  %7318 = vst [vmem:[#allocation20_spill] sm:$0xff] %v5388_v29  ;;  %7319 = vst [vmem:[#allocation21_spill] sm:$0xff] %v5390_v30  ;;  %v5398_v32 = vld [vmem:[#allocation4 + $0x50] sm:$0xff]  ;;  %v74_v33 = vld [vmem:[%s7117_s0 + $0x38] sm:$0xff] }
  0x46   :  { %236 = vmatprep.mubr.f32.mxu0 %v7125_v0  ;;  %349 = vmatprep.mubr.f32.mxu1 %v7125_v0  ;;  %7320 = vst [vmem:[#allocation22_spill] sm:$0xff] %v5396_v31  ;;  %7321 = vst [vmem:[#allocation23_spill] sm:$0xff] %v5398_v32  ;;  %v5407_v42 = vld [vmem:[#allocation4 + $0x28] sm:$0xff]  ;;  %v5409_v51 = vld [vmem:[#allocation4 + $0x38] sm:$0xff] }
  0x47   :  { %494 = vmatpush1.msra.mxu0 %v5272_v58  ;;  %565 = vmatpush1.msra.mxu1 %v5274_v59  ;;  %7322 = vst [vmem:[#allocation24_spill] sm:$0xff] %v5407_v42  ;;  %7323 = vst [vmem:[#allocation25_spill] sm:$0xff] %v5409_v51 }
  0x48   :  { %4642 = vmatmul.mubr.msk.f32.gmra.mxu0 %vm129_vm0, %v70_v60  ;;  %4650 = vmatmul.mubr.msk.f32.gmra.mxu1 %vm129_vm0, %v70_v60  ;;  %v5413_v60 = vld [vmem:[#allocation4 + $0x20] sm:$0xff] }
  0x49   :  { %495 = vmatprep.subr.mxu0 %v5283_v61  ;;  %566 = vmatprep.subr.mxu1 %v5285_v62  ;;  %7324 = vst [vmem:[#allocation26_spill] sm:$0xff] %v5413_v60 }
  0x4a   :  { %496 = vmatpush1.msra.mxu0 %v5289_v63  ;;  %567 = vmatpush1.msra.mxu1 %v5291_v1 }
  0x4b   :  { %497 = vmatprep.subr.mxu0 %v5295_v2  ;;  %568 = vmatprep.subr.mxu1 %v5297_v3 }
  0x4c   :  { %242 = vmatprep.mubr.f32.mxu0 %v7125_v0  ;;  %355 = vmatprep.mubr.f32.mxu1 %v7125_v0 }
  0x4d   :  { %498 = vmatpush1.msra.mxu0 %v5303_v4  ;;  %569 = vmatpush1.msra.mxu1 %v5305_v5 }
  0x4e   :  { %4643 = vmatmul.mubr.msk.f32.gmra.mxu0 %vm129_vm0, %v71_v6  ;;  %4651 = vmatmul.mubr.msk.f32.gmra.mxu1 %vm129_vm0, %v71_v6  ;;  %v5415_v6 = vld [vmem:[#allocation4 + $0x30] sm:$0xff] }
  0x4f   :  { %499 = vmatprep.subr.mxu0 %v5314_v7  ;;  %570 = vmatprep.subr.mxu1 %v5316_v8  ;;  %7325 = vst [vmem:[#allocation27_spill] sm:$0xff] %v5415_v6 }
  0x50   :  { %500 = vmatpush1.msra.mxu0 %v5320_v9  ;;  %571 = vmatpush1.msra.mxu1 %v5322_v10 }
  0x51   :  { %501 = vmatprep.subr.mxu0 %v5326_v11  ;;  %572 = vmatprep.subr.mxu1 %v5328_v12 }
  0x52   :  { %248 = vmatprep.mubr.f32.mxu0 %v7125_v0  ;;  %361 = vmatprep.mubr.f32.mxu1 %v7125_v0 }
  0x53   :  { %502 = vmatpush1.msra.mxu0 %v5334_v13  ;;  %573 = vmatpush1.msra.mxu1 %v5336_v14 }
  0x54   :  { %4644 = vmatmul.mubr.msk.f32.gmra.mxu0 %vm129_vm0, %v72_v15  ;;  %4652 = vmatmul.mubr.msk.f32.gmra.mxu1 %vm129_vm0, %v72_v15  ;;  %v5419_v15 = vld [vmem:[#allocation4 + $0x8] sm:$0xff] }
  0x55   :  { %503 = vmatprep.subr.mxu0 %v5345_v16  ;;  %574 = vmatprep.subr.mxu1 %v5347_v17  ;;  %7326 = vst [vmem:[#allocation28_spill] sm:$0xff] %v5419_v15 }
  0x56   :  { %504 = vmatpush1.msra.mxu0 %v5351_v18  ;;  %575 = vmatpush1.msra.mxu1 %v5353_v19 }
  0x57   :  { %505 = vmatprep.subr.mxu0 %v5357_v20  ;;  %576 = vmatprep.subr.mxu1 %v5359_v21 }
  0x58   :  { %254 = vmatprep.mubr.f32.mxu0 %v7125_v0  ;;  %367 = vmatprep.mubr.f32.mxu1 %v7125_v0 }
  0x59   :  { %506 = vmatpush1.msra.mxu0 %v5365_v22  ;;  %577 = vmatpush1.msra.mxu1 %v5367_v23 }
  0x5a   :  { %4645 = vmatmul.mubr.msk.f32.gmra.mxu0 %vm129_vm0, %v73_v24  ;;  %4653 = vmatmul.mubr.msk.f32.gmra.mxu1 %vm129_vm0, %v73_v24  ;;  %v5421_v24 = vld [vmem:[#allocation4 + $0x18] sm:$0xff] }
  0x5b   :  { %507 = vmatprep.subr.mxu0 %v5376_v25  ;;  %578 = vmatprep.subr.mxu1 %v5378_v26  ;;  %7327 = vst [vmem:[#allocation29_spill] sm:$0xff] %v5421_v24 }
  0x5c   :  { %508 = vmatpush1.msra.mxu0 %v5382_v27  ;;  %579 = vmatpush1.msra.mxu1 %v5384_v28 }
  0x5d   :  { %509 = vmatprep.subr.mxu0 %v5388_v29  ;;  %580 = vmatprep.subr.mxu1 %v5390_v30 }
  0x5e   :  { %260 = vmatprep.mubr.f32.mxu0 %v7125_v0  ;;  %373 = vmatprep.mubr.f32.mxu1 %v7125_v0  ;;  %v5425_v0 = vld [vmem:[#allocation4] sm:$0xff] }
  0x5f   :  { %510 = vmatpush1.msra.mxu0 %v5396_v31  ;;  %581 = vmatpush1.msra.mxu1 %v5398_v32  ;;  %7328 = vst [vmem:[#allocation30_spill] sm:$0xff] %v5425_v0  ;;  %v5429_v32 = vld [vmem:[#allocation4 + $0x10] sm:$0xff] }
  0x60   :  { %4646 = vmatmul.mubr.msk.f32.gmra.mxu0 %vm129_vm0, %v74_v33  ;;  %4654 = vmatmul.mubr.msk.f32.gmra.mxu1 %vm129_vm0, %v74_v33  ;;  %7329 = vst [vmem:[#allocation31_spill] sm:$0xff] %v5429_v32  ;;  %v7330_v33 = vmov 0.0  }
  0x61   :  { %511 = vmatprep.subr.mxu0 %v5407_v42  ;;  %582 = vmatprep.subr.mxu1 %v5409_v51 }
  0x62   :  { %512 = vmatpush1.msra.mxu0 %v5413_v60  ;;  %583 = vmatpush1.msra.mxu1 %v5415_v6 }
  0x63   :  { %513 = vmatprep.subr.mxu0 %v5419_v15  ;;  %584 = vmatprep.subr.mxu1 %v5421_v24 }
  0x64   :  { %514 = vmatpush1.msra.mxu0 %v5425_v0  ;;  %547 = vmatprep.mubr.f32.mxu0 %v7330_v33 }
  0x65   :  { %585 = vmatpush1.msra.mxu1 %v5429_v32  ;;  %618 = vmatprep.mubr.f32.mxu1 %v7330_v33 }
  0x66   :  { %548 = vmatmul.mubr.f32.vlgmr.msra.gmra.mxu0 %v7330_v33  ;;  %619 = vmatmul.mubr.f32.vlgmr.msra.gmra.mxu1 %v7330_v33 }
  0x67   :  { %725 = vmatprep.subr.mxu0 %v5192_v34  ;;  %796 = vmatprep.subr.mxu1 %v5194_v35 }
  0x68   :  { %726 = vmatpush1.msra.mxu0 %v5196_v36  ;;  %797 = vmatpush1.msra.mxu1 %v5198_v37 }
  0x69   :  { %727 = vmatprep.subr.mxu0 %v5202_v38  ;;  %798 = vmatprep.subr.mxu1 %v5204_v39 }
  0x6a   :  { %728 = vmatpush1.msra.mxu0 %v5210_v40  ;;  %799 = vmatpush1.msra.mxu1 %v5212_v41 }
  0x6b   :  { %729 = vmatprep.subr.mxu0 %v5221_v43  ;;  %800 = vmatprep.subr.mxu1 %v5223_v44 }
  0x6c   :  { %730 = vmatpush1.msra.mxu0 %v5227_v45  ;;  %801 = vmatpush1.msra.mxu1 %v5229_v46 }
  0x6d   :  { %731 = vmatprep.subr.mxu0 %v5233_v47  ;;  %802 = vmatprep.subr.mxu1 %v5235_v48 }
  0x6e   :  { %732 = vmatpush1.msra.mxu0 %v5241_v49  ;;  %803 = vmatpush1.msra.mxu1 %v5243_v50 }
  0x6f   :  { %733 = vmatprep.subr.mxu0 %v5252_v52  ;;  %804 = vmatprep.subr.mxu1 %v5254_v53 }
  0x70   :  { %734 = vmatpush1.msra.mxu0 %v5258_v54  ;;  %805 = vmatpush1.msra.mxu1 %v5260_v55 }
  0x71   :  { %735 = vmatprep.subr.mxu0 %v5264_v56  ;;  %806 = vmatprep.subr.mxu1 %v5266_v57 }
  0x72   :  { %736 = vmatpush1.msra.mxu0 %v5272_v58  ;;  %807 = vmatpush1.msra.mxu1 %v5274_v59 }
  0x73   :  { %737 = vmatprep.subr.mxu0 %v5283_v61  ;;  %808 = vmatprep.subr.mxu1 %v5285_v62 }
  0x74   :  { %738 = vmatpush1.msra.mxu0 %v5289_v63  ;;  %809 = vmatpush1.msra.mxu1 %v5291_v1 }
  0x75   :  { %739 = vmatprep.subr.mxu0 %v5295_v2  ;;  %810 = vmatprep.subr.mxu1 %v5297_v3 }
  0x76   :  { %740 = vmatpush1.msra.mxu0 %v5303_v4  ;;  %811 = vmatpush1.msra.mxu1 %v5305_v5 }
  0x77   :  { %741 = vmatprep.subr.mxu0 %v5314_v7  ;;  %812 = vmatprep.subr.mxu1 %v5316_v8 }
  0x78   :  { %742 = vmatpush1.msra.mxu0 %v5320_v9  ;;  %813 = vmatpush1.msra.mxu1 %v5322_v10 }
  0x79   :  { %743 = vmatprep.subr.mxu0 %v5326_v11  ;;  %814 = vmatprep.subr.mxu1 %v5328_v12 }
  0x7a   :  { %744 = vmatpush1.msra.mxu0 %v5334_v13  ;;  %815 = vmatpush1.msra.mxu1 %v5336_v14 }
  0x7b   :  { %745 = vmatprep.subr.mxu0 %v5345_v16  ;;  %816 = vmatprep.subr.mxu1 %v5347_v17 }
  0x7c   :  { %746 = vmatpush1.msra.mxu0 %v5351_v18  ;;  %817 = vmatpush1.msra.mxu1 %v5353_v19 }
  0x7d   :  { %747 = vmatprep.subr.mxu0 %v5357_v20  ;;  %818 = vmatprep.subr.mxu1 %v5359_v21  ;;  %v7331_v20 = vld [vmem:[#allocation23_spill] sm:$0xff] }
  0x7e   :  { %748 = vmatpush1.msra.mxu0 %v5365_v22  ;;  %819 = vmatpush1.msra.mxu1 %v5367_v23 }
  0x7f   :  { %749 = vmatprep.subr.mxu0 %v5376_v25  ;;  %820 = vmatprep.subr.mxu1 %v5378_v26 }
  0x80   :  { %750 = vmatpush1.msra.mxu0 %v5382_v27  ;;  %821 = vmatpush1.msra.mxu1 %v5384_v28 }
  0x81   :  { %751 = vmatprep.subr.mxu0 %v5388_v29  ;;  %822 = vmatprep.subr.mxu1 %v5390_v30 }
  0x82   :  { %752 = vmatpush1.msra.mxu0 %v5396_v31  ;;  %823 = vmatpush1.msra.mxu1 %v7331_v20 }
  0x83   :  { %753 = vmatprep.subr.mxu0 %v5407_v42  ;;  %824 = vmatprep.subr.mxu1 %v5409_v51  ;;  %v109_v51 = vlaneseq }
  0x84   :  { %754 = vmatpush1.msra.mxu0 %v5413_v60  ;;  %825 = vmatpush1.msra.mxu1 %v5415_v6 }
  0x85   :  { %755 = vmatprep.subr.mxu0 %v5419_v15  ;;  %826 = vmatprep.subr.mxu1 %v5421_v24  ;;  %v5507_v60 = vshrl.u32 %v109_v51, 7 }
  0x86   :  { %756 = vmatpush1.msra.mxu0 %v5425_v0  ;;  %789 = vmatprep.mubr.f32.mxu0 %v7330_v33 }
  0x87   :  { %827 = vmatpush1.msra.mxu1 %v5429_v32  ;;  %860 = vmatprep.mubr.f32.mxu1 %v7330_v33  ;;  %7332 = vst [vmem:[#allocation32_spill] sm:$0xff] %v5507_v60  ;;  %v7146_v24 = vsub.s32 0, %v5507_v60  ;;  %v7148_v0 = vsub.s32 2, %v5507_v60  ;;  %v107_v32 = vld [vmem:[%s7120_s3] sm:$0xf]  ;;  %v7153_v51 = vsub.s32 3, %v5507_v60 }
  0x88   :  { %968 = vmatprep.subr.mxu0 %v5192_v34  ;;  %1039 = vmatprep.subr.mxu1 %v5194_v35  ;;  %v7152_v35 = vsub.s32 1, %v5507_v60 }
  0x89   :  { %v112_v42 = vrot.slane %v107_v32, %v7146_v24  ;;  %v5528_v20 = vrot.slane %v107_v32, %v7148_v0  ;;  %v5534_v28 = vrot.slane %v107_v32, %v7153_v51 }
  0x8a   :  { %v116_v29 = vrot.slane %v107_v32, %v7152_v35 }
  0xf6   :  { %v5509_v6 = vpop.f32.mrf.mxu0  ;;  %v5511_v15 = vpop.f32.mrf.mxu1 }
  0xf8   :  { %v5518_v33 = vpop.f32.mrf.mxu0  ;;  %v5520_v34 = vpop.f32.mrf.mxu1 }
  0xfc   :  { %v226_v31 = vpop.f32.mrf.mxu0  ;;  %v339_v30 = vpop.f32.mrf.mxu1 }
  0xfd   :  { %v5536_v27 = vadd.f32 %v226_v31, %v112_v42  ;;  %v5539_v26 = vadd.f32 %v339_v30, %v5528_v20 }
  0xfe   :  { %v228_v25 = vpop.f32.mrf.mxu0  ;;  %v341_v24 = vpop.f32.mrf.mxu1 }
  0xff   :  { %7333 = vst [vmem:[#allocation33_spill] sm:$0xff] %v5539_v26  ;;  %v5541_v23 = vadd.f32 %v228_v25, %v116_v29  ;;  %v5544_v0 = vadd.f32 %v341_v24, %v5534_v28 }
 0x101   :  { %7334 = vst [vmem:[#allocation34_spill] sm:$0xff] %v5541_v23  ;;  %7335 = vst [vmem:[#allocation35_spill] sm:$0xff] %v5544_v0 }
 0x102   :  { %v232_v22 = vpop.f32.mrf.mxu0  ;;  %v345_v21 = vpop.f32.mrf.mxu1 }
 0x103   :  { %v5546_v19 = vadd.f32 %v232_v22, %v112_v42  ;;  %v5549_v35 = vadd.f32 %v345_v21, %v5528_v20 }
 0x104   :  { %v234_v32 = vpop.f32.mrf.mxu0  ;;  %v347_v31 = vpop.f32.mrf.mxu1 }
 0x105   :  { %7336 = vst [vmem:[#allocation36_spill] sm:$0xff] %v5546_v19  ;;  %7337 = vst [vmem:[#allocation37_spill] sm:$0xff] %v5549_v35  ;;  %v5551_v51 = vadd.f32 %v234_v32, %v116_v29  ;;  %v5554_v30 = vadd.f32 %v347_v31, %v5534_v28 }
 0x107   :  { %7338 = vst [vmem:[#allocation38_spill] sm:$0xff] %v5551_v51  ;;  %7339 = vst [vmem:[#allocation39_spill] sm:$0xff] %v5554_v30 }
 0x108   :  { %v238_v60 = vpop.f32.mrf.mxu0  ;;  %v351_v25 = vpop.f32.mrf.mxu1 }
 0x109   :  { %v5556_v26 = vadd.f32 %v238_v60, %v112_v42  ;;  %v5559_v24 = vadd.f32 %v351_v25, %v5528_v20 }
 0x10a   :  { %v240_v0 = vpop.f32.mrf.mxu0  ;;  %v353_v22 = vpop.f32.mrf.mxu1 }
 0x10b   :  { %7340 = vst [vmem:[#allocation40_spill] sm:$0xff] %v5556_v26  ;;  %7341 = vst [vmem:[#allocation41_spill] sm:$0xff] %v5559_v24  ;;  %v5561_v19 = vadd.f32 %v240_v0, %v116_v29  ;;  %v5564_v21 = vadd.f32 %v353_v22, %v5534_v28 }
 0x10d   :  { %7342 = vst [vmem:[#allocation42_spill] sm:$0xff] %v5561_v19  ;;  %7343 = vst [vmem:[#allocation43_spill] sm:$0xff] %v5564_v21 }
 0x10e   :  { %v244_v35 = vpop.f32.mrf.mxu0  ;;  %v357_v32 = vpop.f32.mrf.mxu1 }
 0x10f   :  { %v5566_v51 = vadd.f32 %v244_v35, %v112_v42  ;;  %v5569_v31 = vadd.f32 %v357_v32, %v5528_v20 }
 0x110   :  { %v246_v30 = vpop.f32.mrf.mxu0  ;;  %v359_v60 = vpop.f32.mrf.mxu1 }
 0x111   :  { %7344 = vst [vmem:[#allocation44_spill] sm:$0xff] %v5566_v51  ;;  %7345 = vst [vmem:[#allocation45_spill] sm:$0xff] %v5569_v31  ;;  %v5571_v26 = vadd.f32 %v246_v30, %v116_v29  ;;  %v5574_v25 = vadd.f32 %v359_v60, %v5534_v28 }
 0x113   :  { %7346 = vst [vmem:[#allocation46_spill] sm:$0xff] %v5571_v26  ;;  %7347 = vst [vmem:[#allocation47_spill] sm:$0xff] %v5574_v25 }
 0x114   :  { %v250_v24 = vpop.f32.mrf.mxu0  ;;  %v363_v0 = vpop.f32.mrf.mxu1 }
 0x115   :  { %v5576_v19 = vadd.f32 %v250_v24, %v112_v42  ;;  %v5579_v22 = vadd.f32 %v363_v0, %v5528_v20 }
 0x116   :  { %v252_v21 = vpop.f32.mrf.mxu0  ;;  %v365_v35 = vpop.f32.mrf.mxu1 }
 0x117   :  { %7348 = vst [vmem:[#allocation48_spill] sm:$0xff] %v5576_v19  ;;  %7349 = vst [vmem:[#allocation49_spill] sm:$0xff] %v5579_v22  ;;  %v5581_v51 = vadd.f32 %v252_v21, %v116_v29  ;;  %v5584_v32 = vadd.f32 %v365_v35, %v5534_v28 }
 0x119   :  { %7350 = vst [vmem:[#allocation50_spill] sm:$0xff] %v5581_v51  ;;  %7351 = vst [vmem:[#allocation51_spill] sm:$0xff] %v5584_v32 }
 0x11a   :  { %v256_v31 = vpop.f32.mrf.mxu0  ;;  %v369_v30 = vpop.f32.mrf.mxu1 }
 0x11b   :  { %v5586_v26 = vadd.f32 %v256_v31, %v112_v42  ;;  %v5589_v60 = vadd.f32 %v369_v30, %v5528_v20 }
 0x11c   :  { %v258_v25 = vpop.f32.mrf.mxu0  ;;  %v371_v24 = vpop.f32.mrf.mxu1 }
 0x11d   :  { %7352 = vst [vmem:[#allocation52_spill] sm:$0xff] %v5586_v26  ;;  %7353 = vst [vmem:[#allocation53_spill] sm:$0xff] %v5589_v60  ;;  %v5591_v19 = vadd.f32 %v258_v25, %v116_v29  ;;  %v5594_v0 = vadd.f32 %v371_v24, %v5534_v28  ;;  %v221_v25 = vadd.f32 %v5509_v6, %v112_v42 }
 0x11e   :  { %v223_v24 = vadd.f32 %v5518_v33, %v116_v29 }
 0x11f   :  { %7354 = vst [vmem:[#allocation54_spill] sm:$0xff] %v5591_v19  ;;  %7355 = vst [vmem:[#allocation55_spill] sm:$0xff] %v5594_v0 }
 0x120   :  { %v262_v22 = vpop.f32.mrf.mxu0  ;;  %v375_v21 = vpop.f32.mrf.mxu1 }
 0x121   :  { %v5596_v51 = vadd.f32 %v262_v22, %v112_v42  ;;  %v5599_v35 = vadd.f32 %v375_v21, %v5528_v20 }
 0x122   :  { %v264_v32 = vpop.f32.mrf.mxu0  ;;  %v377_v31 = vpop.f32.mrf.mxu1 }
 0x123   :  { %7356 = vst [vmem:[#allocation56_spill] sm:$0xff] %v5596_v51  ;;  %7357 = vst [vmem:[#allocation57_spill] sm:$0xff] %v5599_v35  ;;  %v5601_v26 = vadd.f32 %v264_v32, %v116_v29  ;;  %v5604_v30 = vadd.f32 %v377_v31, %v5534_v28  ;;  %v336_v32 = vadd.f32 %v5520_v34, %v5534_v28 }
 0x124   :  { %v334_v31 = vadd.f32 %v5511_v15, %v5528_v20 }
 0x125   :  { %7358 = vst [vmem:[#allocation58_spill] sm:$0xff] %v5601_v26  ;;  %7359 = vst [vmem:[#allocation59_spill] sm:$0xff] %v5604_v30 }
 0x126   :  { %v549_v60 = vpop.f32.mrf.mxu0  ;;  %v620_v51 = vpop.f32.mrf.mxu1 }
 0x127   :  { %v625_v0 = vadd.f32 %v549_v60, %v221_v25  ;;  %v627_v30 = vadd.f32 %v620_v51, %v334_v31 }
 0x128   :  { %v551_v19 = vpop.f32.mrf.mxu0  ;;  %v622_v35 = vpop.f32.mrf.mxu1 }
 0x129   :  { %v4655_v23 = vmul.f32 -1.442695, %v625_v0  ;;  %v626_v22 = vadd.f32 %v551_v19, %v223_v24  ;;  %v628_v26 = vadd.f32 %v622_v35, %v336_v32 }
 0x12b   :  { %4716 = vpow2.f32 %v4655_v23  ;;  %v4656_v21 = vmul.f32 -1.442695, %v626_v22  ;;  %v4657_v42 = vmul.f32 -1.442695, %v628_v26 }
 0x12d   :  { %4718 = vpow2.f32 %v4656_v21 }
 0x12e   :  { %4720 = vpow2.f32 %v4657_v42 }
 0x138   :  { %v4717_v6 = vpop.eup %4716 }
 0x139   :  { %v632_v29 = vadd.f32 1.0, %v4717_v6 }
 0x13a   :  { %v4719_v33 = vpop.eup %4718 }
 0x13b   :  { %4722 = vrcp.f32 %v632_v29  ;;  %v638_v19 = vadd.f32 1.0, %v4719_v33  ;;  %v4721_v23 = vpop.eup %4720  ;;  %v5697_v33 = vld [vmem:[#allocation4 + $0x1e8] sm:$0xff] }
 0x13c   :  { %4724 = vtanh.f32 %v627_v30  ;;  %v645_v24 = vadd.f32 1.0, %v4721_v23  ;;  %v5703_v23 = vld [vmem:[#allocation4 + $0x1e0] sm:$0xff] }
 0x13d   :  { %4726 = vrcp.f32 %v638_v19  ;;  %v5699_v19 = vld [vmem:[#allocation4 + $0x1f8] sm:$0xff] }
 0x13e   :  { %4728 = vrcp.f32 %v645_v24  ;;  %v5715_v24 = vld [vmem:[#allocation4 + $0x1c0] sm:$0xff] }
 0x148   :  { %v4723_v60 = vpop.eup %4722 }
 0x149   :  { %v4725_v0 = vpop.eup %4724 }
 0x14a   :  { %v4727_v25 = vpop.eup %4726  ;;  %v649_v34 = vmul.f32 %v4725_v0, %v4723_v60  ;;  %v5705_v60 = vld [vmem:[#allocation4 + $0x1f0] sm:$0xff]  ;;  %v5709_v0 = vld [vmem:[#allocation4 + $0x1c8] sm:$0xff] }
 0x14b   :  { %v648_v28 = vmul.f32 0.0, %v4727_v25  ;;  %v4729_v20 = vpop.eup %4728  ;;  %v5711_v25 = vld [vmem:[#allocation4 + $0x1d8] sm:$0xff] }
 0x14d   :  { %v5612_v35 = vadd.f32 %v649_v34, %v648_v28  ;;  %v5717_v28 = vld [vmem:[#allocation4 + $0x1d0] sm:$0xff]  ;;  %v5721_v34 = vld [vmem:[#allocation4 + $0x1a8] sm:$0xff] }
 0x14f   :  { %4730 = vtanh.f32 %v5612_v35 }
 0x15c   :  { %v4731_v26 = vpop.eup %4730 }
 0x15d   :  { %v5615_v15 = vmul.f32 %v4731_v26, %v4729_v20  ;;  %v5727_v20 = vld [vmem:[#allocation4 + $0x1a0] sm:$0xff]  ;;  %v5729_v26 = vld [vmem:[#allocation4 + $0x1b0] sm:$0xff] }
 0x15f   :  { %7360 = vst [vmem:[#allocation60_spill] sm:$0xff] %v5615_v15  ;;  %790 = vmatmul.mubr.f32.vlgmr.msra.gmra.mxu0 %v5615_v15  ;;  %861 = vmatmul.mubr.f32.vlgmr.msra.gmra.mxu1 %v5615_v15  ;;  %v5875_v15 = vld [vmem:[#allocation4 + $0x18] sm:$0xff] }
 0x160   :  { %969 = vmatpush1.msra.mxu0 %v5196_v36  ;;  %1040 = vmatpush1.msra.mxu1 %v5198_v37  ;;  %v7361_v36 = vld [vmem:[#allocation11_spill] sm:$0xff]  ;;  %v7362_v37 = vld [vmem:[#allocation12_spill] sm:$0xff] }
 0x161   :  { %970 = vmatprep.subr.mxu0 %v5202_v38  ;;  %1041 = vmatprep.subr.mxu1 %v5204_v39  ;;  %v7363_v38 = vld [vmem:[#allocation13_spill] sm:$0xff]  ;;  %v7364_v39 = vld [vmem:[#allocation14_spill] sm:$0xff]  ;;  %7387 = vst [vmem:[#allocation12_spill] sm:$0xff] %v5697_v33 }
 0x162   :  { %971 = vmatpush1.msra.mxu0 %v5210_v40  ;;  %1042 = vmatpush1.msra.mxu1 %v5212_v41  ;;  %v7365_v40 = vld [vmem:[#allocation15_spill] sm:$0xff]  ;;  %v7366_v41 = vld [vmem:[#allocation16_spill] sm:$0xff]  ;;  %7388 = vst [vmem:[#allocation13_spill] sm:$0xff] %v5699_v19 }
 0x163   :  { %972 = vmatprep.subr.mxu0 %v5221_v43  ;;  %1043 = vmatprep.subr.mxu1 %v5223_v44  ;;  %v7367_v43 = vld [vmem:[#allocation17_spill] sm:$0xff]  ;;  %v7368_v44 = vld [vmem:[#allocation18_spill] sm:$0xff] }
 0x164   :  { %973 = vmatpush1.msra.mxu0 %v5227_v45  ;;  %1044 = vmatpush1.msra.mxu1 %v5229_v46  ;;  %v7369_v45 = vld [vmem:[#allocation19_spill] sm:$0xff]  ;;  %v7370_v46 = vld [vmem:[#allocation20_spill] sm:$0xff] }
 0x165   :  { %974 = vmatprep.subr.mxu0 %v5233_v47  ;;  %1045 = vmatprep.subr.mxu1 %v5235_v48  ;;  %v7371_v47 = vld [vmem:[#allocation21_spill] sm:$0xff]  ;;  %v7372_v48 = vld [vmem:[#allocation22_spill] sm:$0xff] }
 0x166   :  { %975 = vmatpush1.msra.mxu0 %v5241_v49  ;;  %1046 = vmatpush1.msra.mxu1 %v5243_v50  ;;  %v7373_v49 = vld [vmem:[#allocation23_spill] sm:$0xff]  ;;  %v7374_v50 = vld [vmem:[#allocation24_spill] sm:$0xff] }
 0x167   :  { %976 = vmatprep.subr.mxu0 %v5252_v52  ;;  %1047 = vmatprep.subr.mxu1 %v5254_v53  ;;  %v7375_v52 = vld [vmem:[#allocation25_spill] sm:$0xff]  ;;  %v7376_v53 = vld [vmem:[#allocation26_spill] sm:$0xff] }
 0x168   :  { %977 = vmatpush1.msra.mxu0 %v5258_v54  ;;  %1048 = vmatpush1.msra.mxu1 %v5260_v55  ;;  %v7377_v54 = vld [vmem:[#allocation27_spill] sm:$0xff]  ;;  %v7378_v55 = vld [vmem:[#allocation28_spill] sm:$0xff] }
 0x169   :  { %978 = vmatprep.subr.mxu0 %v5264_v56  ;;  %1049 = vmatprep.subr.mxu1 %v5266_v57  ;;  %v7379_v56 = vld [vmem:[#allocation29_spill] sm:$0xff]  ;;  %v7380_v57 = vld [vmem:[#allocation30_spill] sm:$0xff]  ;;  %7403 = vst [vmem:[#allocation28_spill] sm:$0xff] %v5875_v15 }
 0x16a   :  { %979 = vmatpush1.msra.mxu0 %v5272_v58  ;;  %1050 = vmatpush1.msra.mxu1 %v5274_v59  ;;  %v7381_v58 = vmov 0.0   ;;  %v7382_v59 = vld [vmem:[#allocation31_spill] sm:$0xff] }
 0x16b   :  { %980 = vmatprep.subr.mxu0 %v5283_v61  ;;  %1051 = vmatprep.subr.mxu1 %v5285_v62 }
 0x16c   :  { %981 = vmatpush1.msra.mxu0 %v5289_v63  ;;  %1052 = vmatpush1.msra.mxu1 %v5291_v1 }
 0x16d   :  { %982 = vmatprep.subr.mxu0 %v5295_v2  ;;  %1053 = vmatprep.subr.mxu1 %v5297_v3  ;;  %v7383_v2 = vld [vmem:[#allocation34_spill] sm:$0xff] }
 0x16e   :  { %983 = vmatpush1.msra.mxu0 %v5303_v4  ;;  %1054 = vmatpush1.msra.mxu1 %v5305_v5 }
 0x16f   :  { %984 = vmatprep.subr.mxu0 %v5314_v7  ;;  %1055 = vmatprep.subr.mxu1 %v5316_v8  ;;  %v7384_v8 = vld [vmem:[#allocation35_spill] sm:$0xff] }
 0x170   :  { %985 = vmatpush1.msra.mxu0 %v5320_v9  ;;  %1056 = vmatpush1.msra.mxu1 %v5322_v10  ;;  %v7385_v10 = vld [vmem:[#allocation33_spill] sm:$0xff] }
 0x171   :  { %986 = vmatprep.subr.mxu0 %v5326_v11  ;;  %1057 = vmatprep.subr.mxu1 %v5328_v12 }
 0x172   :  { %987 = vmatpush1.msra.mxu0 %v5334_v13  ;;  %1058 = vmatpush1.msra.mxu1 %v5336_v14 }
 0x173   :  { %988 = vmatprep.subr.mxu0 %v5345_v16  ;;  %1059 = vmatprep.subr.mxu1 %v5347_v17 }
 0x174   :  { %989 = vmatpush1.msra.mxu0 %v5351_v18  ;;  %1060 = vmatpush1.msra.mxu1 %v7361_v36  ;;  %v5733_v36 = vld [vmem:[#allocation4 + $0x188] sm:$0xff] }
 0x175   :  { %990 = vmatprep.subr.mxu0 %v7362_v37  ;;  %1061 = vmatprep.subr.mxu1 %v7363_v38  ;;  %v5735_v37 = vld [vmem:[#allocation4 + $0x198] sm:$0xff]  ;;  %v5739_v38 = vld [vmem:[#allocation4 + $0x180] sm:$0xff] }
 0x176   :  { %991 = vmatpush1.msra.mxu0 %v7364_v39  ;;  %1062 = vmatpush1.msra.mxu1 %v7365_v40  ;;  %v5741_v39 = vld [vmem:[#allocation4 + $0x190] sm:$0xff]  ;;  %v5745_v40 = vld [vmem:[#allocation4 + $0x168] sm:$0xff] }
 0x177   :  { %992 = vmatprep.subr.mxu0 %v7366_v41  ;;  %1063 = vmatprep.subr.mxu1 %v7367_v43  ;;  %v5747_v41 = vld [vmem:[#allocation4 + $0x178] sm:$0xff]  ;;  %v5751_v43 = vld [vmem:[#allocation4 + $0x160] sm:$0xff] }
 0x178   :  { %993 = vmatpush1.msra.mxu0 %v7368_v44  ;;  %1064 = vmatpush1.msra.mxu1 %v7369_v45  ;;  %v5753_v44 = vld [vmem:[#allocation4 + $0x170] sm:$0xff]  ;;  %v5757_v45 = vld [vmem:[#allocation4 + $0x148] sm:$0xff] }
 0x179   :  { %994 = vmatprep.subr.mxu0 %v7370_v46  ;;  %1065 = vmatprep.subr.mxu1 %v7371_v47  ;;  %v5759_v46 = vld [vmem:[#allocation4 + $0x158] sm:$0xff]  ;;  %v5763_v47 = vld [vmem:[#allocation4 + $0x140] sm:$0xff] }
 0x17a   :  { %995 = vmatpush1.msra.mxu0 %v7372_v48  ;;  %1066 = vmatpush1.msra.mxu1 %v7373_v49  ;;  %v5765_v48 = vld [vmem:[#allocation4 + $0x150] sm:$0xff]  ;;  %v5769_v49 = vld [vmem:[#allocation4 + $0x128] sm:$0xff] }
 0x17b   :  { %996 = vmatprep.subr.mxu0 %v7374_v50  ;;  %1067 = vmatprep.subr.mxu1 %v7375_v52  ;;  %v5771_v50 = vld [vmem:[#allocation4 + $0x138] sm:$0xff]  ;;  %v5775_v52 = vld [vmem:[#allocation4 + $0x120] sm:$0xff] }
 0x17c   :  { %997 = vmatpush1.msra.mxu0 %v7376_v53  ;;  %1068 = vmatpush1.msra.mxu1 %v7377_v54  ;;  %v5777_v53 = vld [vmem:[#allocation4 + $0x130] sm:$0xff]  ;;  %v5781_v54 = vld [vmem:[#allocation4 + $0x108] sm:$0xff] }
 0x17d   :  { %998 = vmatprep.subr.mxu0 %v7378_v55  ;;  %1069 = vmatprep.subr.mxu1 %v7379_v56  ;;  %v5783_v55 = vld [vmem:[#allocation4 + $0x118] sm:$0xff]  ;;  %v5785_v56 = vld [vmem:[#allocation4 + $0x100] sm:$0xff] }
 0x17e   :  { %999 = vmatpush1.msra.mxu0 %v7380_v57  ;;  %1032 = vmatprep.mubr.f32.mxu0 %v7381_v58  ;;  %v5789_v57 = vld [vmem:[#allocation4 + $0x110] sm:$0xff] }
 0x17f   :  { %1070 = vmatpush1.msra.mxu1 %v7382_v59  ;;  %1103 = vmatprep.mubr.f32.mxu1 %v7381_v58  ;;  %v5791_v59 = vld [vmem:[#allocation4 + $0xe8] sm:$0xff] }
 0x180   :  { %1211 = vmatprep.subr.mxu0 %v5697_v33  ;;  %1282 = vmatprep.subr.mxu1 %v5699_v19 }
 0x21f   :  { %v791_v61 = vpop.f32.mrf.mxu0  ;;  %v862_v4 = vpop.f32.mrf.mxu1 }
 0x220   :  { %v867_v62 = vadd.f32 %v791_v61, %v5536_v27  ;;  %v869_v11 = vadd.f32 %v862_v4, %v7385_v10  ;;  %v5793_v61 = vld [vmem:[#allocation4 + $0xf8] sm:$0xff]  ;;  %v5809_v4 = vld [vmem:[#allocation4 + $0xd0] sm:$0xff]  ;;  %v5825_v10 = vld [vmem:[#allocation4 + $0x88] sm:$0xff] }
 0x221   :  { %v793_v63 = vpop.f32.mrf.mxu0  ;;  %v864_v7 = vpop.f32.mrf.mxu1 }
 0x222   :  { %v4658_v1 = vmul.f32 -1.442695, %v867_v62  ;;  %v868_v3 = vadd.f32 %v793_v63, %v7383_v2  ;;  %v870_v9 = vadd.f32 %v864_v7, %v7384_v8  ;;  %v5797_v62 = vld [vmem:[#allocation4 + $0xe0] sm:$0xff]  ;;  %v5799_v63 = vld [vmem:[#allocation4 + $0xf0] sm:$0xff]  ;;  %v5805_v2 = vld [vmem:[#allocation4 + $0xd8] sm:$0xff] }
 0x223   :  { %v5815_v7 = vld [vmem:[#allocation4 + $0xb8] sm:$0xff]  ;;  %v5819_v8 = vld [vmem:[#allocation4 + $0xa0] sm:$0xff] }
 0x224   :  { %4732 = vpow2.f32 %v4658_v1  ;;  %v4659_v5 = vmul.f32 -1.442695, %v868_v3  ;;  %v4660_v12 = vmul.f32 -1.442695, %v870_v9  ;;  %v5801_v1 = vld [vmem:[#allocation4 + $0xc8] sm:$0xff]  ;;  %v5807_v3 = vld [vmem:[#allocation4 + $0xc0] sm:$0xff] }
 0x225   :  { %v5821_v9 = vld [vmem:[#allocation4 + $0xb0] sm:$0xff] }
 0x226   :  { %4734 = vpow2.f32 %v4659_v5  ;;  %v5813_v5 = vld [vmem:[#allocation4 + $0xa8] sm:$0xff] }
 0x227   :  { %4736 = vtanh.f32 %v869_v11  ;;  %v5827_v11 = vld [vmem:[#allocation4 + $0x98] sm:$0xff] }
 0x228   :  { %4738 = vpow2.f32 %v4660_v12  ;;  %v5831_v12 = vld [vmem:[#allocation4 + $0x80] sm:$0xff] }
 0x231   :  { %v4733_v13 = vpop.eup %4732 }
 0x232   :  { %v874_v14 = vadd.f32 1.0, %v4733_v13  ;;  %v5833_v13 = vld [vmem:[#allocation4 + $0x90] sm:$0xff] }
 0x233   :  { %v4735_v16 = vpop.eup %4734  ;;  %7389 = vst [vmem:[#allocation14_spill] sm:$0xff] %v5833_v13 }
 0x234   :  { %4740 = vrcp.f32 %v874_v14  ;;  %v880_v17 = vadd.f32 1.0, %v4735_v16  ;;  %v4737_v18 = vpop.eup %4736  ;;  %v5837_v14 = vld [vmem:[#allocation4 + $0x68] sm:$0xff]  ;;  %v5839_v16 = vld [vmem:[#allocation4 + $0x78] sm:$0xff] }
 0x235   :  { %v4739_v27 = vpop.eup %4738  ;;  %7390 = vst [vmem:[#allocation15_spill] sm:$0xff] %v5837_v14  ;;  %7391 = vst [vmem:[#allocation16_spill] sm:$0xff] %v5839_v16 }
 0x236   :  { %4742 = vrcp.f32 %v880_v17  ;;  %v887_v21 = vadd.f32 1.0, %v4739_v27  ;;  %v5843_v17 = vld [vmem:[#allocation4 + $0x60] sm:$0xff]  ;;  %v5849_v27 = vld [vmem:[#allocation4 + $0x48] sm:$0xff] }
 0x237   :  { %7392 = vst [vmem:[#allocation17_spill] sm:$0xff] %v5843_v17  ;;  %7394 = vst [vmem:[#allocation19_spill] sm:$0xff] %v5849_v27 }
 0x238   :  { %4744 = vrcp.f32 %v887_v21  ;;  %v5861_v21 = vld [vmem:[#allocation4 + $0x28] sm:$0xff] }
 0x239   :  { %7398 = vst [vmem:[#allocation23_spill] sm:$0xff] %v5861_v21 }
 0x241   :  { %v4741_v51 = vpop.eup %4740 }
 0x242   :  { %v891_v30 = vmul.f32 %v4741_v51, %v4737_v18  ;;  %v5845_v18 = vld [vmem:[#allocation4 + $0x70] sm:$0xff]  ;;  %v5851_v51 = vld [vmem:[#allocation4 + $0x58] sm:$0xff] }
 0x243   :  { %v4743_v22 = vpop.eup %4742  ;;  %7393 = vst [vmem:[#allocation18_spill] sm:$0xff] %v5845_v18  ;;  %7395 = vst [vmem:[#allocation20_spill] sm:$0xff] %v5851_v51 }
 0x244   :  { %v890_v32 = vmul.f32 %v4743_v22, %v5612_v35  ;;  %v5723_v35 = vld [vmem:[#allocation4 + $0x1b8] sm:$0xff]  ;;  %v5857_v22 = vld [vmem:[#allocation4 + $0x50] sm:$0xff] }
 0x245   :  { %v4745_v42 = vpop.eup %4744  ;;  %7397 = vst [vmem:[#allocation22_spill] sm:$0xff] %v5857_v22 }
 0x246   :  { %v5688_v31 = vadd.f32 %v891_v30, %v890_v32  ;;  %v5855_v30 = vld [vmem:[#allocation4 + $0x40] sm:$0xff]  ;;  %v5863_v32 = vld [vmem:[#allocation4 + $0x38] sm:$0xff] }
 0x247   :  { %7396 = vst [vmem:[#allocation21_spill] sm:$0xff] %v5855_v30  ;;  %7399 = vst [vmem:[#allocation24_spill] sm:$0xff] %v5863_v32 }
 0x248   :  { %4746 = vtanh.f32 %v5688_v31 }
 0x255   :  { %v4747_v6 = vpop.eup %4746 }
 0x256   :  { %v5691_v29 = vmul.f32 %v4747_v6, %v4745_v42  ;;  %v5867_v42 = vld [vmem:[#allocation4 + $0x20] sm:$0xff]  ;;  %v5869_v6 = vld [vmem:[#allocation4 + $0x30] sm:$0xff] }
 0x257   :  { %7400 = vst [vmem:[#allocation25_spill] sm:$0xff] %v5867_v42  ;;  %7401 = vst [vmem:[#allocation26_spill] sm:$0xff] %v5869_v6 }
 0x258   :  { %7386 = vst [vmem:[#allocation11_spill] sm:$0xff] %v5691_v29  ;;  %1033 = vmatmul.mubr.f32.vlgmr.msra.gmra.mxu0 %v5691_v29  ;;  %1104 = vmatmul.mubr.f32.vlgmr.msra.gmra.mxu1 %v5691_v29  ;;  %v5873_v29 = vld [vmem:[#allocation4 + $0x8] sm:$0xff] }
 0x259   :  { %1275 = vmatprep.mubr.f32.mxu0 %v7381_v58  ;;  %1346 = vmatprep.mubr.f32.mxu1 %v7381_v58  ;;  %7402 = vst [vmem:[#allocation27_spill] sm:$0xff] %v5873_v29  ;;  %v5879_v58 = vld [vmem:[#allocation4] sm:$0xff] }
 0x25a   :  { %1212 = vmatpush1.msra.mxu0 %v5703_v23  ;;  %1283 = vmatpush1.msra.mxu1 %v5705_v60  ;;  %7404 = vst [vmem:[#allocation29_spill] sm:$0xff] %v5879_v58 }
 0x25b   :  { %1213 = vmatprep.subr.mxu0 %v5709_v0  ;;  %1284 = vmatprep.subr.mxu1 %v5711_v25 }
 0x25c   :  { %1214 = vmatpush1.msra.mxu0 %v5715_v24  ;;  %1285 = vmatpush1.msra.mxu1 %v5717_v28 }
 0x25d   :  { %1215 = vmatprep.subr.mxu0 %v5721_v34  ;;  %1286 = vmatprep.subr.mxu1 %v5723_v35 }
 0x25e   :  { %1216 = vmatpush1.msra.mxu0 %v5727_v20  ;;  %1287 = vmatpush1.msra.mxu1 %v5729_v26 }
 0x25f   :  { %1217 = vmatprep.subr.mxu0 %v5733_v36  ;;  %1288 = vmatprep.subr.mxu1 %v5735_v37 }
 0x260   :  { %1218 = vmatpush1.msra.mxu0 %v5739_v38  ;;  %1289 = vmatpush1.msra.mxu1 %v5741_v39 }
 0x261   :  { %1219 = vmatprep.subr.mxu0 %v5745_v40  ;;  %1290 = vmatprep.subr.mxu1 %v5747_v41 }
 0x262   :  { %1220 = vmatpush1.msra.mxu0 %v5751_v43  ;;  %1291 = vmatpush1.msra.mxu1 %v5753_v44 }
 0x263   :  { %1221 = vmatprep.subr.mxu0 %v5757_v45  ;;  %1292 = vmatprep.subr.mxu1 %v5759_v46 }
 0x264   :  { %1222 = vmatpush1.msra.mxu0 %v5763_v47  ;;  %1293 = vmatpush1.msra.mxu1 %v5765_v48 }
 0x265   :  { %1223 = vmatprep.subr.mxu0 %v5769_v49  ;;  %1294 = vmatprep.subr.mxu1 %v5771_v50 }
 0x266   :  { %1224 = vmatpush1.msra.mxu0 %v5775_v52  ;;  %1295 = vmatpush1.msra.mxu1 %v5777_v53 }
 0x267   :  { %1225 = vmatprep.subr.mxu0 %v5781_v54  ;;  %1296 = vmatprep.subr.mxu1 %v5783_v55 }
 0x268   :  { %1226 = vmatpush1.msra.mxu0 %v5785_v56  ;;  %1297 = vmatpush1.msra.mxu1 %v5789_v57 }
 0x269   :  { %1227 = vmatprep.subr.mxu0 %v5791_v59  ;;  %1298 = vmatprep.subr.mxu1 %v5793_v61 }
 0x26a   :  { %1228 = vmatpush1.msra.mxu0 %v5797_v62  ;;  %1299 = vmatpush1.msra.mxu1 %v5799_v63 }
 0x26b   :  { %1229 = vmatprep.subr.mxu0 %v5801_v1  ;;  %1300 = vmatprep.subr.mxu1 %v5805_v2 }
 0x26c   :  { %1230 = vmatpush1.msra.mxu0 %v5807_v3  ;;  %1301 = vmatpush1.msra.mxu1 %v5809_v4 }
 0x26d   :  { %1231 = vmatprep.subr.mxu0 %v5813_v5  ;;  %1302 = vmatprep.subr.mxu1 %v5815_v7 }
 0x26e   :  { %1232 = vmatpush1.msra.mxu0 %v5819_v8  ;;  %1303 = vmatpush1.msra.mxu1 %v5821_v9 }
 0x26f   :  { %1233 = vmatprep.subr.mxu0 %v5825_v10  ;;  %1304 = vmatprep.subr.mxu1 %v5827_v11 }
 0x270   :  { %1234 = vmatpush1.msra.mxu0 %v5831_v12  ;;  %1305 = vmatpush1.msra.mxu1 %v5833_v13 }
 0x271   :  { %1235 = vmatprep.subr.mxu0 %v5837_v14  ;;  %1306 = vmatprep.subr.mxu1 %v5839_v16  ;;  %v7409_v16 = vld [vmem:[#allocation37_spill] sm:$0xff] }
 0x272   :  { %1236 = vmatpush1.msra.mxu0 %v5843_v17  ;;  %1307 = vmatpush1.msra.mxu1 %v5845_v18  ;;  %v7408_v17 = vld [vmem:[#allocation39_spill] sm:$0xff] }
 0x273   :  { %1237 = vmatprep.subr.mxu0 %v5849_v27  ;;  %1308 = vmatprep.subr.mxu1 %v5851_v51  ;;  %v5881_v27 = vld [vmem:[#allocation4 + $0x10] sm:$0xff] }
 0x274   :  { %1238 = vmatpush1.msra.mxu0 %v5855_v30  ;;  %1309 = vmatpush1.msra.mxu1 %v5857_v22  ;;  %7405 = vst [vmem:[#allocation30_spill] sm:$0xff] %v5881_v27 }
 0x275   :  { %1239 = vmatprep.subr.mxu0 %v5861_v21  ;;  %1310 = vmatprep.subr.mxu1 %v5863_v32  ;;  %v7406_v21 = vld [vmem:[#allocation36_spill] sm:$0xff] }
 0x276   :  { %1240 = vmatpush1.msra.mxu0 %v5867_v42  ;;  %1311 = vmatpush1.msra.mxu1 %v5869_v6  ;;  %v7407_v42 = vld [vmem:[#allocation38_spill] sm:$0xff] }
 0x277   :  { %1241 = vmatprep.subr.mxu0 %v5873_v29  ;;  %1312 = vmatprep.subr.mxu1 %v5875_v15 }
 0x278   :  { %1242 = vmatpush1.msra.mxu0 %v5879_v58  ;;  %1313 = vmatpush1.msra.mxu1 %v5881_v27 }
 0x279   :  { %1454 = vmatprep.subr.mxu0 %v5697_v33  ;;  %1525 = vmatprep.subr.mxu1 %v5699_v19 }
 0x318   :  { %v1034_v32 = vpop.f32.mrf.mxu0  ;;  %v1105_v6 = vpop.f32.mrf.mxu1 }
 0x319   :  { %v1110_v22 = vadd.f32 %v1034_v32, %v7406_v21  ;;  %v1112_v27 = vadd.f32 %v1105_v6, %v7409_v16  ;;  %v7417_v6 = vld [vmem:[#allocation20_spill] sm:$0xff] }
 0x31a   :  { %v1036_v30 = vpop.f32.mrf.mxu0  ;;  %v1107_v15 = vpop.f32.mrf.mxu1 }
 0x31b   :  { %v4661_v51 = vmul.f32 -1.442695, %v1110_v22  ;;  %v1111_v18 = vadd.f32 %v1036_v30, %v7407_v42  ;;  %v1113_v58 = vadd.f32 %v1107_v15, %v7408_v17  ;;  %v7415_v17 = vld [vmem:[#allocation18_spill] sm:$0xff] }
 0x31d   :  { %4748 = vpow2.f32 %v4661_v51  ;;  %v4662_v29 = vmul.f32 -1.442695, %v1111_v18  ;;  %v4663_v14 = vmul.f32 -1.442695, %v1113_v58 }
 0x31f   :  { %4750 = vpow2.f32 %v4662_v29 }
 0x320   :  { %4752 = vtanh.f32 %v1112_v27  ;;  %v7416_v27 = vld [vmem:[#allocation19_spill] sm:$0xff] }
 0x321   :  { %4754 = vpow2.f32 %v4663_v14  ;;  %v7414_v14 = vld [vmem:[#allocation17_spill] sm:$0xff] }
 0x32a   :  { %v4749_v33 = vpop.eup %4748 }
 0x32b   :  { %v1117_v13 = vadd.f32 1.0, %v4749_v33 }
 0x32c   :  { %v4751_v19 = vpop.eup %4750 }
 0x32d   :  { %4756 = vrcp.f32 %v1117_v13  ;;  %v1123_v21 = vadd.f32 1.0, %v4751_v19  ;;  %v4753_v22 = vpop.eup %4752  ;;  %v7412_v19 = vld [vmem:[#allocation15_spill] sm:$0xff]  ;;  %v7413_v13 = vld [vmem:[#allocation16_spill] sm:$0xff] }
 0x32e   :  { %v4755_v30 = vpop.eup %4754 }
 0x32f   :  { %4758 = vrcp.f32 %v1123_v21  ;;  %v1130_v29 = vadd.f32 1.0, %v4755_v30  ;;  %v7418_v21 = vld [vmem:[#allocation21_spill] sm:$0xff]  ;;  %v7420_v30 = vld [vmem:[#allocation23_spill] sm:$0xff] }
 0x331   :  { %4760 = vrcp.f32 %v1130_v29  ;;  %v7424_v29 = vld [vmem:[#allocation27_spill] sm:$0xff] }
 0x33a   :  { %v4757_v51 = vpop.eup %4756 }
 0x33b   :  { %v1134_v32 = vmul.f32 %v4757_v51, %v4753_v22  ;;  %v7419_v22 = vld [vmem:[#allocation22_spill] sm:$0xff]  ;;  %v7421_v51 = vld [vmem:[#allocation24_spill] sm:$0xff] }
 0x33c   :  { %v4759_v18 = vpop.eup %4758 }
 0x33d   :  { %v1133_v42 = vmul.f32 %v4759_v18, %v5688_v31  ;;  %v7411_v31 = vld [vmem:[#allocation14_spill] sm:$0xff] }
 0x33e   :  { %v4761_v58 = vpop.eup %4760  ;;  %v7423_v18 = vld [vmem:[#allocation26_spill] sm:$0xff] }
 0x33f   :  { %v5896_v15 = vadd.f32 %v1134_v32, %v1133_v42  ;;  %v7422_v32 = vld [vmem:[#allocation25_spill] sm:$0xff]  ;;  %v7425_v42 = vld [vmem:[#allocation28_spill] sm:$0xff] }
 0x341   :  { %4762 = vtanh.f32 %v5896_v15 }
 0x34e   :  { %v4763_v33 = vpop.eup %4762 }
 0x34f   :  { %v5899_v16 = vmul.f32 %v4763_v33, %v4761_v58  ;;  %v7426_v58 = vld [vmem:[#allocation29_spill] sm:$0xff]  ;;  %v7427_v33 = vmov 0.0  }
 0x351   :  { %7410 = vst [vmem:[#allocation31_spill] sm:$0xff] %v5899_v16  ;;  %1276 = vmatmul.mubr.f32.vlgmr.msra.gmra.mxu0 %v5899_v16  ;;  %1347 = vmatmul.mubr.f32.vlgmr.msra.gmra.mxu1 %v5899_v16  ;;  %v7428_v16 = vld [vmem:[#allocation30_spill] sm:$0xff] }
 0x352   :  { %1455 = vmatpush1.msra.mxu0 %v5703_v23  ;;  %1526 = vmatpush1.msra.mxu1 %v5705_v60 }
 0x353   :  { %1456 = vmatprep.subr.mxu0 %v5709_v0  ;;  %1527 = vmatprep.subr.mxu1 %v5711_v25 }
 0x354   :  { %1457 = vmatpush1.msra.mxu0 %v5715_v24  ;;  %1528 = vmatpush1.msra.mxu1 %v5717_v28 }
 0x355   :  { %1458 = vmatprep.subr.mxu0 %v5721_v34  ;;  %1529 = vmatprep.subr.mxu1 %v5723_v35 }
 0x356   :  { %1459 = vmatpush1.msra.mxu0 %v5727_v20  ;;  %1530 = vmatpush1.msra.mxu1 %v5729_v26 }
 0x357   :  { %1460 = vmatprep.subr.mxu0 %v5733_v36  ;;  %1531 = vmatprep.subr.mxu1 %v5735_v37 }
 0x358   :  { %1461 = vmatpush1.msra.mxu0 %v5739_v38  ;;  %1532 = vmatpush1.msra.mxu1 %v5741_v39 }
 0x359   :  { %1462 = vmatprep.subr.mxu0 %v5745_v40  ;;  %1533 = vmatprep.subr.mxu1 %v5747_v41 }
 0x35a   :  { %1463 = vmatpush1.msra.mxu0 %v5751_v43  ;;  %1534 = vmatpush1.msra.mxu1 %v5753_v44 }
 0x35b   :  { %1464 = vmatprep.subr.mxu0 %v5757_v45  ;;  %1535 = vmatprep.subr.mxu1 %v5759_v46 }
 0x35c   :  { %1465 = vmatpush1.msra.mxu0 %v5763_v47  ;;  %1536 = vmatpush1.msra.mxu1 %v5765_v48 }
 0x35d   :  { %1466 = vmatprep.subr.mxu0 %v5769_v49  ;;  %1537 = vmatprep.subr.mxu1 %v5771_v50 }
 0x35e   :  { %1467 = vmatpush1.msra.mxu0 %v5775_v52  ;;  %1538 = vmatpush1.msra.mxu1 %v5777_v53 }
 0x35f   :  { %1468 = vmatprep.subr.mxu0 %v5781_v54  ;;  %1539 = vmatprep.subr.mxu1 %v5783_v55 }
 0x360   :  { %1469 = vmatpush1.msra.mxu0 %v5785_v56  ;;  %1540 = vmatpush1.msra.mxu1 %v5789_v57 }
 0x361   :  { %1470 = vmatprep.subr.mxu0 %v5791_v59  ;;  %1541 = vmatprep.subr.mxu1 %v5793_v61 }
 0x362   :  { %1471 = vmatpush1.msra.mxu0 %v5797_v62  ;;  %1542 = vmatpush1.msra.mxu1 %v5799_v63 }
 0x363   :  { %1472 = vmatprep.subr.mxu0 %v5801_v1  ;;  %1543 = vmatprep.subr.mxu1 %v5805_v2 }
 0x364   :  { %1473 = vmatpush1.msra.mxu0 %v5807_v3  ;;  %1544 = vmatpush1.msra.mxu1 %v5809_v4 }
 0x365   :  { %1474 = vmatprep.subr.mxu0 %v5813_v5  ;;  %1545 = vmatprep.subr.mxu1 %v5815_v7 }
 0x366   :  { %1475 = vmatpush1.msra.mxu0 %v5819_v8  ;;  %1546 = vmatpush1.msra.mxu1 %v5821_v9 }
 0x367   :  { %1476 = vmatprep.subr.mxu0 %v5825_v10  ;;  %1547 = vmatprep.subr.mxu1 %v5827_v11 }
 0x368   :  { %1477 = vmatpush1.msra.mxu0 %v5831_v12  ;;  %1548 = vmatpush1.msra.mxu1 %v7411_v31 }
 0x369   :  { %1478 = vmatprep.subr.mxu0 %v7412_v19  ;;  %1549 = vmatprep.subr.mxu1 %v7413_v13  ;;  %v7434_v13 = vld [vmem:[#allocation41_spill] sm:$0xff] }
 0x36a   :  { %1479 = vmatpush1.msra.mxu0 %v7414_v14  ;;  %1550 = vmatpush1.msra.mxu1 %v7415_v17  ;;  %v7433_v14 = vld [vmem:[#allocation43_spill] sm:$0xff] }
 0x36b   :  { %1480 = vmatprep.subr.mxu0 %v7416_v27  ;;  %1551 = vmatprep.subr.mxu1 %v7417_v6 }
 0x36c   :  { %1481 = vmatpush1.msra.mxu0 %v7418_v21  ;;  %1552 = vmatpush1.msra.mxu1 %v7419_v22  ;;  %v7429_v22 = vld [vmem:[#allocation12_spill] sm:$0xff] }
 0x36d   :  { %1482 = vmatprep.subr.mxu0 %v7420_v30  ;;  %1553 = vmatprep.subr.mxu1 %v7421_v51  ;;  %v7430_v30 = vld [vmem:[#allocation13_spill] sm:$0xff] }
 0x36e   :  { %1483 = vmatpush1.msra.mxu0 %v7422_v32  ;;  %1554 = vmatpush1.msra.mxu1 %v7423_v18  ;;  %v7431_v32 = vld [vmem:[#allocation40_spill] sm:$0xff] }
 0x36f   :  { %1484 = vmatprep.subr.mxu0 %v7424_v29  ;;  %1555 = vmatprep.subr.mxu1 %v7425_v42  ;;  %v7432_v29 = vld [vmem:[#allocation42_spill] sm:$0xff] }
 0x370   :  { %1485 = vmatpush1.msra.mxu0 %v7426_v58  ;;  %1518 = vmatprep.mubr.f32.mxu0 %v7427_v33 }
 0x371   :  { %1556 = vmatpush1.msra.mxu1 %v7428_v16  ;;  %1589 = vmatprep.mubr.f32.mxu1 %v7427_v33 }
 0x372   :  { %1697 = vmatprep.subr.mxu0 %v7429_v22  ;;  %1768 = vmatprep.subr.mxu1 %v7430_v30 }
 0x411   :  { %v1277_v51 = vpop.f32.mrf.mxu0  ;;  %v1348_v42 = vpop.f32.mrf.mxu1 }
 0x412   :  { %v1353_v21 = vadd.f32 %v1277_v51, %v7431_v32  ;;  %v1355_v33 = vadd.f32 %v1348_v42, %v7434_v13  ;;  %v7441_v42 = vld [vmem:[#allocation19_spill] sm:$0xff] }
 0x413   :  { %v1279_v18 = vpop.f32.mrf.mxu0  ;;  %v1350_v17 = vpop.f32.mrf.mxu1 }
 0x414   :  { %v4664_v6 = vmul.f32 -1.442695, %v1353_v21  ;;  %v1354_v27 = vadd.f32 %v1279_v18, %v7432_v29  ;;  %v1356_v16 = vadd.f32 %v1350_v17, %v7433_v14 }
 0x416   :  { %4764 = vpow2.f32 %v4664_v6  ;;  %v4665_v58 = vmul.f32 -1.442695, %v1354_v27  ;;  %v4666_v19 = vmul.f32 -1.442695, %v1356_v16 }
 0x418   :  { %4766 = vpow2.f32 %v4665_v58 }
 0x419   :  { %4768 = vtanh.f32 %v1355_v33  ;;  %v7442_v33 = vld [vmem:[#allocation20_spill] sm:$0xff] }
 0x41a   :  { %4770 = vpow2.f32 %v4666_v19  ;;  %v7438_v19 = vld [vmem:[#allocation16_spill] sm:$0xff] }
 0x423   :  { %v4765_v22 = vpop.eup %4764 }
 0x424   :  { %v1360_v31 = vadd.f32 1.0, %v4765_v22  ;;  %v7439_v22 = vld [vmem:[#allocation17_spill] sm:$0xff] }
 0x425   :  { %v4767_v30 = vpop.eup %4766 }
 0x426   :  { %4772 = vrcp.f32 %v1360_v31  ;;  %v1366_v51 = vadd.f32 1.0, %v4767_v30  ;;  %v4769_v21 = vpop.eup %4768  ;;  %v7437_v31 = vld [vmem:[#allocation15_spill] sm:$0xff]  ;;  %v7440_v30 = vld [vmem:[#allocation18_spill] sm:$0xff] }
 0x427   :  { %v4771_v32 = vpop.eup %4770 }
 0x428   :  { %4774 = vrcp.f32 %v1366_v51  ;;  %v1373_v29 = vadd.f32 1.0, %v4771_v32  ;;  %v7443_v51 = vld [vmem:[#allocation21_spill] sm:$0xff]  ;;  %v7445_v32 = vld [vmem:[#allocation23_spill] sm:$0xff] }
 0x42a   :  { %4776 = vrcp.f32 %v1373_v29  ;;  %v7449_v29 = vld [vmem:[#allocation27_spill] sm:$0xff] }
 0x433   :  { %v4773_v6 = vpop.eup %4772 }
 0x434   :  { %v1377_v18 = vmul.f32 %v4773_v6, %v4769_v21  ;;  %v7444_v21 = vld [vmem:[#allocation22_spill] sm:$0xff]  ;;  %v7446_v6 = vld [vmem:[#allocation24_spill] sm:$0xff] }
 0x435   :  { %v4775_v27 = vpop.eup %4774 }
 0x436   :  { %v1376_v58 = vmul.f32 %v4775_v27, %v5896_v15  ;;  %v7436_v15 = vld [vmem:[#allocation14_spill] sm:$0xff] }
 0x437   :  { %v4777_v16 = vpop.eup %4776  ;;  %v7448_v27 = vld [vmem:[#allocation26_spill] sm:$0xff] }
 0x438   :  { %v5974_v14 = vadd.f32 %v1377_v18, %v1376_v58  ;;  %v7447_v18 = vld [vmem:[#allocation25_spill] sm:$0xff]  ;;  %v7450_v58 = vld [vmem:[#allocation28_spill] sm:$0xff] }
 0x43a   :  { %4778 = vtanh.f32 %v5974_v14 }
 0x447   :  { %v4779_v13 = vpop.eup %4778 }
 0x448   :  { %v5977_v17 = vmul.f32 %v4779_v13, %v4777_v16  ;;  %v7451_v16 = vld [vmem:[#allocation29_spill] sm:$0xff]  ;;  %v7452_v13 = vmov 0.0  }
 0x44a   :  { %7435 = vst [vmem:[#allocation34_spill] sm:$0xff] %v5977_v17  ;;  %1519 = vmatmul.mubr.f32.vlgmr.msra.gmra.mxu0 %v5977_v17  ;;  %1590 = vmatmul.mubr.f32.vlgmr.msra.gmra.mxu1 %v5977_v17  ;;  %v7453_v17 = vld [vmem:[#allocation30_spill] sm:$0xff] }
 0x44b   :  { %1698 = vmatpush1.msra.mxu0 %v5703_v23  ;;  %1769 = vmatpush1.msra.mxu1 %v5705_v60 }
 0x44c   :  { %1699 = vmatprep.subr.mxu0 %v5709_v0  ;;  %1770 = vmatprep.subr.mxu1 %v5711_v25 }
 0x44d   :  { %1700 = vmatpush1.msra.mxu0 %v5715_v24  ;;  %1771 = vmatpush1.msra.mxu1 %v5717_v28 }
 0x44e   :  { %1701 = vmatprep.subr.mxu0 %v5721_v34  ;;  %1772 = vmatprep.subr.mxu1 %v5723_v35 }
 0x44f   :  { %1702 = vmatpush1.msra.mxu0 %v5727_v20  ;;  %1773 = vmatpush1.msra.mxu1 %v5729_v26 }
 0x450   :  { %1703 = vmatprep.subr.mxu0 %v5733_v36  ;;  %1774 = vmatprep.subr.mxu1 %v5735_v37 }
 0x451   :  { %1704 = vmatpush1.msra.mxu0 %v5739_v38  ;;  %1775 = vmatpush1.msra.mxu1 %v5741_v39 }
 0x452   :  { %1705 = vmatprep.subr.mxu0 %v5745_v40  ;;  %1776 = vmatprep.subr.mxu1 %v5747_v41 }
 0x453   :  { %1706 = vmatpush1.msra.mxu0 %v5751_v43  ;;  %1777 = vmatpush1.msra.mxu1 %v5753_v44 }
 0x454   :  { %1707 = vmatprep.subr.mxu0 %v5757_v45  ;;  %1778 = vmatprep.subr.mxu1 %v5759_v46 }
 0x455   :  { %1708 = vmatpush1.msra.mxu0 %v5763_v47  ;;  %1779 = vmatpush1.msra.mxu1 %v5765_v48 }
 0x456   :  { %1709 = vmatprep.subr.mxu0 %v5769_v49  ;;  %1780 = vmatprep.subr.mxu1 %v5771_v50 }
 0x457   :  { %1710 = vmatpush1.msra.mxu0 %v5775_v52  ;;  %1781 = vmatpush1.msra.mxu1 %v5777_v53 }
 0x458   :  { %1711 = vmatprep.subr.mxu0 %v5781_v54  ;;  %1782 = vmatprep.subr.mxu1 %v5783_v55 }
 0x459   :  { %1712 = vmatpush1.msra.mxu0 %v5785_v56  ;;  %1783 = vmatpush1.msra.mxu1 %v5789_v57 }
 0x45a   :  { %1713 = vmatprep.subr.mxu0 %v5791_v59  ;;  %1784 = vmatprep.subr.mxu1 %v5793_v61 }
 0x45b   :  { %1714 = vmatpush1.msra.mxu0 %v5797_v62  ;;  %1785 = vmatpush1.msra.mxu1 %v5799_v63 }
 0x45c   :  { %1715 = vmatprep.subr.mxu0 %v5801_v1  ;;  %1786 = vmatprep.subr.mxu1 %v5805_v2 }
 0x45d   :  { %1716 = vmatpush1.msra.mxu0 %v5807_v3  ;;  %1787 = vmatpush1.msra.mxu1 %v5809_v4 }
 0x45e   :  { %1717 = vmatprep.subr.mxu0 %v5813_v5  ;;  %1788 = vmatprep.subr.mxu1 %v5815_v7 }
 0x45f   :  { %1718 = vmatpush1.msra.mxu0 %v5819_v8  ;;  %1789 = vmatpush1.msra.mxu1 %v5821_v9 }
 0x460   :  { %1719 = vmatprep.subr.mxu0 %v5825_v10  ;;  %1790 = vmatprep.subr.mxu1 %v5827_v11 }
 0x461   :  { %1720 = vmatpush1.msra.mxu0 %v5831_v12  ;;  %1791 = vmatpush1.msra.mxu1 %v7436_v15 }
 0x462   :  { %1721 = vmatprep.subr.mxu0 %v7437_v31  ;;  %1792 = vmatprep.subr.mxu1 %v7438_v19  ;;  %v7459_v19 = vld [vmem:[#allocation45_spill] sm:$0xff] }
 0x463   :  { %1722 = vmatpush1.msra.mxu0 %v7439_v22  ;;  %1793 = vmatpush1.msra.mxu1 %v7440_v30  ;;  %v7458_v22 = vld [vmem:[#allocation47_spill] sm:$0xff] }
 0x464   :  { %1723 = vmatprep.subr.mxu0 %v7441_v42  ;;  %1794 = vmatprep.subr.mxu1 %v7442_v33 }
 0x465   :  { %1724 = vmatpush1.msra.mxu0 %v7443_v51  ;;  %1795 = vmatpush1.msra.mxu1 %v7444_v21  ;;  %v7454_v21 = vld [vmem:[#allocation12_spill] sm:$0xff] }
 0x466   :  { %1725 = vmatprep.subr.mxu0 %v7445_v32  ;;  %1796 = vmatprep.subr.mxu1 %v7446_v6  ;;  %v7455_v32 = vld [vmem:[#allocation13_spill] sm:$0xff] }
 0x467   :  { %1726 = vmatpush1.msra.mxu0 %v7447_v18  ;;  %1797 = vmatpush1.msra.mxu1 %v7448_v27  ;;  %v7456_v18 = vld [vmem:[#allocation44_spill] sm:$0xff] }
 0x468   :  { %1727 = vmatprep.subr.mxu0 %v7449_v29  ;;  %1798 = vmatprep.subr.mxu1 %v7450_v58  ;;  %v7457_v29 = vld [vmem:[#allocation46_spill] sm:$0xff] }
 0x469   :  { %1728 = vmatpush1.msra.mxu0 %v7451_v16  ;;  %1761 = vmatprep.mubr.f32.mxu0 %v7452_v13 }
 0x46a   :  { %1799 = vmatpush1.msra.mxu1 %v7453_v17  ;;  %1832 = vmatprep.mubr.f32.mxu1 %v7452_v13 }
 0x46b   :  { %1940 = vmatprep.subr.mxu0 %v7454_v21  ;;  %2011 = vmatprep.subr.mxu1 %v7455_v32 }
 0x50a   :  { %v1520_v6 = vpop.f32.mrf.mxu0  ;;  %v1591_v58 = vpop.f32.mrf.mxu1 }
 0x50b   :  { %v1596_v51 = vadd.f32 %v1520_v6, %v7456_v18  ;;  %v1598_v13 = vadd.f32 %v1591_v58, %v7459_v19  ;;  %v2180_v58 = vld [vmem:[#allocation4 + $0x1e8] sm:$0xff] }
 0x50c   :  { %v1522_v27 = vpop.f32.mrf.mxu0  ;;  %v1593_v30 = vpop.f32.mrf.mxu1 }
 0x50d   :  { %v4667_v33 = vmul.f32 -1.442695, %v1596_v51  ;;  %v1597_v42 = vadd.f32 %v1522_v27, %v7457_v29  ;;  %v1599_v17 = vadd.f32 %v1593_v30, %v7458_v22 }
 0x50f   :  { %4780 = vpow2.f32 %v4667_v33  ;;  %v4668_v16 = vmul.f32 -1.442695, %v1597_v42  ;;  %v4669_v31 = vmul.f32 -1.442695, %v1599_v17 }
 0x511   :  { %4782 = vpow2.f32 %v4668_v16 }
 0x512   :  { %4784 = vtanh.f32 %v1598_v13  ;;  %v2182_v13 = vld [vmem:[#allocation4 + $0x1f8] sm:$0xff] }
 0x513   :  { %4786 = vpow2.f32 %v4669_v31 }
 0x51c   :  { %v4781_v21 = vpop.eup %4780 }
 0x51d   :  { %v1603_v15 = vadd.f32 1.0, %v4781_v21  ;;  %v2179_v21 = vld [vmem:[#allocation4 + $0x1e0] sm:$0xff] }
 0x51e   :  { %v4783_v32 = vpop.eup %4782 }
 0x51f   :  { %4788 = vrcp.f32 %v1603_v15  ;;  %v1609_v6 = vadd.f32 1.0, %v4783_v32  ;;  %v4785_v51 = vpop.eup %4784  ;;  %v2181_v32 = vld [vmem:[#allocation4 + $0x1f0] sm:$0xff] }
 0x520   :  { %v4787_v18 = vpop.eup %4786 }
 0x521   :  { %4790 = vrcp.f32 %v1609_v6  ;;  %v1616_v29 = vadd.f32 1.0, %v4787_v18  ;;  %v2176_v6 = vld [vmem:[#allocation4 + $0x1c8] sm:$0xff]  ;;  %v2175_v18 = vld [vmem:[#allocation4 + $0x1c0] sm:$0xff] }
 0x523   :  { %4792 = vrcp.f32 %v1616_v29  ;;  %v2171_v29 = vld [vmem:[#allocation4 + $0x1a0] sm:$0xff] }
 0x52c   :  { %v4789_v33 = vpop.eup %4788 }
 0x52d   :  { %v1620_v27 = vmul.f32 %v4789_v33, %v4785_v51  ;;  %v2178_v51 = vld [vmem:[#allocation4 + $0x1d8] sm:$0xff]  ;;  %v2177_v33 = vld [vmem:[#allocation4 + $0x1d0] sm:$0xff] }
 0x52e   :  { %v4791_v42 = vpop.eup %4790 }
 0x52f   :  { %v1619_v16 = vmul.f32 %v4791_v42, %v5974_v14  ;;  %v2174_v42 = vld [vmem:[#allocation4 + $0x1b8] sm:$0xff] }
 0x530   :  { %v4793_v17 = vpop.eup %4792 }
 0x531   :  { %v6052_v22 = vadd.f32 %v1620_v27, %v1619_v16  ;;  %v2172_v27 = vld [vmem:[#allocation4 + $0x1a8] sm:$0xff]  ;;  %v2173_v16 = vld [vmem:[#allocation4 + $0x1b0] sm:$0xff] }
 0x533   :  { %4794 = vtanh.f32 %v6052_v22 }
 0x540   :  { %v4795_v19 = vpop.eup %4794 }
 0x541   :  { %v6055_v30 = vmul.f32 %v4795_v19, %v4793_v17  ;;  %v2170_v17 = vld [vmem:[#allocation4 + $0x198] sm:$0xff]  ;;  %v2167_v19 = vld [vmem:[#allocation4 + $0x180] sm:$0xff] }
 0x543   :  { %1762 = vmatmul.mubr.f32.vlgmr.msra.gmra.mxu0 %v6055_v30  ;;  %1833 = vmatmul.mubr.f32.vlgmr.msra.gmra.mxu1 %v6055_v30 }
 0x544   :  { %1941 = vmatpush1.msra.mxu0 %v5703_v23  ;;  %2012 = vmatpush1.msra.mxu1 %v5705_v60  ;;  %v7460_v23 = vld [vmem:[#allocation14_spill] sm:$0xff]  ;;  %v7461_v60 = vld [vmem:[#allocation15_spill] sm:$0xff] }
 0x545   :  { %1942 = vmatprep.subr.mxu0 %v5709_v0  ;;  %2013 = vmatprep.subr.mxu1 %v5711_v25  ;;  %v7462_v0 = vld [vmem:[#allocation16_spill] sm:$0xff]  ;;  %v7463_v25 = vld [vmem:[#allocation17_spill] sm:$0xff] }
 0x546   :  { %1943 = vmatpush1.msra.mxu0 %v5715_v24  ;;  %2014 = vmatpush1.msra.mxu1 %v5717_v28  ;;  %v7464_v24 = vld [vmem:[#allocation18_spill] sm:$0xff]  ;;  %v7465_v28 = vld [vmem:[#allocation19_spill] sm:$0xff] }
 0x547   :  { %1944 = vmatprep.subr.mxu0 %v5721_v34  ;;  %2015 = vmatprep.subr.mxu1 %v5723_v35  ;;  %v7466_v34 = vld [vmem:[#allocation20_spill] sm:$0xff]  ;;  %v7467_v35 = vld [vmem:[#allocation21_spill] sm:$0xff] }
 0x548   :  { %1945 = vmatpush1.msra.mxu0 %v5727_v20  ;;  %2016 = vmatpush1.msra.mxu1 %v5729_v26  ;;  %v7468_v20 = vld [vmem:[#allocation22_spill] sm:$0xff]  ;;  %v7469_v26 = vld [vmem:[#allocation23_spill] sm:$0xff] }
 0x549   :  { %1946 = vmatprep.subr.mxu0 %v5733_v36  ;;  %2017 = vmatprep.subr.mxu1 %v5735_v37  ;;  %v7470_v36 = vld [vmem:[#allocation24_spill] sm:$0xff]  ;;  %v7471_v37 = vld [vmem:[#allocation25_spill] sm:$0xff] }
 0x54a   :  { %1947 = vmatpush1.msra.mxu0 %v5739_v38  ;;  %2018 = vmatpush1.msra.mxu1 %v5741_v39  ;;  %v7472_v38 = vld [vmem:[#allocation26_spill] sm:$0xff]  ;;  %v7473_v39 = vld [vmem:[#allocation27_spill] sm:$0xff] }
 0x54b   :  { %1948 = vmatprep.subr.mxu0 %v5745_v40  ;;  %2019 = vmatprep.subr.mxu1 %v5747_v41  ;;  %v7474_v40 = vld [vmem:[#allocation28_spill] sm:$0xff]  ;;  %v7475_v41 = vld [vmem:[#allocation29_spill] sm:$0xff] }
 0x54c   :  { %1949 = vmatpush1.msra.mxu0 %v5751_v43  ;;  %2020 = vmatpush1.msra.mxu1 %v5753_v44  ;;  %v7476_v43 = vmov 0.0   ;;  %v7477_v44 = vld [vmem:[#allocation30_spill] sm:$0xff] }
 0x54d   :  { %1950 = vmatprep.subr.mxu0 %v5757_v45  ;;  %2021 = vmatprep.subr.mxu1 %v5759_v46  ;;  %v7478_v46 = vld [vmem:[#allocation48_spill] sm:$0xff] }
 0x54e   :  { %1951 = vmatpush1.msra.mxu0 %v5763_v47  ;;  %2022 = vmatpush1.msra.mxu1 %v5765_v48 }
 0x54f   :  { %1952 = vmatprep.subr.mxu0 %v5769_v49  ;;  %2023 = vmatprep.subr.mxu1 %v5771_v50  ;;  %v7479_v50 = vld [vmem:[#allocation50_spill] sm:$0xff] }
 0x550   :  { %1953 = vmatpush1.msra.mxu0 %v5775_v52  ;;  %2024 = vmatpush1.msra.mxu1 %v5777_v53 }
 0x551   :  { %1954 = vmatprep.subr.mxu0 %v5781_v54  ;;  %2025 = vmatprep.subr.mxu1 %v5783_v55 }
 0x552   :  { %1955 = vmatpush1.msra.mxu0 %v5785_v56  ;;  %2026 = vmatpush1.msra.mxu1 %v5789_v57  ;;  %v7480_v56 = vld [vmem:[#allocation51_spill] sm:$0xff] }
 0x553   :  { %1956 = vmatprep.subr.mxu0 %v5791_v59  ;;  %2027 = vmatprep.subr.mxu1 %v5793_v61  ;;  %v7481_v59 = vld [vmem:[#allocation49_spill] sm:$0xff] }
 0x554   :  { %1957 = vmatpush1.msra.mxu0 %v5797_v62  ;;  %2028 = vmatpush1.msra.mxu1 %v5799_v63 }
 0x555   :  { %1958 = vmatprep.subr.mxu0 %v5801_v1  ;;  %2029 = vmatprep.subr.mxu1 %v5805_v2 }
 0x556   :  { %1959 = vmatpush1.msra.mxu0 %v5807_v3  ;;  %2030 = vmatpush1.msra.mxu1 %v5809_v4 }
 0x557   :  { %1960 = vmatprep.subr.mxu0 %v5813_v5  ;;  %2031 = vmatprep.subr.mxu1 %v5815_v7 }
 0x558   :  { %1961 = vmatpush1.msra.mxu0 %v5819_v8  ;;  %2032 = vmatpush1.msra.mxu1 %v5821_v9 }
 0x559   :  { %1962 = vmatprep.subr.mxu0 %v5825_v10  ;;  %2033 = vmatprep.subr.mxu1 %v5827_v11 }
 0x55a   :  { %1963 = vmatpush1.msra.mxu0 %v5831_v12  ;;  %2034 = vmatpush1.msra.mxu1 %v7460_v23  ;;  %v2169_v23 = vld [vmem:[#allocation4 + $0x190] sm:$0xff] }
 0x55b   :  { %1964 = vmatprep.subr.mxu0 %v7461_v60  ;;  %2035 = vmatprep.subr.mxu1 %v7462_v0  ;;  %v2164_v60 = vld [vmem:[#allocation4 + $0x168] sm:$0xff]  ;;  %v2166_v0 = vld [vmem:[#allocation4 + $0x178] sm:$0xff] }
 0x55c   :  { %1965 = vmatpush1.msra.mxu0 %v7463_v25  ;;  %2036 = vmatpush1.msra.mxu1 %v7464_v24  ;;  %v2163_v25 = vld [vmem:[#allocation4 + $0x160] sm:$0xff]  ;;  %v2165_v24 = vld [vmem:[#allocation4 + $0x170] sm:$0xff] }
 0x55d   :  { %1966 = vmatprep.subr.mxu0 %v7465_v28  ;;  %2037 = vmatprep.subr.mxu1 %v7466_v34  ;;  %v2160_v28 = vld [vmem:[#allocation4 + $0x148] sm:$0xff]  ;;  %v2162_v34 = vld [vmem:[#allocation4 + $0x158] sm:$0xff] }
 0x55e   :  { %1967 = vmatpush1.msra.mxu0 %v7467_v35  ;;  %2038 = vmatpush1.msra.mxu1 %v7468_v20  ;;  %v2159_v35 = vld [vmem:[#allocation4 + $0x140] sm:$0xff]  ;;  %v2161_v20 = vld [vmem:[#allocation4 + $0x150] sm:$0xff] }
 0x55f   :  { %1968 = vmatprep.subr.mxu0 %v7469_v26  ;;  %2039 = vmatprep.subr.mxu1 %v7470_v36  ;;  %v2156_v26 = vld [vmem:[#allocation4 + $0x128] sm:$0xff]  ;;  %v2158_v36 = vld [vmem:[#allocation4 + $0x138] sm:$0xff] }
 0x560   :  { %1969 = vmatpush1.msra.mxu0 %v7471_v37  ;;  %2040 = vmatpush1.msra.mxu1 %v7472_v38  ;;  %v2155_v37 = vld [vmem:[#allocation4 + $0x120] sm:$0xff]  ;;  %v2157_v38 = vld [vmem:[#allocation4 + $0x130] sm:$0xff] }
 0x561   :  { %1970 = vmatprep.subr.mxu0 %v7473_v39  ;;  %2041 = vmatprep.subr.mxu1 %v7474_v40  ;;  %v2152_v39 = vld [vmem:[#allocation4 + $0x108] sm:$0xff]  ;;  %v2154_v40 = vld [vmem:[#allocation4 + $0x118] sm:$0xff] }
 0x562   :  { %1971 = vmatpush1.msra.mxu0 %v7475_v41  ;;  %2004 = vmatprep.mubr.f32.mxu0 %v7476_v43  ;;  %v2151_v41 = vld [vmem:[#allocation4 + $0x100] sm:$0xff] }
 0x563   :  { %2042 = vmatpush1.msra.mxu1 %v7477_v44  ;;  %2075 = vmatprep.mubr.f32.mxu1 %v7476_v43  ;;  %v2153_v44 = vld [vmem:[#allocation4 + $0x110] sm:$0xff] }
 0x564   :  { %2183 = vmatprep.subr.mxu0 %v2180_v58  ;;  %2254 = vmatprep.subr.mxu1 %v2182_v13  ;;  %v2120_v58 = vld [vmem:[#allocation4 + $0x8] sm:$0xff]  ;;  %v2122_v13 = vld [vmem:[#allocation4 + $0x18] sm:$0xff] }
 0x603   :  { %v1763_v45 = vpop.f32.mrf.mxu0  ;;  %v1834_v53 = vpop.f32.mrf.mxu1 }
 0x604   :  { %v1839_v47 = vadd.f32 %v1763_v45, %v7478_v46  ;;  %v1841_v61 = vadd.f32 %v1834_v53, %v7481_v59  ;;  %v2148_v45 = vld [vmem:[#allocation4 + $0xe8] sm:$0xff]  ;;  %v2150_v46 = vld [vmem:[#allocation4 + $0xf8] sm:$0xff]  ;;  %v2145_v53 = vld [vmem:[#allocation4 + $0xd0] sm:$0xff] }
 0x605   :  { %v1765_v48 = vpop.f32.mrf.mxu0  ;;  %v1836_v55 = vpop.f32.mrf.mxu1  ;;  %v2136_v59 = vld [vmem:[#allocation4 + $0x88] sm:$0xff] }
 0x606   :  { %v4670_v49 = vmul.f32 -1.442695, %v1839_v47  ;;  %v1840_v52 = vadd.f32 %v1765_v48, %v7479_v50  ;;  %v1842_v57 = vadd.f32 %v1836_v55, %v7480_v56  ;;  %v2147_v47 = vld [vmem:[#allocation4 + $0xe0] sm:$0xff]  ;;  %v2149_v48 = vld [vmem:[#allocation4 + $0xf0] sm:$0xff]  ;;  %v2146_v50 = vld [vmem:[#allocation4 + $0xd8] sm:$0xff] }
 0x607   :  { %v2142_v55 = vld [vmem:[#allocation4 + $0xb8] sm:$0xff]  ;;  %v2139_v56 = vld [vmem:[#allocation4 + $0xa0] sm:$0xff] }
 0x608   :  { %4796 = vpow2.f32 %v4670_v49  ;;  %v4671_v54 = vmul.f32 -1.442695, %v1840_v52  ;;  %v4672_v62 = vmul.f32 -1.442695, %v1842_v57  ;;  %v2144_v49 = vld [vmem:[#allocation4 + $0xc8] sm:$0xff]  ;;  %v2143_v52 = vld [vmem:[#allocation4 + $0xc0] sm:$0xff] }
 0x609   :  { %v2141_v57 = vld [vmem:[#allocation4 + $0xb0] sm:$0xff] }
 0x60a   :  { %4798 = vpow2.f32 %v4671_v54  ;;  %v2140_v54 = vld [vmem:[#allocation4 + $0xa8] sm:$0xff] }
 0x60b   :  { %4800 = vtanh.f32 %v1841_v61  ;;  %v2138_v61 = vld [vmem:[#allocation4 + $0x98] sm:$0xff] }
 0x60c   :  { %4802 = vpow2.f32 %v4672_v62  ;;  %v2135_v62 = vld [vmem:[#allocation4 + $0x80] sm:$0xff] }
 0x615   :  { %v4797_v63 = vpop.eup %4796 }
 0x616   :  { %v1846_v1 = vadd.f32 1.0, %v4797_v63  ;;  %v2137_v63 = vld [vmem:[#allocation4 + $0x90] sm:$0xff] }
 0x617   :  { %v4799_v2 = vpop.eup %4798 }
 0x618   :  { %4804 = vrcp.f32 %v1846_v1  ;;  %v1852_v3 = vadd.f32 1.0, %v4799_v2  ;;  %v4801_v4 = vpop.eup %4800  ;;  %v2132_v1 = vld [vmem:[#allocation4 + $0x68] sm:$0xff]  ;;  %v2134_v2 = vld [vmem:[#allocation4 + $0x78] sm:$0xff] }
 0x619   :  { %v4803_v5 = vpop.eup %4802 }
 0x61a   :  { %4806 = vrcp.f32 %v1852_v3  ;;  %v1859_v10 = vadd.f32 1.0, %v4803_v5  ;;  %v2131_v3 = vld [vmem:[#allocation4 + $0x60] sm:$0xff]  ;;  %v2128_v5 = vld [vmem:[#allocation4 + $0x48] sm:$0xff] }
 0x61c   :  { %4808 = vrcp.f32 %v1859_v10  ;;  %v2124_v10 = vld [vmem:[#allocation4 + $0x28] sm:$0xff] }
 0x625   :  { %v4805_v7 = vpop.eup %4804 }
 0x626   :  { %v1863_v8 = vmul.f32 %v4805_v7, %v4801_v4  ;;  %v2133_v4 = vld [vmem:[#allocation4 + $0x70] sm:$0xff]  ;;  %v2130_v7 = vld [vmem:[#allocation4 + $0x58] sm:$0xff] }
 0x627   :  { %v4807_v9 = vpop.eup %4806 }
 0x628   :  { %v1862_v11 = vmul.f32 %v4807_v9, %v6052_v22  ;;  %v2168_v22 = vld [vmem:[#allocation4 + $0x188] sm:$0xff]  ;;  %v2129_v9 = vld [vmem:[#allocation4 + $0x50] sm:$0xff] }
 0x629   :  { %v4809_v14 = vpop.eup %4808 }
 0x62a   :  { %v6128_v12 = vadd.f32 %v1863_v8, %v1862_v11  ;;  %v2127_v8 = vld [vmem:[#allocation4 + $0x40] sm:$0xff]  ;;  %v2126_v11 = vld [vmem:[#allocation4 + $0x38] sm:$0xff] }
 0x62c   :  { %4810 = vtanh.f32 %v6128_v12 }
 0x639   :  { %v4811_v15 = vpop.eup %4810 }
 0x63a   :  { %v6131_v31 = vmul.f32 %v4811_v15, %v4809_v14  ;;  %v2123_v14 = vld [vmem:[#allocation4 + $0x20] sm:$0xff]  ;;  %v2125_v15 = vld [vmem:[#allocation4 + $0x30] sm:$0xff] }
 0x63c   :  { %2005 = vmatmul.mubr.f32.vlgmr.msra.gmra.mxu0 %v6131_v31  ;;  %2076 = vmatmul.mubr.f32.vlgmr.msra.gmra.mxu1 %v6131_v31 }
 0x63d   :  { %2247 = vmatprep.mubr.f32.mxu0 %v7476_v43  ;;  %2318 = vmatprep.mubr.f32.mxu1 %v7476_v43 }
 0x63e   :  { %2184 = vmatpush1.msra.mxu0 %v2179_v21  ;;  %2255 = vmatpush1.msra.mxu1 %v2181_v32  ;;  %v2119_v21 = vld [vmem:[#allocation4] sm:$0xff]  ;;  %v2121_v32 = vld [vmem:[#allocation4 + $0x10] sm:$0xff] }
 0x63f   :  { %2185 = vmatprep.subr.mxu0 %v2176_v6  ;;  %2256 = vmatprep.subr.mxu1 %v2178_v51  ;;  %v2424_v6 = vld [vmem:[#allocation6 + $0x1e8] sm:$0xff]  ;;  %v2426_v51 = vld [vmem:[#allocation6 + $0x1f8] sm:$0xff] }
 0x640   :  { %2186 = vmatpush1.msra.mxu0 %v2175_v18  ;;  %2257 = vmatpush1.msra.mxu1 %v2177_v33  ;;  %v7482_v33 = vld [vmem:[#allocation52_spill] sm:$0xff] }
 0x641   :  { %2187 = vmatprep.subr.mxu0 %v2172_v27  ;;  %2258 = vmatprep.subr.mxu1 %v2174_v42 }
 0x642   :  { %2188 = vmatpush1.msra.mxu0 %v2171_v29  ;;  %2259 = vmatpush1.msra.mxu1 %v2173_v16  ;;  %v7483_v16 = vld [vmem:[#allocation54_spill] sm:$0xff] }
 0x643   :  { %2189 = vmatprep.subr.mxu0 %v2168_v22  ;;  %2260 = vmatprep.subr.mxu1 %v2170_v17 }
 0x644   :  { %2190 = vmatpush1.msra.mxu0 %v2167_v19  ;;  %2261 = vmatpush1.msra.mxu1 %v2169_v23 }
 0x645   :  { %2191 = vmatprep.subr.mxu0 %v2164_v60  ;;  %2262 = vmatprep.subr.mxu1 %v2166_v0  ;;  %v7484_v60 = vld [vmem:[#allocation55_spill] sm:$0xff] }
 0x646   :  { %2192 = vmatpush1.msra.mxu0 %v2163_v25  ;;  %2263 = vmatpush1.msra.mxu1 %v2165_v24  ;;  %v7485_v25 = vld [vmem:[#allocation53_spill] sm:$0xff] }
 0x647   :  { %2193 = vmatprep.subr.mxu0 %v2160_v28  ;;  %2264 = vmatprep.subr.mxu1 %v2162_v34 }
 0x648   :  { %2194 = vmatpush1.msra.mxu0 %v2159_v35  ;;  %2265 = vmatpush1.msra.mxu1 %v2161_v20 }
 0x649   :  { %2195 = vmatprep.subr.mxu0 %v2156_v26  ;;  %2266 = vmatprep.subr.mxu1 %v2158_v36 }
 0x64a   :  { %2196 = vmatpush1.msra.mxu0 %v2155_v37  ;;  %2267 = vmatpush1.msra.mxu1 %v2157_v38 }
 0x64b   :  { %2197 = vmatprep.subr.mxu0 %v2152_v39  ;;  %2268 = vmatprep.subr.mxu1 %v2154_v40 }
 0x64c   :  { %2198 = vmatpush1.msra.mxu0 %v2151_v41  ;;  %2269 = vmatpush1.msra.mxu1 %v2153_v44 }
 0x64d   :  { %2199 = vmatprep.subr.mxu0 %v2148_v45  ;;  %2270 = vmatprep.subr.mxu1 %v2150_v46 }
 0x64e   :  { %2200 = vmatpush1.msra.mxu0 %v2147_v47  ;;  %2271 = vmatpush1.msra.mxu1 %v2149_v48 }
 0x64f   :  { %2201 = vmatprep.subr.mxu0 %v2144_v49  ;;  %2272 = vmatprep.subr.mxu1 %v2146_v50  ;;  %v2423_v49 = vld [vmem:[#allocation6 + $0x1e0] sm:$0xff]  ;;  %v2425_v50 = vld [vmem:[#allocation6 + $0x1f0] sm:$0xff] }
 0x650   :  { %2202 = vmatpush1.msra.mxu0 %v2143_v52  ;;  %2273 = vmatpush1.msra.mxu1 %v2145_v53  ;;  %v2420_v52 = vld [vmem:[#allocation6 + $0x1c8] sm:$0xff]  ;;  %v2422_v53 = vld [vmem:[#allocation6 + $0x1d8] sm:$0xff] }
 0x651   :  { %2203 = vmatprep.subr.mxu0 %v2140_v54  ;;  %2274 = vmatprep.subr.mxu1 %v2142_v55  ;;  %v2419_v54 = vld [vmem:[#allocation6 + $0x1c0] sm:$0xff]  ;;  %v2421_v55 = vld [vmem:[#allocation6 + $0x1d0] sm:$0xff] }
 0x652   :  { %2204 = vmatpush1.msra.mxu0 %v2139_v56  ;;  %2275 = vmatpush1.msra.mxu1 %v2141_v57  ;;  %v2418_v56 = vld [vmem:[#allocation6 + $0x1b8] sm:$0xff]  ;;  %v2415_v57 = vld [vmem:[#allocation6 + $0x1a0] sm:$0xff] }
 0x653   :  { %2205 = vmatprep.subr.mxu0 %v2136_v59  ;;  %2276 = vmatprep.subr.mxu1 %v2138_v61  ;;  %v2417_v59 = vld [vmem:[#allocation6 + $0x1b0] sm:$0xff]  ;;  %v2412_v61 = vld [vmem:[#allocation6 + $0x188] sm:$0xff] }
 0x654   :  { %2206 = vmatpush1.msra.mxu0 %v2135_v62  ;;  %2277 = vmatpush1.msra.mxu1 %v2137_v63  ;;  %v2414_v62 = vld [vmem:[#allocation6 + $0x198] sm:$0xff]  ;;  %v2411_v63 = vld [vmem:[#allocation6 + $0x180] sm:$0xff] }
 0x655   :  { %2207 = vmatprep.subr.mxu0 %v2132_v1  ;;  %2278 = vmatprep.subr.mxu1 %v2134_v2  ;;  %v2413_v1 = vld [vmem:[#allocation6 + $0x190] sm:$0xff]  ;;  %v2408_v2 = vld [vmem:[#allocation6 + $0x168] sm:$0xff] }
 0x656   :  { %2208 = vmatpush1.msra.mxu0 %v2131_v3  ;;  %2279 = vmatpush1.msra.mxu1 %v2133_v4  ;;  %v2410_v3 = vld [vmem:[#allocation6 + $0x178] sm:$0xff]  ;;  %v2407_v4 = vld [vmem:[#allocation6 + $0x160] sm:$0xff] }
 0x657   :  { %2209 = vmatprep.subr.mxu0 %v2128_v5  ;;  %2280 = vmatprep.subr.mxu1 %v2130_v7  ;;  %v2409_v5 = vld [vmem:[#allocation6 + $0x170] sm:$0xff]  ;;  %v2404_v7 = vld [vmem:[#allocation6 + $0x148] sm:$0xff] }
 0x658   :  { %2210 = vmatpush1.msra.mxu0 %v2127_v8  ;;  %2281 = vmatpush1.msra.mxu1 %v2129_v9  ;;  %v2406_v8 = vld [vmem:[#allocation6 + $0x158] sm:$0xff]  ;;  %v2403_v9 = vld [vmem:[#allocation6 + $0x140] sm:$0xff] }
 0x659   :  { %2211 = vmatprep.subr.mxu0 %v2124_v10  ;;  %2282 = vmatprep.subr.mxu1 %v2126_v11  ;;  %v2405_v10 = vld [vmem:[#allocation6 + $0x150] sm:$0xff]  ;;  %v2400_v11 = vld [vmem:[#allocation6 + $0x128] sm:$0xff] }
 0x65a   :  { %2212 = vmatpush1.msra.mxu0 %v2123_v14  ;;  %2283 = vmatpush1.msra.mxu1 %v2125_v15  ;;  %v2402_v14 = vld [vmem:[#allocation6 + $0x138] sm:$0xff]  ;;  %v2399_v15 = vld [vmem:[#allocation6 + $0x120] sm:$0xff] }
 0x65b   :  { %2213 = vmatprep.subr.mxu0 %v2120_v58  ;;  %2284 = vmatprep.subr.mxu1 %v2122_v13  ;;  %v2401_v58 = vld [vmem:[#allocation6 + $0x130] sm:$0xff]  ;;  %v2396_v13 = vld [vmem:[#allocation6 + $0x108] sm:$0xff] }
 0x65c   :  { %2214 = vmatpush1.msra.mxu0 %v2119_v21  ;;  %2285 = vmatpush1.msra.mxu1 %v2121_v32  ;;  %v2398_v21 = vld [vmem:[#allocation6 + $0x118] sm:$0xff]  ;;  %v2395_v32 = vld [vmem:[#allocation6 + $0x100] sm:$0xff] }
 0x65d   :  { %2449 = vmatprep.subr.mxu0 %v2424_v6  ;;  %2562 = vmatprep.subr.mxu1 %v2426_v51  ;;  %v2397_v6 = vld [vmem:[#allocation6 + $0x110] sm:$0xff]  ;;  %v2392_v51 = vld [vmem:[#allocation6 + $0xe8] sm:$0xff] }
 0x6fc   :  { %v2006_v18 = vpop.f32.mrf.mxu0  ;;  %v2077_v17 = vpop.f32.mrf.mxu1 }
 0x6fd   :  { %v2082_v27 = vadd.f32 %v2006_v18, %v7482_v33  ;;  %v2084_v24 = vadd.f32 %v2077_v17, %v7485_v25  ;;  %v2394_v18 = vld [vmem:[#allocation6 + $0xf8] sm:$0xff]  ;;  %v2391_v33 = vld [vmem:[#allocation6 + $0xe0] sm:$0xff]  ;;  %v2384_v17 = vld [vmem:[#allocation6 + $0xa8] sm:$0xff] }
 0x6fe   :  { %v2008_v42 = vpop.f32.mrf.mxu0  ;;  %v2079_v23 = vpop.f32.mrf.mxu1  ;;  %v2382_v25 = vld [vmem:[#allocation6 + $0x98] sm:$0xff] }
 0x6ff   :  { %v4673_v29 = vmul.f32 -1.442695, %v2082_v27  ;;  %v2083_v22 = vadd.f32 %v2008_v42, %v7483_v16  ;;  %v2085_v0 = vadd.f32 %v2079_v23, %v7484_v60  ;;  %v2393_v27 = vld [vmem:[#allocation6 + $0xf0] sm:$0xff]  ;;  %v2388_v42 = vld [vmem:[#allocation6 + $0xc8] sm:$0xff]  ;;  %v2387_v16 = vld [vmem:[#allocation6 + $0xc0] sm:$0xff] }
 0x700   :  { %v2383_v23 = vld [vmem:[#allocation6 + $0xa0] sm:$0xff]  ;;  %v2385_v60 = vld [vmem:[#allocation6 + $0xb0] sm:$0xff] }
 0x701   :  { %4812 = vpow2.f32 %v4673_v29  ;;  %v4674_v19 = vmul.f32 -1.442695, %v2083_v22  ;;  %v4675_v28 = vmul.f32 -1.442695, %v2085_v0  ;;  %v2390_v29 = vld [vmem:[#allocation6 + $0xd8] sm:$0xff]  ;;  %v2389_v22 = vld [vmem:[#allocation6 + $0xd0] sm:$0xff] }
 0x702   :  { %v2380_v0 = vld [vmem:[#allocation6 + $0x88] sm:$0xff] }
 0x703   :  { %4814 = vpow2.f32 %v4674_v19  ;;  %v2386_v19 = vld [vmem:[#allocation6 + $0xb8] sm:$0xff] }
 0x704   :  { %4816 = vtanh.f32 %v2084_v24  ;;  %v2379_v24 = vld [vmem:[#allocation6 + $0x80] sm:$0xff] }
 0x705   :  { %4818 = vpow2.f32 %v4675_v28  ;;  %v2381_v28 = vld [vmem:[#allocation6 + $0x90] sm:$0xff] }
 0x70e   :  { %v4813_v34 = vpop.eup %4812 }
 0x70f   :  { %v2089_v35 = vadd.f32 1.0, %v4813_v34  ;;  %v2376_v34 = vld [vmem:[#allocation6 + $0x68] sm:$0xff] }
 0x710   :  { %v4815_v20 = vpop.eup %4814 }
 0x711   :  { %4820 = vrcp.f32 %v2089_v35  ;;  %v2095_v26 = vadd.f32 1.0, %v4815_v20  ;;  %v4817_v36 = vpop.eup %4816  ;;  %v2378_v35 = vld [vmem:[#allocation6 + $0x78] sm:$0xff]  ;;  %v2375_v20 = vld [vmem:[#allocation6 + $0x60] sm:$0xff] }
 0x712   :  { %v4819_v37 = vpop.eup %4818 }
 0x713   :  { %4822 = vrcp.f32 %v2095_v26  ;;  %v2102_v41 = vadd.f32 1.0, %v4819_v37  ;;  %v2377_v26 = vld [vmem:[#allocation6 + $0x70] sm:$0xff]  ;;  %v2374_v37 = vld [vmem:[#allocation6 + $0x58] sm:$0xff] }
 0x715   :  { %4824 = vrcp.f32 %v2102_v41  ;;  %v2370_v41 = vld [vmem:[#allocation6 + $0x38] sm:$0xff] }
 0x71e   :  { %v4821_v38 = vpop.eup %4820 }
 0x71f   :  { %v2106_v39 = vmul.f32 %v4821_v38, %v4817_v36  ;;  %v2372_v36 = vld [vmem:[#allocation6 + $0x48] sm:$0xff]  ;;  %v2371_v38 = vld [vmem:[#allocation6 + $0x40] sm:$0xff] }
 0x720   :  { %v4823_v40 = vpop.eup %4822 }
 0x721   :  { %v2105_v44 = vmul.f32 %v4823_v40, %v6128_v12  ;;  %v2416_v12 = vld [vmem:[#allocation6 + $0x1a8] sm:$0xff] }
 0x722   :  { %v4825_v46 = vpop.eup %4824  ;;  %v2368_v40 = vld [vmem:[#allocation6 + $0x28] sm:$0xff] }
 0x723   :  { %v6142_v45 = vadd.f32 %v2106_v39, %v2105_v44  ;;  %v2373_v39 = vld [vmem:[#allocation6 + $0x50] sm:$0xff]  ;;  %v2367_v44 = vld [vmem:[#allocation6 + $0x20] sm:$0xff] }
 0x725   :  { %4826 = vtanh.f32 %v6142_v45 }
 0x732   :  { %v4827_v47 = vpop.eup %4826 }
 0x733   :  { %v6145_v48 = vmul.f32 %v4827_v47, %v4825_v46  ;;  %v2369_v46 = vld [vmem:[#allocation6 + $0x30] sm:$0xff]  ;;  %v2364_v47 = vld [vmem:[#allocation6 + $0x8] sm:$0xff] }
 0x735   :  { %2248 = vmatmul.mubr.f32.vlgmr.msra.gmra.mxu0 %v6145_v48  ;;  %2319 = vmatmul.mubr.f32.vlgmr.msra.gmra.mxu1 %v6145_v48 }
 0x736   :  { %2450 = vmatpush1.msra.mxu0 %v2423_v49  ;;  %2563 = vmatpush1.msra.mxu1 %v2425_v50  ;;  %v2366_v49 = vld [vmem:[#allocation6 + $0x18] sm:$0xff]  ;;  %v2363_v50 = vld [vmem:[#allocation6] sm:$0xff] }
 0x737   :  { %2451 = vmatprep.subr.mxu0 %v2420_v52  ;;  %2564 = vmatprep.subr.mxu1 %v2422_v53  ;;  %v2365_v52 = vld [vmem:[#allocation6 + $0x10] sm:$0xff]  ;;  %v7486_v53 = vld [vmem:[#allocation60_spill] sm:$0xff] }
 0x738   :  { %2452 = vmatpush1.msra.mxu0 %v2419_v54  ;;  %2565 = vmatpush1.msra.mxu1 %v2421_v55  ;;  %v7487_v54 = vld [vmem:[#allocation11_spill] sm:$0xff] }
 0x739   :  { %2453 = vmatprep.subr.mxu0 %v2416_v12  ;;  %2566 = vmatprep.subr.mxu1 %v2418_v56  ;;  %v7488_v55 = vld [vmem:[#allocation31_spill] sm:$0xff]  ;;  %v7489_v12 = vld [vmem:[#allocation34_spill] sm:$0xff] }
 0x73a   :  { %2454 = vmatpush1.msra.mxu0 %v2415_v57  ;;  %2567 = vmatpush1.msra.mxu1 %v2417_v59  ;;  %v6181_v56 = vld [vmem:[#allocation8 + $0x1f8] sm:$0xff]  ;;  %v6187_v57 = vld [vmem:[#allocation8 + $0x1f0] sm:$0xff] }
 0x73b   :  { %2455 = vmatprep.subr.mxu0 %v2412_v61  ;;  %2568 = vmatprep.subr.mxu1 %v2414_v62  ;;  %7491 = vst [vmem:[#allocation33_spill] sm:$0xff] %v6181_v56  ;;  %v6193_v59 = vld [vmem:[#allocation8 + $0x1d8] sm:$0xff]  ;;  %v6197_v61 = vld [vmem:[#allocation8 + $0x1c0] sm:$0xff]  ;;  %v6199_v62 = vld [vmem:[#allocation8 + $0x1d0] sm:$0xff] }
 0x73c   :  { %2456 = vmatpush1.msra.mxu0 %v2411_v63  ;;  %2569 = vmatpush1.msra.mxu1 %v2413_v1  ;;  %v6203_v63 = vld [vmem:[#allocation8 + $0x1a8] sm:$0xff]  ;;  %v6205_v1 = vld [vmem:[#allocation8 + $0x1b8] sm:$0xff] }
 0x73d   :  { %2457 = vmatprep.subr.mxu0 %v2408_v2  ;;  %2570 = vmatprep.subr.mxu1 %v2410_v3  ;;  %v6209_v2 = vld [vmem:[#allocation8 + $0x1a0] sm:$0xff]  ;;  %v6211_v3 = vld [vmem:[#allocation8 + $0x1b0] sm:$0xff] }
 0x73e   :  { %2458 = vmatpush1.msra.mxu0 %v2407_v4  ;;  %2571 = vmatpush1.msra.mxu1 %v2409_v5  ;;  %v6215_v4 = vld [vmem:[#allocation8 + $0x188] sm:$0xff]  ;;  %v6217_v5 = vld [vmem:[#allocation8 + $0x198] sm:$0xff] }
 0x73f   :  { %2459 = vmatprep.subr.mxu0 %v2404_v7  ;;  %2572 = vmatprep.subr.mxu1 %v2406_v8  ;;  %v6221_v7 = vld [vmem:[#allocation8 + $0x180] sm:$0xff]  ;;  %v6223_v8 = vld [vmem:[#allocation8 + $0x190] sm:$0xff] }
 0x740   :  { %2460 = vmatpush1.msra.mxu0 %v2403_v9  ;;  %2573 = vmatpush1.msra.mxu1 %v2405_v10  ;;  %v6227_v9 = vld [vmem:[#allocation8 + $0x168] sm:$0xff]  ;;  %v6229_v10 = vld [vmem:[#allocation8 + $0x178] sm:$0xff] }
 0x741   :  { %2461 = vmatprep.subr.mxu0 %v2400_v11  ;;  %2574 = vmatprep.subr.mxu1 %v2402_v14  ;;  %v6233_v11 = vld [vmem:[#allocation8 + $0x160] sm:$0xff]  ;;  %v6235_v14 = vld [vmem:[#allocation8 + $0x170] sm:$0xff] }
 0x742   :  { %2462 = vmatpush1.msra.mxu0 %v2399_v15  ;;  %2575 = vmatpush1.msra.mxu1 %v2401_v58  ;;  %v6239_v15 = vld [vmem:[#allocation8 + $0x148] sm:$0xff]  ;;  %v6241_v58 = vld [vmem:[#allocation8 + $0x158] sm:$0xff] }
 0x743   :  { %2463 = vmatprep.subr.mxu0 %v2396_v13  ;;  %2576 = vmatprep.subr.mxu1 %v2398_v21  ;;  %v6245_v13 = vld [vmem:[#allocation8 + $0x140] sm:$0xff]  ;;  %v6247_v21 = vld [vmem:[#allocation8 + $0x150] sm:$0xff] }
 0x744   :  { %2464 = vmatpush1.msra.mxu0 %v2395_v32  ;;  %2577 = vmatpush1.msra.mxu1 %v2397_v6  ;;  %v6251_v32 = vld [vmem:[#allocation8 + $0x128] sm:$0xff]  ;;  %v6253_v6 = vld [vmem:[#allocation8 + $0x138] sm:$0xff] }
 0x745   :  { %2465 = vmatprep.subr.mxu0 %v2392_v51  ;;  %2578 = vmatprep.subr.mxu1 %v2394_v18  ;;  %v6257_v51 = vld [vmem:[#allocation8 + $0x120] sm:$0xff]  ;;  %v6259_v18 = vld [vmem:[#allocation8 + $0x130] sm:$0xff] }
 0x746   :  { %2466 = vmatpush1.msra.mxu0 %v2391_v33  ;;  %2579 = vmatpush1.msra.mxu1 %v2393_v27  ;;  %v6263_v33 = vld [vmem:[#allocation8 + $0x108] sm:$0xff]  ;;  %v6265_v27 = vld [vmem:[#allocation8 + $0x118] sm:$0xff] }
 0x747   :  { %2467 = vmatprep.subr.mxu0 %v2388_v42  ;;  %2580 = vmatprep.subr.mxu1 %v2390_v29  ;;  %v6269_v42 = vld [vmem:[#allocation8 + $0x100] sm:$0xff]  ;;  %v6271_v29 = vld [vmem:[#allocation8 + $0x110] sm:$0xff] }
 0x748   :  { %2468 = vmatpush1.msra.mxu0 %v2387_v16  ;;  %2581 = vmatpush1.msra.mxu1 %v2389_v22  ;;  %v6275_v16 = vld [vmem:[#allocation8 + $0xe8] sm:$0xff]  ;;  %v6277_v22 = vld [vmem:[#allocation8 + $0xf8] sm:$0xff] }
 0x749   :  { %2469 = vmatprep.subr.mxu0 %v2384_v17  ;;  %2582 = vmatprep.subr.mxu1 %v2386_v19  ;;  %v6281_v17 = vld [vmem:[#allocation8 + $0xe0] sm:$0xff]  ;;  %v6283_v19 = vld [vmem:[#allocation8 + $0xf0] sm:$0xff] }
 0x74a   :  { %2470 = vmatpush1.msra.mxu0 %v2383_v23  ;;  %2583 = vmatpush1.msra.mxu1 %v2385_v60  ;;  %v6287_v23 = vld [vmem:[#allocation8 + $0xc8] sm:$0xff]  ;;  %v6289_v60 = vld [vmem:[#allocation8 + $0xd8] sm:$0xff] }
 0x74b   :  { %2471 = vmatprep.subr.mxu0 %v2380_v0  ;;  %2584 = vmatprep.subr.mxu1 %v2382_v25  ;;  %v6293_v0 = vld [vmem:[#allocation8 + $0xc0] sm:$0xff]  ;;  %v6295_v25 = vld [vmem:[#allocation8 + $0xd0] sm:$0xff] }
 0x74c   :  { %2472 = vmatpush1.msra.mxu0 %v2379_v24  ;;  %2585 = vmatpush1.msra.mxu1 %v2381_v28  ;;  %v6299_v24 = vld [vmem:[#allocation8 + $0xa8] sm:$0xff]  ;;  %v6301_v28 = vld [vmem:[#allocation8 + $0xb8] sm:$0xff] }
 0x74d   :  { %2473 = vmatprep.subr.mxu0 %v2376_v34  ;;  %2586 = vmatprep.subr.mxu1 %v2378_v35  ;;  %v6305_v34 = vld [vmem:[#allocation8 + $0xa0] sm:$0xff]  ;;  %v6307_v35 = vld [vmem:[#allocation8 + $0xb0] sm:$0xff] }
 0x74e   :  { %2474 = vmatpush1.msra.mxu0 %v2375_v20  ;;  %2587 = vmatpush1.msra.mxu1 %v2377_v26  ;;  %v6311_v20 = vld [vmem:[#allocation8 + $0x88] sm:$0xff]  ;;  %v6313_v26 = vld [vmem:[#allocation8 + $0x98] sm:$0xff] }
 0x74f   :  { %2475 = vmatprep.subr.mxu0 %v2372_v36  ;;  %2588 = vmatprep.subr.mxu1 %v2374_v37  ;;  %7492 = vst [vmem:[#allocation36_spill] sm:$0xff] %v6311_v20  ;;  %7493 = vst [vmem:[#allocation38_spill] sm:$0xff] %v6313_v26  ;;  %v6317_v36 = vld [vmem:[#allocation8 + $0x80] sm:$0xff]  ;;  %v6319_v37 = vld [vmem:[#allocation8 + $0x90] sm:$0xff] }
 0x750   :  { %2476 = vmatpush1.msra.mxu0 %v2371_v38  ;;  %2589 = vmatpush1.msra.mxu1 %v2373_v39  ;;  %7494 = vst [vmem:[#allocation39_spill] sm:$0xff] %v6317_v36  ;;  %7495 = vst [vmem:[#allocation37_spill] sm:$0xff] %v6319_v37  ;;  %v6323_v38 = vld [vmem:[#allocation8 + $0x68] sm:$0xff]  ;;  %v6325_v39 = vld [vmem:[#allocation8 + $0x78] sm:$0xff] }
 0x751   :  { %2477 = vmatprep.subr.mxu0 %v2368_v40  ;;  %2590 = vmatprep.subr.mxu1 %v2370_v41  ;;  %7496 = vst [vmem:[#allocation40_spill] sm:$0xff] %v6323_v38  ;;  %7497 = vst [vmem:[#allocation42_spill] sm:$0xff] %v6325_v39  ;;  %v6329_v40 = vld [vmem:[#allocation8 + $0x60] sm:$0xff]  ;;  %v6331_v41 = vld [vmem:[#allocation8 + $0x70] sm:$0xff] }
 0x752   :  { %2478 = vmatpush1.msra.mxu0 %v2367_v44  ;;  %2591 = vmatpush1.msra.mxu1 %v2369_v46  ;;  %7498 = vst [vmem:[#allocation43_spill] sm:$0xff] %v6329_v40  ;;  %7499 = vst [vmem:[#allocation41_spill] sm:$0xff] %v6331_v41  ;;  %v6335_v44 = vld [vmem:[#allocation8 + $0x48] sm:$0xff]  ;;  %v6337_v46 = vld [vmem:[#allocation8 + $0x58] sm:$0xff] }
 0x753   :  { %2479 = vmatprep.subr.mxu0 %v2364_v47  ;;  %2592 = vmatprep.subr.mxu1 %v2366_v49  ;;  %7500 = vst [vmem:[#allocation12_spill] sm:$0xff] %v6335_v44  ;;  %7501 = vst [vmem:[#allocation13_spill] sm:$0xff] %v6337_v46  ;;  %v6341_v47 = vld [vmem:[#allocation8 + $0x40] sm:$0xff]  ;;  %v6343_v49 = vld [vmem:[#allocation8 + $0x50] sm:$0xff] }
 0x754   :  { %2480 = vmatpush1.msra.mxu0 %v2363_v50  ;;  %2513 = vmatprep.mubr.f32.mxu0 %v7476_v43  ;;  %7502 = vst [vmem:[#allocation44_spill] sm:$0xff] %v6341_v47  ;;  %7503 = vst [vmem:[#allocation46_spill] sm:$0xff] %v6343_v49  ;;  %v6347_v50 = vld [vmem:[#allocation8 + $0x28] sm:$0xff] }
 0x755   :  { %2593 = vmatpush1.msra.mxu1 %v2365_v52  ;;  %2626 = vmatprep.mubr.f32.mxu1 %v7476_v43  ;;  %7504 = vst [vmem:[#allocation47_spill] sm:$0xff] %v6347_v50  ;;  %v6349_v52 = vld [vmem:[#allocation8 + $0x38] sm:$0xff] }
 0x756   :  { %2514 = vmatmul.mubr.f32.vlgmr.msra.gmra.mxu0 %v7486_v53  ;;  %2627 = vmatmul.mubr.f32.vlgmr.msra.gmra.mxu1 %v7486_v53  ;;  %7505 = vst [vmem:[#allocation45_spill] sm:$0xff] %v6349_v52  ;;  %v6353_v53 = vld [vmem:[#allocation8 + $0x20] sm:$0xff] }
 0x757   :  { %2519 = vmatprep.mubr.f32.mxu0 %v7476_v43  ;;  %2632 = vmatprep.mubr.f32.mxu1 %v7476_v43  ;;  %7506 = vst [vmem:[#allocation14_spill] sm:$0xff] %v6353_v53 }
 0x758   :  { %2846 = vmatprep.subr.mxu1 %v6181_v56 }
 0x759   :  { %2847 = vmatpush1.msra.mxu1 %v6187_v57 }
 0x75a   :  { %2520 = vmatmul.mubr.f32.gmra.mxu0 %v7487_v54  ;;  %2633 = vmatmul.mubr.f32.gmra.mxu1 %v7487_v54  ;;  %v6355_v54 = vld [vmem:[#allocation8 + $0x30] sm:$0xff] }
 0x75b   :  { %2525 = vmatprep.mubr.f32.mxu0 %v7476_v43  ;;  %2638 = vmatprep.mubr.f32.mxu1 %v7476_v43  ;;  %7507 = vst [vmem:[#allocation15_spill] sm:$0xff] %v6355_v54 }
 0x75c   :  { %2848 = vmatprep.subr.mxu1 %v6193_v59 }
 0x75d   :  { %2849 = vmatpush1.msra.mxu1 %v6199_v62 }
 0x75e   :  { %2526 = vmatmul.mubr.f32.gmra.mxu0 %v7488_v55  ;;  %2639 = vmatmul.mubr.f32.gmra.mxu1 %v7488_v55  ;;  %v6359_v55 = vld [vmem:[#allocation8 + $0x8] sm:$0xff] }
 0x75f   :  { %2531 = vmatprep.mubr.f32.mxu0 %v7476_v43  ;;  %2644 = vmatprep.mubr.f32.mxu1 %v7476_v43  ;;  %7508 = vst [vmem:[#allocation16_spill] sm:$0xff] %v6359_v55 }
 0x760   :  { %2850 = vmatprep.subr.mxu1 %v6205_v1 }
 0x761   :  { %2851 = vmatpush1.msra.mxu1 %v6211_v3 }
 0x762   :  { %2532 = vmatmul.mubr.f32.gmra.mxu0 %v7489_v12  ;;  %2645 = vmatmul.mubr.f32.gmra.mxu1 %v7489_v12  ;;  %v6361_v12 = vld [vmem:[#allocation8 + $0x18] sm:$0xff] }
 0x763   :  { %2537 = vmatprep.mubr.f32.mxu0 %v7476_v43  ;;  %2650 = vmatprep.mubr.f32.mxu1 %v7476_v43  ;;  %7509 = vst [vmem:[#allocation17_spill] sm:$0xff] %v6361_v12 }
 0x764   :  { %2852 = vmatprep.subr.mxu1 %v6217_v5 }
 0x765   :  { %2853 = vmatpush1.msra.mxu1 %v6223_v8 }
 0x766   :  { %2538 = vmatmul.mubr.f32.gmra.mxu0 %v6055_v30  ;;  %2651 = vmatmul.mubr.f32.gmra.mxu1 %v6055_v30  ;;  %v6179_v30 = vld [vmem:[#allocation8 + $0x1e8] sm:$0xff] }
 0x767   :  { %2543 = vmatprep.mubr.f32.mxu0 %v7476_v43  ;;  %2656 = vmatprep.mubr.f32.mxu1 %v7476_v43  ;;  %7490 = vst [vmem:[#allocation35_spill] sm:$0xff] %v6179_v30 }
 0x768   :  { %2775 = vmatprep.subr.mxu0 %v6179_v30  ;;  %2854 = vmatprep.subr.mxu1 %v6229_v10 }
 0x769   :  { %2855 = vmatpush1.msra.mxu1 %v6235_v14 }
 0x76a   :  { %2544 = vmatmul.mubr.f32.gmra.mxu0 %v6131_v31  ;;  %2657 = vmatmul.mubr.f32.gmra.mxu1 %v6131_v31  ;;  %v6185_v31 = vld [vmem:[#allocation8 + $0x1e0] sm:$0xff] }
 0x76b   :  { %2549 = vmatprep.mubr.f32.mxu0 %v7476_v43  ;;  %2662 = vmatprep.mubr.f32.mxu1 %v7476_v43 }
 0x76c   :  { %2776 = vmatpush1.msra.mxu0 %v6185_v31  ;;  %2856 = vmatprep.subr.mxu1 %v6241_v58 }
 0x76d   :  { %2857 = vmatpush1.msra.mxu1 %v6247_v21 }
 0x76e   :  { %2550 = vmatmul.mubr.f32.gmra.mxu0 %v6145_v48  ;;  %2663 = vmatmul.mubr.f32.gmra.mxu1 %v6145_v48  ;;  %v6191_v48 = vld [vmem:[#allocation8 + $0x1c8] sm:$0xff] }
 0x76f   :  { %2555 = vmatprep.mubr.f32.mxu0 %v7476_v43  ;;  %2668 = vmatprep.mubr.f32.mxu1 %v7476_v43 }
 0x770   :  { %2777 = vmatprep.subr.mxu0 %v6191_v48  ;;  %2858 = vmatprep.subr.mxu1 %v6253_v6 }
 0x771   :  { %2778 = vmatpush1.msra.mxu0 %v6197_v61  ;;  %2859 = vmatpush1.msra.mxu1 %v6259_v18 }
 0x772   :  { %2779 = vmatprep.subr.mxu0 %v6203_v63  ;;  %2860 = vmatprep.subr.mxu1 %v6265_v27 }
 0x773   :  { %2780 = vmatpush1.msra.mxu0 %v6209_v2  ;;  %2861 = vmatpush1.msra.mxu1 %v6271_v29 }
 0x774   :  { %2781 = vmatprep.subr.mxu0 %v6215_v4  ;;  %2862 = vmatprep.subr.mxu1 %v6277_v22 }
 0x775   :  { %2782 = vmatpush1.msra.mxu0 %v6221_v7  ;;  %2863 = vmatpush1.msra.mxu1 %v6283_v19 }
 0x776   :  { %2783 = vmatprep.subr.mxu0 %v6227_v9  ;;  %2864 = vmatprep.subr.mxu1 %v6289_v60 }
 0x777   :  { %2784 = vmatpush1.msra.mxu0 %v6233_v11  ;;  %2865 = vmatpush1.msra.mxu1 %v6295_v25 }
 0x778   :  { %2785 = vmatprep.subr.mxu0 %v6239_v15  ;;  %2866 = vmatprep.subr.mxu1 %v6301_v28 }
 0x779   :  { %2786 = vmatpush1.msra.mxu0 %v6245_v13  ;;  %2867 = vmatpush1.msra.mxu1 %v6307_v35 }
 0x77a   :  { %2787 = vmatprep.subr.mxu0 %v6251_v32  ;;  %2868 = vmatprep.subr.mxu1 %v6313_v26 }
 0x77b   :  { %2788 = vmatpush1.msra.mxu0 %v6257_v51  ;;  %2869 = vmatpush1.msra.mxu1 %v6319_v37 }
 0x77c   :  { %2789 = vmatprep.subr.mxu0 %v6263_v33  ;;  %2870 = vmatprep.subr.mxu1 %v6325_v39  ;;  %v7514_v39 = vld [vmem:[#allocation59_spill] sm:$0xff] }
 0x77d   :  { %2790 = vmatpush1.msra.mxu0 %v6269_v42  ;;  %2871 = vmatpush1.msra.mxu1 %v6331_v41 }
 0x77e   :  { %2791 = vmatprep.subr.mxu0 %v6275_v16  ;;  %2872 = vmatprep.subr.mxu1 %v6337_v46 }
 0x77f   :  { %2792 = vmatpush1.msra.mxu0 %v6281_v17  ;;  %2873 = vmatpush1.msra.mxu1 %v6343_v49  ;;  %v6363_v49 = vld [vmem:[#allocation8] sm:$0xff] }
 0x780   :  { %2793 = vmatprep.subr.mxu0 %v6287_v23  ;;  %2874 = vmatprep.subr.mxu1 %v6349_v52  ;;  %7510 = vst [vmem:[#allocation18_spill] sm:$0xff] %v6363_v49 }
 0x781   :  { %2794 = vmatpush1.msra.mxu0 %v6293_v0  ;;  %2875 = vmatpush1.msra.mxu1 %v6355_v54 }
 0x782   :  { %2795 = vmatprep.subr.mxu0 %v6299_v24  ;;  %2876 = vmatprep.subr.mxu1 %v6361_v12 }
 0x783   :  { %2796 = vmatpush1.msra.mxu0 %v6305_v34 }
 0x784   :  { %2797 = vmatprep.subr.mxu0 %v6311_v20 }
 0x785   :  { %2798 = vmatpush1.msra.mxu0 %v6317_v36 }
 0x786   :  { %2799 = vmatprep.subr.mxu0 %v6323_v38  ;;  %v7515_v38 = vld [vmem:[#allocation57_spill] sm:$0xff] }
 0x787   :  { %2800 = vmatpush1.msra.mxu0 %v6329_v40 }
 0x788   :  { %2801 = vmatprep.subr.mxu0 %v6335_v44  ;;  %v7513_v44 = vld [vmem:[#allocation58_spill] sm:$0xff] }
 0x789   :  { %2802 = vmatpush1.msra.mxu0 %v6341_v47 }
 0x78a   :  { %2803 = vmatprep.subr.mxu0 %v6347_v50  ;;  %v6367_v50 = vld [vmem:[#allocation8 + $0x10] sm:$0xff] }
 0x78b   :  { %2804 = vmatpush1.msra.mxu0 %v6353_v53  ;;  %7511 = vst [vmem:[#allocation19_spill] sm:$0xff] %v6367_v50  ;;  %2877 = vmatpush1.msra.mxu1 %v6367_v50  ;;  %v7512_v53 = vld [vmem:[#allocation56_spill] sm:$0xff] }
 0x78c   :  { %2805 = vmatprep.subr.mxu0 %v6359_v55  ;;  %3085 = vmatprep.subr.mxu1 %v6181_v56 }
 0x78d   :  { %2806 = vmatpush1.msra.mxu0 %v6363_v49 }
 0x78e   :  { %3014 = vmatprep.subr.mxu0 %v6179_v30 }
 0x7f5   :  { %v2249_v54 = vpop.f32.mrf.mxu0  ;;  %v2320_v55 = vpop.f32.mrf.mxu1 }
 0x7f6   :  { %v2325_v52 = vadd.f32 %v2249_v54, %v7512_v53  ;;  %v2327_v50 = vadd.f32 %v2320_v55, %v7515_v38  ;;  %v7522_v55 = vld [vmem:[#allocation12_spill] sm:$0xff] }
 0x7f7   :  { %v2251_v47 = vpop.f32.mrf.mxu0  ;;  %v2322_v40 = vpop.f32.mrf.mxu1 }
 0x7f8   :  { %v4676_v46 = vmul.f32 -1.442695, %v2325_v52  ;;  %v2326_v41 = vadd.f32 %v2251_v47, %v7513_v44  ;;  %v2328_v49 = vadd.f32 %v2322_v40, %v7514_v39 }
 0x7fa   :  { %4828 = vpow2.f32 %v4676_v46  ;;  %v4677_v12 = vmul.f32 -1.442695, %v2326_v41  ;;  %v4678_v37 = vmul.f32 -1.442695, %v2328_v49  ;;  %v7520_v49 = vld [vmem:[#allocation43_spill] sm:$0xff] }
 0x7fc   :  { %4830 = vpow2.f32 %v4677_v12 }
 0x7fd   :  { %4832 = vtanh.f32 %v2327_v50  ;;  %v7521_v50 = vld [vmem:[#allocation41_spill] sm:$0xff] }
 0x7fe   :  { %4834 = vpow2.f32 %v4678_v37  ;;  %v7519_v37 = vld [vmem:[#allocation42_spill] sm:$0xff] }
 0x807   :  { %v4829_v30 = vpop.eup %4828 }
 0x808   :  { %v2332_v36 = vadd.f32 1.0, %v4829_v30 }
 0x809   :  { %v4831_v56 = vpop.eup %4830 }
 0x80a   :  { %4836 = vrcp.f32 %v2332_v36  ;;  %v2338_v53 = vadd.f32 1.0, %v4831_v56  ;;  %v4833_v52 = vpop.eup %4832  ;;  %v7517_v56 = vld [vmem:[#allocation37_spill] sm:$0xff]  ;;  %v7518_v36 = vld [vmem:[#allocation40_spill] sm:$0xff] }
 0x80b   :  { %v4835_v44 = vpop.eup %4834 }
 0x80c   :  { %4838 = vrcp.f32 %v2338_v53  ;;  %v2345_v54 = vadd.f32 1.0, %v4835_v44  ;;  %v7523_v53 = vld [vmem:[#allocation13_spill] sm:$0xff]  ;;  %v7525_v44 = vld [vmem:[#allocation46_spill] sm:$0xff] }
 0x80e   :  { %4840 = vrcp.f32 %v2345_v54  ;;  %v7529_v54 = vld [vmem:[#allocation15_spill] sm:$0xff] }
 0x817   :  { %v4837_v46 = vpop.eup %4836 }
 0x818   :  { %v2349_v47 = vmul.f32 %v4837_v46, %v4833_v52  ;;  %v7524_v52 = vld [vmem:[#allocation44_spill] sm:$0xff]  ;;  %v7526_v46 = vld [vmem:[#allocation47_spill] sm:$0xff] }
 0x819   :  { %v4839_v41 = vpop.eup %4838 }
 0x81a   :  { %v2348_v12 = vmul.f32 %v4839_v41, %v6142_v45  ;;  %v7516_v45 = vld [vmem:[#allocation39_spill] sm:$0xff]  ;;  %v7528_v41 = vld [vmem:[#allocation14_spill] sm:$0xff] }
 0x81b   :  { %v4841_v38 = vpop.eup %4840 }
 0x81c   :  { %v2350_v39 = vadd.f32 %v2349_v47, %v2348_v12  ;;  %v7527_v47 = vld [vmem:[#allocation45_spill] sm:$0xff]  ;;  %v7530_v12 = vld [vmem:[#allocation16_spill] sm:$0xff] }
 0x81e   :  { %4842 = vtanh.f32 %v2350_v39  ;;  %v7531_v39 = vld [vmem:[#allocation17_spill] sm:$0xff] }
 0x82b   :  { %v4843_v40 = vpop.eup %4842 }
 0x82c   :  { %v2352_v30 = vmul.f32 %v4843_v40, %v4841_v38  ;;  %v7532_v38 = vld [vmem:[#allocation18_spill] sm:$0xff]  ;;  %v7533_v40 = vld [vmem:[#allocation19_spill] sm:$0xff] }
 0x82e   :  { %2556 = vmatmul.mubr.f32.gmra.mxu0 %v2352_v30  ;;  %2669 = vmatmul.mubr.f32.gmra.mxu1 %v2352_v30  ;;  %v7534_v30 = vld [vmem:[#allocation35_spill] sm:$0xff] }
 0x82f   :  { %2839 = vmatprep.mubr.f32.mxu0 %v7476_v43  ;;  %2910 = vmatprep.mubr.f32.mxu1 %v7476_v43 }
 0x832   :  { %2840 = vmatmul.mubr.f32.vlgmr.msra.gmra.mxu0 %v7476_v43  ;;  %2911 = vmatmul.mubr.f32.vlgmr.msra.gmra.mxu1 %v7476_v43 }
 0x833   :  { %3015 = vmatpush1.msra.mxu0 %v6185_v31  ;;  %3086 = vmatpush1.msra.mxu1 %v6187_v57 }
 0x834   :  { %3016 = vmatprep.subr.mxu0 %v6191_v48  ;;  %3087 = vmatprep.subr.mxu1 %v6193_v59 }
 0x835   :  { %3017 = vmatpush1.msra.mxu0 %v6197_v61  ;;  %3088 = vmatpush1.msra.mxu1 %v6199_v62 }
 0x836   :  { %3018 = vmatprep.subr.mxu0 %v6203_v63  ;;  %3089 = vmatprep.subr.mxu1 %v6205_v1 }
 0x837   :  { %3019 = vmatpush1.msra.mxu0 %v6209_v2  ;;  %3090 = vmatpush1.msra.mxu1 %v6211_v3 }
 0x838   :  { %3020 = vmatprep.subr.mxu0 %v6215_v4  ;;  %3091 = vmatprep.subr.mxu1 %v6217_v5 }
 0x839   :  { %3021 = vmatpush1.msra.mxu0 %v6221_v7  ;;  %3092 = vmatpush1.msra.mxu1 %v6223_v8 }
 0x83a   :  { %3022 = vmatprep.subr.mxu0 %v6227_v9  ;;  %3093 = vmatprep.subr.mxu1 %v6229_v10 }
 0x83b   :  { %3023 = vmatpush1.msra.mxu0 %v6233_v11  ;;  %3094 = vmatpush1.msra.mxu1 %v6235_v14 }
 0x83c   :  { %3024 = vmatprep.subr.mxu0 %v6239_v15  ;;  %3095 = vmatprep.subr.mxu1 %v6241_v58 }
 0x83d   :  { %3025 = vmatpush1.msra.mxu0 %v6245_v13  ;;  %3096 = vmatpush1.msra.mxu1 %v6247_v21 }
 0x83e   :  { %3026 = vmatprep.subr.mxu0 %v6251_v32  ;;  %3097 = vmatprep.subr.mxu1 %v6253_v6 }
 0x83f   :  { %3027 = vmatpush1.msra.mxu0 %v6257_v51  ;;  %3098 = vmatpush1.msra.mxu1 %v6259_v18 }
 0x840   :  { %3028 = vmatprep.subr.mxu0 %v6263_v33  ;;  %3099 = vmatprep.subr.mxu1 %v6265_v27 }
 0x841   :  { %3029 = vmatpush1.msra.mxu0 %v6269_v42  ;;  %3100 = vmatpush1.msra.mxu1 %v6271_v29 }
 0x842   :  { %3030 = vmatprep.subr.mxu0 %v6275_v16  ;;  %3101 = vmatprep.subr.mxu1 %v6277_v22 }
 0x843   :  { %3031 = vmatpush1.msra.mxu0 %v6281_v17  ;;  %3102 = vmatpush1.msra.mxu1 %v6283_v19 }
 0x844   :  { %3032 = vmatprep.subr.mxu0 %v6287_v23  ;;  %3103 = vmatprep.subr.mxu1 %v6289_v60 }
 0x845   :  { %3033 = vmatpush1.msra.mxu0 %v6293_v0  ;;  %3104 = vmatpush1.msra.mxu1 %v6295_v25 }
 0x846   :  { %3034 = vmatprep.subr.mxu0 %v6299_v24  ;;  %3105 = vmatprep.subr.mxu1 %v6301_v28 }
 0x847   :  { %3035 = vmatpush1.msra.mxu0 %v6305_v34  ;;  %3106 = vmatpush1.msra.mxu1 %v6307_v35 }
 0x848   :  { %3036 = vmatprep.subr.mxu0 %v6311_v20  ;;  %3107 = vmatprep.subr.mxu1 %v6313_v26 }
 0x849   :  { %3037 = vmatpush1.msra.mxu0 %v7516_v45  ;;  %3108 = vmatpush1.msra.mxu1 %v7517_v56 }
 0x84a   :  { %3038 = vmatprep.subr.mxu0 %v7518_v36  ;;  %3109 = vmatprep.subr.mxu1 %v7519_v37 }
 0x84b   :  { %3039 = vmatpush1.msra.mxu0 %v7520_v49  ;;  %3110 = vmatpush1.msra.mxu1 %v7521_v50 }
 0x84c   :  { %3040 = vmatprep.subr.mxu0 %v7522_v55  ;;  %3111 = vmatprep.subr.mxu1 %v7523_v53 }
 0x84d   :  { %3041 = vmatpush1.msra.mxu0 %v7524_v52  ;;  %3112 = vmatpush1.msra.mxu1 %v7525_v44 }
 0x84e   :  { %3042 = vmatprep.subr.mxu0 %v7526_v46  ;;  %3113 = vmatprep.subr.mxu1 %v7527_v47  ;;  %v7535_v46 = vld [vmem:[#allocation33_spill] sm:$0xff]  ;;  %v2515_v47 = vpop.f32.mrf.mxu0 }
 0x84f   :  { %3043 = vmatpush1.msra.mxu0 %v7528_v41  ;;  %3114 = vmatpush1.msra.mxu1 %v7529_v54  ;;  %v2628_v41 = vpop.f32.mrf.mxu1 }
 0x850   :  { %3044 = vmatprep.subr.mxu0 %v7530_v12  ;;  %3115 = vmatprep.subr.mxu1 %v7531_v39  ;;  %v2517_v44 = vpop.f32.mrf.mxu0 }
 0x851   :  { %3045 = vmatpush1.msra.mxu0 %v7532_v38  ;;  %3078 = vmatprep.mubr.f32.mxu0 %v7476_v43  ;;  %v2630_v54 = vpop.f32.mrf.mxu1 }
 0x852   :  { %3116 = vmatpush1.msra.mxu1 %v7533_v40  ;;  %3149 = vmatprep.mubr.f32.mxu1 %v7476_v43  ;;  %v6448_v52 = vpop.f32.mrf.mxu0 }
 0x853   :  { %3254 = vmatprep.subr.mxu0 %v7534_v30  ;;  %3325 = vmatprep.subr.mxu1 %v7535_v46  ;;  %7536 = vst [vmem:[#allocation20_spill] sm:$0xff] %v6448_v52  ;;  %v6450_v12 = vpop.f32.mrf.mxu1 }
 0x854   :  { %7537 = vst [vmem:[#allocation21_spill] sm:$0xff] %v6450_v12  ;;  %v6452_v39 = vpop.f32.mrf.mxu0 }
 0x855   :  { %7538 = vst [vmem:[#allocation22_spill] sm:$0xff] %v6452_v39  ;;  %v6454_v38 = vpop.f32.mrf.mxu1 }
 0x856   :  { %7539 = vst [vmem:[#allocation23_spill] sm:$0xff] %v6454_v38  ;;  %v6456_v53 = vpop.f32.mrf.mxu0 }
 0x857   :  { %7540 = vst [vmem:[#allocation24_spill] sm:$0xff] %v6456_v53  ;;  %v6458_v40 = vpop.f32.mrf.mxu1 }
 0x858   :  { %7541 = vst [vmem:[#allocation25_spill] sm:$0xff] %v6458_v40  ;;  %v6460_v43 = vpop.f32.mrf.mxu0 }
 0x859   :  { %7542 = vst [vmem:[#allocation26_spill] sm:$0xff] %v6460_v43  ;;  %v6462_v30 = vpop.f32.mrf.mxu1 }
 0x85a   :  { %7543 = vst [vmem:[#allocation27_spill] sm:$0xff] %v6462_v30  ;;  %v6464_v46 = vpop.f32.mrf.mxu0 }
 0x85b   :  { %7544 = vst [vmem:[#allocation28_spill] sm:$0xff] %v6464_v46  ;;  %v6466_v55 = vpop.f32.mrf.mxu1 }
 0x85c   :  { %7545 = vst [vmem:[#allocation29_spill] sm:$0xff] %v6466_v55  ;;  %v6468_v50 = vpop.f32.mrf.mxu0 }
 0x85d   :  { %7546 = vst [vmem:[#allocation30_spill] sm:$0xff] %v6468_v50  ;;  %v6470_v52 = vpop.f32.mrf.mxu1 }
 0x85e   :  { %7547 = vst [vmem:[#allocation48_spill] sm:$0xff] %v6470_v52  ;;  %v6472_v12 = vpop.f32.mrf.mxu0 }
 0x85f   :  { %7548 = vst [vmem:[#allocation50_spill] sm:$0xff] %v6472_v12  ;;  %v6474_v39 = vpop.f32.mrf.mxu1 }
 0x860   :  { %7549 = vst [vmem:[#allocation51_spill] sm:$0xff] %v6474_v39  ;;  %v6476_v38 = vpop.f32.mrf.mxu0  ;;  %v2427_v39 = vld [vmem:[%s7123_s6] sm:$0xf] }
 0x861   :  { %7550 = vst [vmem:[#allocation49_spill] sm:$0xff] %v6476_v38  ;;  %v6478_v53 = vpop.f32.mrf.mxu1  ;;  %v7559_v38 = vld [vmem:[#allocation32_spill] sm:$0xff] }
 0x862   :  { %7551 = vst [vmem:[#allocation52_spill] sm:$0xff] %v6478_v53  ;;  %v6480_v40 = vpop.f32.mrf.mxu0  ;;  %v7560_v53 = vsub.s32 0, %v7559_v38 }
 0x863   :  { %7552 = vst [vmem:[#allocation54_spill] sm:$0xff] %v6480_v40  ;;  %v6482_v43 = vpop.f32.mrf.mxu1 }
 0x864   :  { %7553 = vst [vmem:[#allocation55_spill] sm:$0xff] %v6482_v43  ;;  %v6484_v30 = vpop.f32.mrf.mxu0  ;;  %v6499_v52 = vrot.slane %v2427_v39, %v7560_v53 }
 0x865   :  { %7554 = vst [vmem:[#allocation53_spill] sm:$0xff] %v6484_v30  ;;  %v6486_v46 = vpop.f32.mrf.mxu1 }
 0x866   :  { %7555 = vst [vmem:[#allocation60_spill] sm:$0xff] %v6486_v46  ;;  %v6488_v55 = vpop.f32.mrf.mxu0  ;;  %7561 = vst [vmem:[#allocation56_spill] sm:$0xff] %v6499_v52  ;;  %v7564_v46 = vsub.s32 1, %v7559_v38  ;;  %v2516_v49 = vadd.f32 %v2515_v47, %v6499_v52 }
 0x867   :  { %7556 = vst [vmem:[#allocation11_spill] sm:$0xff] %v6488_v55  ;;  %v6490_v50 = vpop.f32.mrf.mxu1 }
 0x868   :  { %7557 = vst [vmem:[#allocation31_spill] sm:$0xff] %v6490_v50  ;;  %v6495_v12 = vpop.f32.mrf.mxu0  ;;  %v6507_v30 = vrot.slane %v2427_v39, %v7564_v46  ;;  %v7568_v46 = vsub.s32 3, %v7559_v38 }
 0x869   :  { %7558 = vst [vmem:[#allocation34_spill] sm:$0xff] %v6495_v12  ;;  %v6501_v40 = vpop.f32.mrf.mxu1 }
 0x86a   :  { %7562 = vst [vmem:[#allocation58_spill] sm:$0xff] %v6501_v40  ;;  %v2518_v12 = vadd.f32 %v2517_v44, %v6507_v30  ;;  %v6519_v20 = vrot.slane %v2427_v39, %v7568_v46 }
 0x86c   :  { %7569 = vst [vmem:[#allocation32_spill] sm:$0xff] %v6519_v20  ;;  %v2631_v47 = vadd.f32 %v2630_v54, %v6519_v20 }
 0x8ee   :  { %v6503_v43 = vpop.f32.mrf.mxu0  ;;  %v6509_v55 = vpop.f32.mrf.mxu1 }
 0x8ef   :  { %7563 = vst [vmem:[#allocation59_spill] sm:$0xff] %v6503_v43  ;;  %7565 = vst [vmem:[#allocation57_spill] sm:$0xff] %v6509_v55 }
 0x8f0   :  { %v6511_v50 = vpop.f32.mrf.mxu0  ;;  %v6515_v36 = vpop.f32.mrf.mxu1 }
 0x8f1   :  { %7566 = vst [vmem:[#allocation35_spill] sm:$0xff] %v6511_v50  ;;  %7567 = vst [vmem:[#allocation33_spill] sm:$0xff] %v6515_v36  ;;  %v7570_v50 = vsub.s32 2, %v7559_v38 }
 0x8f2   :  { %v2841_v37 = vpop.f32.mrf.mxu0  ;;  %v2912_v43 = vpop.f32.mrf.mxu1 }
 0x8f3   :  { %v2917_v53 = vadd.f32 %v2841_v37, %v2516_v49  ;;  %v6524_v44 = vrot.slane %v2427_v39, %v7570_v50 }
 0x8f4   :  { %v2843_v56 = vpop.f32.mrf.mxu0  ;;  %v2914_v55 = vpop.f32.mrf.mxu1 }
 0x8f5   :  { %v4679_v40 = vmul.f32 -1.442695, %v2917_v53  ;;  %v2918_v45 = vadd.f32 %v2843_v56, %v2518_v12  ;;  %v2920_v36 = vadd.f32 %v2914_v55, %v2631_v47  ;;  %v2629_v37 = vadd.f32 %v2628_v41, %v6524_v44 }
 0x8f7   :  { %4844 = vpow2.f32 %v4679_v40  ;;  %v4680_v26 = vmul.f32 -1.442695, %v2918_v45  ;;  %v4681_v49 = vmul.f32 -1.442695, %v2920_v36  ;;  %v2919_v12 = vadd.f32 %v2912_v43, %v2629_v37 }
 0x8f9   :  { %4846 = vpow2.f32 %v4680_v26 }
 0x8fa   :  { %4848 = vpow2.f32 %v4681_v49  ;;  %v7596_v49 = vld [vmem:[#allocation21_spill] sm:$0xff] }
 0x904   :  { %v4845_v56 = vpop.eup %4844 }
 0x905   :  { %v2924_v40 = vadd.f32 1.0, %v4845_v56  ;;  %v2635_v56 = vadd.f32 %v7596_v49, %v6524_v44  ;;  %v6650_v49 = vld [vmem:[#allocation8 + $0x188] sm:$0xff] }
 0x906   :  { %v4847_v45 = vpop.eup %4846 }
 0x907   :  { %4850 = vrcp.f32 %v2924_v40  ;;  %v2930_v53 = vadd.f32 1.0, %v4847_v45  ;;  %v4849_v26 = vpop.eup %4848 }
 0x908   :  { %4852 = vtanh.f32 %v2919_v12  ;;  %v2937_v38 = vadd.f32 1.0, %v4849_v26 }
 0x909   :  { %4854 = vrcp.f32 %v2930_v53 }
 0x90a   :  { %4856 = vrcp.f32 %v2937_v38 }
 0x914   :  { %v4851_v46 = vpop.eup %4850 }
 0x915   :  { %v4853_v54 = vpop.eup %4852 }
 0x916   :  { %v4855_v20 = vpop.eup %4854  ;;  %v2941_v39 = vmul.f32 %v4853_v54, %v4851_v46 }
 0x917   :  { %v2940_v50 = vmul.f32 0.0, %v4855_v20  ;;  %v4857_v43 = vpop.eup %4856  ;;  %v7595_v20 = vld [vmem:[#allocation23_spill] sm:$0xff] }
 0x919   :  { %v6527_v55 = vadd.f32 %v2941_v39, %v2940_v50 }
 0x91b   :  { %4858 = vtanh.f32 %v6527_v55 }
 0x928   :  { %v4859_v36 = vpop.eup %4858 }
 0x929   :  { %v2944_v41 = vmul.f32 %v4859_v36, %v4857_v43 }
 0x92b   :  { %2945 = vst [vmem:[%s7124_s7] sm:$0xff] %v2944_v41  ;;  %3079 = vmatmul.mubr.f32.vlgmr.msra.gmra.mxu0 %v2944_v41  ;;  %3150 = vmatmul.mubr.f32.vlgmr.msra.gmra.mxu1 %v2944_v41 }
 0x92c   :  { %3255 = vmatpush1.msra.mxu0 %v6185_v31  ;;  %3326 = vmatpush1.msra.mxu1 %v6187_v57  ;;  %v7571_v31 = vld [vmem:[#allocation36_spill] sm:$0xff]  ;;  %v7572_v57 = vld [vmem:[#allocation38_spill] sm:$0xff] }
 0x92d   :  { %3256 = vmatprep.subr.mxu0 %v6191_v48  ;;  %3327 = vmatprep.subr.mxu1 %v6193_v59  ;;  %v7573_v48 = vld [vmem:[#allocation39_spill] sm:$0xff]  ;;  %v7574_v59 = vld [vmem:[#allocation37_spill] sm:$0xff] }
 0x92e   :  { %3257 = vmatpush1.msra.mxu0 %v6197_v61  ;;  %3328 = vmatpush1.msra.mxu1 %v6199_v62  ;;  %v7575_v61 = vld [vmem:[#allocation40_spill] sm:$0xff]  ;;  %v7576_v62 = vld [vmem:[#allocation42_spill] sm:$0xff] }
 0x92f   :  { %3258 = vmatprep.subr.mxu0 %v6203_v63  ;;  %3329 = vmatprep.subr.mxu1 %v6205_v1  ;;  %v7577_v63 = vld [vmem:[#allocation43_spill] sm:$0xff]  ;;  %v7578_v1 = vld [vmem:[#allocation41_spill] sm:$0xff] }
 0x930   :  { %3259 = vmatpush1.msra.mxu0 %v6209_v2  ;;  %3330 = vmatpush1.msra.mxu1 %v6211_v3  ;;  %v7579_v2 = vld [vmem:[#allocation12_spill] sm:$0xff]  ;;  %v7580_v3 = vld [vmem:[#allocation13_spill] sm:$0xff] }
 0x931   :  { %3260 = vmatprep.subr.mxu0 %v6215_v4  ;;  %3331 = vmatprep.subr.mxu1 %v6217_v5  ;;  %v7581_v4 = vld [vmem:[#allocation44_spill] sm:$0xff]  ;;  %v7582_v5 = vld [vmem:[#allocation46_spill] sm:$0xff] }
 0x932   :  { %3261 = vmatpush1.msra.mxu0 %v6221_v7  ;;  %3332 = vmatpush1.msra.mxu1 %v6223_v8  ;;  %v7583_v7 = vld [vmem:[#allocation47_spill] sm:$0xff]  ;;  %v7584_v8 = vld [vmem:[#allocation45_spill] sm:$0xff] }
 0x933   :  { %3262 = vmatprep.subr.mxu0 %v6227_v9  ;;  %3333 = vmatprep.subr.mxu1 %v6229_v10  ;;  %v7585_v9 = vld [vmem:[#allocation14_spill] sm:$0xff]  ;;  %v7586_v10 = vld [vmem:[#allocation15_spill] sm:$0xff] }
 0x934   :  { %3263 = vmatpush1.msra.mxu0 %v6233_v11  ;;  %3334 = vmatpush1.msra.mxu1 %v6235_v14  ;;  %v7587_v11 = vld [vmem:[#allocation16_spill] sm:$0xff]  ;;  %v7588_v14 = vld [vmem:[#allocation17_spill] sm:$0xff] }
 0x935   :  { %3264 = vmatprep.subr.mxu0 %v6239_v15  ;;  %3335 = vmatprep.subr.mxu1 %v6241_v58  ;;  %v7589_v15 = vld [vmem:[#allocation18_spill] sm:$0xff]  ;;  %v7590_v58 = vmov 0.0  }
 0x936   :  { %3265 = vmatpush1.msra.mxu0 %v6245_v13  ;;  %3336 = vmatpush1.msra.mxu1 %v6247_v21  ;;  %v7591_v13 = vld [vmem:[#allocation19_spill] sm:$0xff]  ;;  %v7592_v21 = vld [vmem:[#allocation20_spill] sm:$0xff] }
 0x937   :  { %3266 = vmatprep.subr.mxu0 %v6251_v32  ;;  %3337 = vmatprep.subr.mxu1 %v6253_v6  ;;  %v2522_v32 = vadd.f32 %v7592_v21, %v6499_v52 }
 0x938   :  { %3267 = vmatpush1.msra.mxu0 %v6257_v51  ;;  %3338 = vmatpush1.msra.mxu1 %v6259_v18  ;;  %v7593_v51 = vld [vmem:[#allocation22_spill] sm:$0xff] }
 0x939   :  { %3268 = vmatprep.subr.mxu0 %v6263_v33  ;;  %3339 = vmatprep.subr.mxu1 %v6265_v27  ;;  %v2524_v18 = vadd.f32 %v7593_v51, %v6507_v30 }
 0x93a   :  { %3269 = vmatpush1.msra.mxu0 %v6269_v42  ;;  %3340 = vmatpush1.msra.mxu1 %v6271_v29 }
 0x93b   :  { %3270 = vmatprep.subr.mxu0 %v6275_v16  ;;  %3341 = vmatprep.subr.mxu1 %v6277_v22 }
 0x93c   :  { %3271 = vmatpush1.msra.mxu0 %v6281_v17  ;;  %3342 = vmatpush1.msra.mxu1 %v6283_v19  ;;  %v7594_v19 = vld [vmem:[#allocation32_spill] sm:$0xff] }
 0x93d   :  { %3272 = vmatprep.subr.mxu0 %v6287_v23  ;;  %3343 = vmatprep.subr.mxu1 %v6289_v60  ;;  %v2637_v47 = vadd.f32 %v7595_v20, %v7594_v19  ;;  %v6640_v20 = vld [vmem:[#allocation8 + $0x1b8] sm:$0xff] }
 0x93e   :  { %3273 = vmatpush1.msra.mxu0 %v6293_v0  ;;  %3344 = vmatpush1.msra.mxu1 %v6295_v25 }
 0x93f   :  { %3274 = vmatprep.subr.mxu0 %v6299_v24  ;;  %3345 = vmatprep.subr.mxu1 %v6301_v28 }
 0x940   :  { %3275 = vmatpush1.msra.mxu0 %v6305_v34  ;;  %3346 = vmatpush1.msra.mxu1 %v6307_v35 }
 0x941   :  { %3276 = vmatprep.subr.mxu0 %v7571_v31  ;;  %3347 = vmatprep.subr.mxu1 %v7572_v57 }
 0x942   :  { %3277 = vmatpush1.msra.mxu0 %v7573_v48  ;;  %3348 = vmatpush1.msra.mxu1 %v7574_v59 }
 0x943   :  { %3278 = vmatprep.subr.mxu0 %v7575_v61  ;;  %3349 = vmatprep.subr.mxu1 %v7576_v62 }
 0x944   :  { %3279 = vmatpush1.msra.mxu0 %v7577_v63  ;;  %3350 = vmatpush1.msra.mxu1 %v7578_v1 }
 0x945   :  { %3280 = vmatprep.subr.mxu0 %v7579_v2  ;;  %3351 = vmatprep.subr.mxu1 %v7580_v3 }
 0x946   :  { %3281 = vmatpush1.msra.mxu0 %v7581_v4  ;;  %3352 = vmatpush1.msra.mxu1 %v7582_v5 }
 0x947   :  { %3282 = vmatprep.subr.mxu0 %v7583_v7  ;;  %3353 = vmatprep.subr.mxu1 %v7584_v8 }
 0x948   :  { %3283 = vmatpush1.msra.mxu0 %v7585_v9  ;;  %3354 = vmatpush1.msra.mxu1 %v7586_v10 }
 0x949   :  { %3284 = vmatprep.subr.mxu0 %v7587_v11  ;;  %3355 = vmatprep.subr.mxu1 %v7588_v14 }
 0x94a   :  { %3285 = vmatpush1.msra.mxu0 %v7589_v15  ;;  %3318 = vmatprep.mubr.f32.mxu0 %v7590_v58 }
 0x94b   :  { %3356 = vmatpush1.msra.mxu1 %v7591_v13  ;;  %3389 = vmatprep.mubr.f32.mxu1 %v7590_v58 }
 0x9eb   :  { %v3080_v6 = vpop.f32.mrf.mxu0  ;;  %v3151_v16 = vpop.f32.mrf.mxu1 }
 0x9ec   :  { %v3156_v33 = vadd.f32 %v3080_v6, %v2522_v32  ;;  %v3158_v12 = vadd.f32 %v3151_v16, %v2635_v56  ;;  %v6632_v16 = vld [vmem:[#allocation8 + $0x1c0] sm:$0xff]  ;;  %v6652_v56 = vld [vmem:[#allocation8 + $0x198] sm:$0xff] }
 0x9ed   :  { %v3082_v27 = vpop.f32.mrf.mxu0  ;;  %v3153_v17 = vpop.f32.mrf.mxu1 }
 0x9ee   :  { %v4682_v42 = vmul.f32 -1.442695, %v3156_v33  ;;  %v3157_v29 = vadd.f32 %v3082_v27, %v2524_v18  ;;  %v3159_v37 = vadd.f32 %v3153_v17, %v2637_v47  ;;  %v6614_v18 = vld [vmem:[#allocation8 + $0x1e8] sm:$0xff]  ;;  %v6620_v33 = vld [vmem:[#allocation8 + $0x1e0] sm:$0xff]  ;;  %v6622_v27 = vld [vmem:[#allocation8 + $0x1f0] sm:$0xff] }
 0x9ef   :  { %7597 = vst [vmem:[#allocation36_spill] sm:$0xff] %v6614_v18  ;;  %3494 = vmatprep.subr.mxu0 %v6614_v18  ;;  %v6638_v17 = vld [vmem:[#allocation8 + $0x1a8] sm:$0xff]  ;;  %v6644_v47 = vld [vmem:[#allocation8 + $0x1a0] sm:$0xff] }
 0x9f0   :  { %4860 = vpow2.f32 %v4682_v42  ;;  %v4683_v22 = vmul.f32 -1.442695, %v3157_v29  ;;  %v4684_v40 = vmul.f32 -1.442695, %v3159_v37  ;;  %v6626_v42 = vld [vmem:[#allocation8 + $0x1c8] sm:$0xff]  ;;  %v6628_v29 = vld [vmem:[#allocation8 + $0x1d8] sm:$0xff] }
 0x9f1   :  { %v6646_v37 = vld [vmem:[#allocation8 + $0x1b0] sm:$0xff] }
 0x9f2   :  { %4862 = vpow2.f32 %v4683_v22  ;;  %v6634_v22 = vld [vmem:[#allocation8 + $0x1d0] sm:$0xff] }
 0x9f3   :  { %4864 = vtanh.f32 %v3158_v12  ;;  %v6656_v12 = vld [vmem:[#allocation8 + $0x180] sm:$0xff] }
 0x9f4   :  { %4866 = vpow2.f32 %v4684_v40  ;;  %v6658_v40 = vld [vmem:[#allocation8 + $0x190] sm:$0xff] }
 0x9fd   :  { %v4861_v45 = vpop.eup %4860 }
 0x9fe   :  { %v3163_v53 = vadd.f32 1.0, %v4861_v45  ;;  %v6662_v45 = vld [vmem:[#allocation8 + $0x168] sm:$0xff] }
 0x9ff   :  { %v4863_v26 = vpop.eup %4862 }
 0xa00   :  { %4868 = vrcp.f32 %v3163_v53  ;;  %v3169_v46 = vadd.f32 1.0, %v4863_v26  ;;  %v4865_v54 = vpop.eup %4864  ;;  %v6664_v53 = vld [vmem:[#allocation8 + $0x178] sm:$0xff]  ;;  %v6668_v26 = vld [vmem:[#allocation8 + $0x160] sm:$0xff] }
 0xa01   :  { %v4867_v38 = vpop.eup %4866 }
 0xa02   :  { %4870 = vrcp.f32 %v3169_v46  ;;  %v3176_v36 = vadd.f32 1.0, %v4867_v38  ;;  %v6670_v46 = vld [vmem:[#allocation8 + $0x170] sm:$0xff]  ;;  %v6676_v38 = vld [vmem:[#allocation8 + $0x158] sm:$0xff] }
 0xa04   :  { %4872 = vrcp.f32 %v3176_v36  ;;  %v6688_v36 = vld [vmem:[#allocation8 + $0x138] sm:$0xff] }
 0xa05   :  { %7602 = vst [vmem:[#allocation42_spill] sm:$0xff] %v6688_v36 }
 0xa0d   :  { %v4869_v50 = vpop.eup %4868 }
 0xa0e   :  { %v3180_v39 = vmul.f32 %v4869_v50, %v4865_v54  ;;  %v6674_v54 = vld [vmem:[#allocation8 + $0x148] sm:$0xff]  ;;  %v6680_v50 = vld [vmem:[#allocation8 + $0x140] sm:$0xff] }
 0xa0f   :  { %v4871_v43 = vpop.eup %4870  ;;  %7599 = vst [vmem:[#allocation39_spill] sm:$0xff] %v6680_v50 }
 0xa10   :  { %v3179_v41 = vmul.f32 %v4871_v43, %v6527_v55  ;;  %v6616_v55 = vld [vmem:[#allocation8 + $0x1f8] sm:$0xff]  ;;  %v6686_v43 = vld [vmem:[#allocation8 + $0x128] sm:$0xff] }
 0xa11   :  { %v4873_v32 = vpop.eup %4872  ;;  %7598 = vst [vmem:[#allocation38_spill] sm:$0xff] %v6616_v55  ;;  %3565 = vmatprep.subr.mxu1 %v6616_v55  ;;  %7601 = vst [vmem:[#allocation40_spill] sm:$0xff] %v6686_v43 }
 0xa12   :  { %v6606_v21 = vadd.f32 %v3180_v39, %v3179_v41  ;;  %v6682_v39 = vld [vmem:[#allocation8 + $0x150] sm:$0xff]  ;;  %v6692_v41 = vld [vmem:[#allocation8 + $0x120] sm:$0xff] }
 0xa13   :  { %7600 = vst [vmem:[#allocation37_spill] sm:$0xff] %v6682_v39 }
 0xa14   :  { %4874 = vtanh.f32 %v6606_v21 }
 0xa21   :  { %v4875_v6 = vpop.eup %4874 }
 0xa22   :  { %v3183_v51 = vmul.f32 %v4875_v6, %v4873_v32  ;;  %v6694_v32 = vld [vmem:[#allocation8 + $0x130] sm:$0xff]  ;;  %v6696_v6 = vld [vmem:[#allocation8 + $0x108] sm:$0xff] }
 0xa23   :  { %7603 = vst [vmem:[#allocation43_spill] sm:$0xff] %v6694_v32 }
 0xa24   :  { %4685 = vst [vmem:[%s7124_s7 + $0x8] sm:$0xff] %v3183_v51  ;;  %3319 = vmatmul.mubr.f32.vlgmr.msra.gmra.mxu0 %v3183_v51  ;;  %3390 = vmatmul.mubr.f32.vlgmr.msra.gmra.mxu1 %v3183_v51  ;;  %v6700_v51 = vld [vmem:[#allocation8 + $0x118] sm:$0xff] }
 0xa25   :  { %3558 = vmatprep.mubr.f32.mxu0 %v7590_v58  ;;  %3629 = vmatprep.mubr.f32.mxu1 %v7590_v58  ;;  %v6702_v58 = vld [vmem:[#allocation8 + $0x100] sm:$0xff] }
 0xa26   :  { %3495 = vmatpush1.msra.mxu0 %v6620_v33  ;;  %3566 = vmatpush1.msra.mxu1 %v6622_v27 }
 0xa27   :  { %3496 = vmatprep.subr.mxu0 %v6626_v42  ;;  %3567 = vmatprep.subr.mxu1 %v6628_v29 }
 0xa28   :  { %3497 = vmatpush1.msra.mxu0 %v6632_v16  ;;  %3568 = vmatpush1.msra.mxu1 %v6634_v22 }
 0xa29   :  { %3498 = vmatprep.subr.mxu0 %v6638_v17  ;;  %3569 = vmatprep.subr.mxu1 %v6640_v20 }
 0xa2a   :  { %3499 = vmatpush1.msra.mxu0 %v6644_v47  ;;  %3570 = vmatpush1.msra.mxu1 %v6646_v37 }
 0xa2b   :  { %3500 = vmatprep.subr.mxu0 %v6650_v49  ;;  %3571 = vmatprep.subr.mxu1 %v6652_v56 }
 0xa2c   :  { %3501 = vmatpush1.msra.mxu0 %v6656_v12  ;;  %3572 = vmatpush1.msra.mxu1 %v6658_v40 }
 0xa2d   :  { %3502 = vmatprep.subr.mxu0 %v6662_v45  ;;  %3573 = vmatprep.subr.mxu1 %v6664_v53 }
 0xa2e   :  { %3503 = vmatpush1.msra.mxu0 %v6668_v26  ;;  %3574 = vmatpush1.msra.mxu1 %v6670_v46 }
 0xa2f   :  { %3504 = vmatprep.subr.mxu0 %v6674_v54  ;;  %3575 = vmatprep.subr.mxu1 %v6676_v38 }
 0xa30   :  { %3505 = vmatpush1.msra.mxu0 %v6680_v50  ;;  %3576 = vmatpush1.msra.mxu1 %v6682_v39  ;;  %v6704_v39 = vld [vmem:[#allocation8 + $0x110] sm:$0xff]  ;;  %v6712_v50 = vld [vmem:[#allocation8 + $0xe0] sm:$0xff] }
 0xa31   :  { %3506 = vmatprep.subr.mxu0 %v6686_v43  ;;  %3577 = vmatprep.subr.mxu1 %v6688_v36  ;;  %v6708_v36 = vld [vmem:[#allocation8 + $0xe8] sm:$0xff]  ;;  %v6710_v43 = vld [vmem:[#allocation8 + $0xf8] sm:$0xff] }
 0xa32   :  { %3507 = vmatpush1.msra.mxu0 %v6692_v41  ;;  %3578 = vmatpush1.msra.mxu1 %v6694_v32  ;;  %v6716_v32 = vld [vmem:[#allocation8 + $0xf0] sm:$0xff] }
 0xa33   :  { %3508 = vmatprep.subr.mxu0 %v6696_v6  ;;  %3579 = vmatprep.subr.mxu1 %v6700_v51 }
 0xa34   :  { %3509 = vmatpush1.msra.mxu0 %v6702_v58  ;;  %3580 = vmatpush1.msra.mxu1 %v6704_v39 }
 0xa35   :  { %3510 = vmatprep.subr.mxu0 %v6708_v36  ;;  %3581 = vmatprep.subr.mxu1 %v6710_v43 }
 0xa36   :  { %3511 = vmatpush1.msra.mxu0 %v6712_v50  ;;  %3582 = vmatpush1.msra.mxu1 %v6716_v32 }
 0xa37   :  { %3512 = vmatprep.subr.mxu0 %v6287_v23  ;;  %3583 = vmatprep.subr.mxu1 %v6289_v60  ;;  %v7604_v23 = vld [vmem:[#allocation24_spill] sm:$0xff] }
 0xa38   :  { %3513 = vmatpush1.msra.mxu0 %v6293_v0  ;;  %3584 = vmatpush1.msra.mxu1 %v6295_v25  ;;  %v2528_v60 = vadd.f32 %v7604_v23, %v6499_v52  ;;  %v7605_v25 = vld [vmem:[#allocation26_spill] sm:$0xff] }
 0xa39   :  { %3514 = vmatprep.subr.mxu0 %v6299_v24  ;;  %3585 = vmatprep.subr.mxu1 %v6301_v28  ;;  %v2530_v24 = vadd.f32 %v7605_v25, %v6507_v30 }
 0xa3a   :  { %3515 = vmatpush1.msra.mxu0 %v6305_v34  ;;  %3586 = vmatpush1.msra.mxu1 %v6307_v35 }
 0xa3b   :  { %3516 = vmatprep.subr.mxu0 %v7571_v31  ;;  %3587 = vmatprep.subr.mxu1 %v7572_v57 }
 0xa3c   :  { %3517 = vmatpush1.msra.mxu0 %v7573_v48  ;;  %3588 = vmatpush1.msra.mxu1 %v7574_v59 }
 0xa3d   :  { %3518 = vmatprep.subr.mxu0 %v7575_v61  ;;  %3589 = vmatprep.subr.mxu1 %v7576_v62  ;;  %v7606_v61 = vld [vmem:[#allocation27_spill] sm:$0xff] }
 0xa3e   :  { %3519 = vmatpush1.msra.mxu0 %v7577_v63  ;;  %3590 = vmatpush1.msra.mxu1 %v7578_v1  ;;  %v2643_v62 = vadd.f32 %v7606_v61, %v7594_v19  ;;  %v7607_v1 = vld [vmem:[#allocation25_spill] sm:$0xff]  ;;  %v6805_v61 = vld [vmem:[#allocation8 + $0xd8] sm:$0xff] }
 0xa3f   :  { %3520 = vmatprep.subr.mxu0 %v7579_v2  ;;  %3591 = vmatprep.subr.mxu1 %v7580_v3  ;;  %v2641_v2 = vadd.f32 %v7607_v1, %v6524_v44  ;;  %v6813_v1 = vld [vmem:[#allocation8 + $0xa8] sm:$0xff] }
 0xa40   :  { %3521 = vmatpush1.msra.mxu0 %v7581_v4  ;;  %3592 = vmatpush1.msra.mxu1 %v7582_v5 }
 0xa41   :  { %3522 = vmatprep.subr.mxu0 %v7583_v7  ;;  %3593 = vmatprep.subr.mxu1 %v7584_v8 }
 0xa42   :  { %3523 = vmatpush1.msra.mxu0 %v7585_v9  ;;  %3594 = vmatpush1.msra.mxu1 %v7586_v10 }
 0xa43   :  { %3524 = vmatprep.subr.mxu0 %v7587_v11  ;;  %3595 = vmatprep.subr.mxu1 %v7588_v14 }
 0xa44   :  { %3525 = vmatpush1.msra.mxu0 %v7589_v15  ;;  %3596 = vmatpush1.msra.mxu1 %v7591_v13 }
 0xa45   :  { %3734 = vmatprep.subr.mxu0 %v6614_v18  ;;  %3805 = vmatprep.subr.mxu1 %v6616_v55 }
 0xae4   :  { %v3320_v0 = vpop.f32.mrf.mxu0  ;;  %v3391_v57 = vpop.f32.mrf.mxu1 }
 0xae5   :  { %v3396_v28 = vadd.f32 %v3320_v0, %v2528_v60  ;;  %v3398_v3 = vadd.f32 %v3391_v57, %v2641_v2  ;;  %v7612_v57 = vld [vmem:[#allocation43_spill] sm:$0xff]  ;;  %v6815_v2 = vld [vmem:[#allocation8 + $0xb8] sm:$0xff] }
 0xae6   :  { %v3322_v34 = vpop.f32.mrf.mxu0  ;;  %v3393_v59 = vpop.f32.mrf.mxu1 }
 0xae7   :  { %v4686_v35 = vmul.f32 -1.442695, %v3396_v28  ;;  %v3397_v31 = vadd.f32 %v3322_v34, %v2530_v24  ;;  %v3399_v63 = vadd.f32 %v3393_v59, %v2643_v62  ;;  %v7609_v34 = vld [vmem:[#allocation37_spill] sm:$0xff]  ;;  %v6803_v59 = vld [vmem:[#allocation8 + $0xc8] sm:$0xff]  ;;  %v6807_v62 = vld [vmem:[#allocation8 + $0xc0] sm:$0xff] }
 0xae9   :  { %4876 = vpow2.f32 %v4686_v35  ;;  %v4687_v48 = vmul.f32 -1.442695, %v3397_v31  ;;  %v4688_v4 = vmul.f32 -1.442695, %v3399_v63  ;;  %v7610_v35 = vld [vmem:[#allocation40_spill] sm:$0xff]  ;;  %v7611_v31 = vld [vmem:[#allocation42_spill] sm:$0xff] }
 0xaea   :  { %v6811_v63 = vld [vmem:[#allocation8 + $0xd0] sm:$0xff] }
 0xaeb   :  { %4878 = vpow2.f32 %v4687_v48  ;;  %v7613_v48 = vmov 0.0  }
 0xaec   :  { %4880 = vtanh.f32 %v3398_v3  ;;  %v6819_v3 = vld [vmem:[#allocation8 + $0xa0] sm:$0xff] }
 0xaed   :  { %4882 = vpow2.f32 %v4688_v4  ;;  %v6821_v4 = vld [vmem:[#allocation8 + $0xb0] sm:$0xff] }
 0xaee   :  { %7614 = vst [vmem:[#allocation41_spill] sm:$0xff] %v6821_v4 }
 0xaf6   :  { %v4877_v5 = vpop.eup %4876 }
 0xaf7   :  { %v3403_v7 = vadd.f32 1.0, %v4877_v5  ;;  %v6823_v5 = vld [vmem:[#allocation8 + $0x88] sm:$0xff] }
 0xaf8   :  { %v4879_v8 = vpop.eup %4878  ;;  %7615 = vst [vmem:[#allocation12_spill] sm:$0xff] %v6823_v5 }
 0xaf9   :  { %4884 = vrcp.f32 %v3403_v7  ;;  %v3409_v9 = vadd.f32 1.0, %v4879_v8  ;;  %v4881_v10 = vpop.eup %4880  ;;  %v6827_v7 = vld [vmem:[#allocation8 + $0x98] sm:$0xff]  ;;  %v6829_v8 = vld [vmem:[#allocation8 + $0x80] sm:$0xff] }
 0xafa   :  { %v4883_v11 = vpop.eup %4882  ;;  %7616 = vst [vmem:[#allocation13_spill] sm:$0xff] %v6827_v7  ;;  %7617 = vst [vmem:[#allocation44_spill] sm:$0xff] %v6829_v8 }
 0xafb   :  { %4886 = vrcp.f32 %v3409_v9  ;;  %v3416_v23 = vadd.f32 1.0, %v4883_v11  ;;  %v6831_v9 = vld [vmem:[#allocation8 + $0x90] sm:$0xff]  ;;  %v6837_v11 = vld [vmem:[#allocation8 + $0x78] sm:$0xff] }
 0xafc   :  { %7618 = vst [vmem:[#allocation46_spill] sm:$0xff] %v6831_v9  ;;  %7620 = vst [vmem:[#allocation45_spill] sm:$0xff] %v6837_v11 }
 0xafd   :  { %4888 = vrcp.f32 %v3416_v23  ;;  %v6849_v23 = vld [vmem:[#allocation8 + $0x58] sm:$0xff] }
 0xafe   :  { %7624 = vst [vmem:[#allocation17_spill] sm:$0xff] %v6849_v23 }
 0xb06   :  { %v4885_v14 = vpop.eup %4884 }
 0xb07   :  { %v3420_v15 = vmul.f32 %v4885_v14, %v4881_v10  ;;  %v6835_v10 = vld [vmem:[#allocation8 + $0x68] sm:$0xff]  ;;  %v6841_v14 = vld [vmem:[#allocation8 + $0x60] sm:$0xff] }
 0xb08   :  { %v4887_v13 = vpop.eup %4886  ;;  %7619 = vst [vmem:[#allocation47_spill] sm:$0xff] %v6835_v10  ;;  %7621 = vst [vmem:[#allocation14_spill] sm:$0xff] %v6841_v14 }
 0xb09   :  { %v3419_v60 = vmul.f32 %v4887_v13, %v6606_v21  ;;  %v7608_v21 = vld [vmem:[#allocation39_spill] sm:$0xff]  ;;  %v6847_v13 = vld [vmem:[#allocation8 + $0x48] sm:$0xff] }
 0xb0a   :  { %v4889_v25 = vpop.eup %4888  ;;  %7623 = vst [vmem:[#allocation16_spill] sm:$0xff] %v6847_v13 }
 0xb0b   :  { %v6761_v0 = vadd.f32 %v3420_v15, %v3419_v60  ;;  %v6843_v15 = vld [vmem:[#allocation8 + $0x70] sm:$0xff]  ;;  %v6853_v60 = vld [vmem:[#allocation8 + $0x40] sm:$0xff] }
 0xb0c   :  { %7622 = vst [vmem:[#allocation15_spill] sm:$0xff] %v6843_v15  ;;  %7625 = vst [vmem:[#allocation18_spill] sm:$0xff] %v6853_v60 }
 0xb0d   :  { %4890 = vtanh.f32 %v6761_v0 }
 0xb1a   :  { %v4891_v24 = vpop.eup %4890 }
 0xb1b   :  { %v3423_v28 = vmul.f32 %v4891_v24, %v4889_v25  ;;  %v6855_v25 = vld [vmem:[#allocation8 + $0x50] sm:$0xff]  ;;  %v6859_v24 = vld [vmem:[#allocation8 + $0x28] sm:$0xff] }
 0xb1c   :  { %7626 = vst [vmem:[#allocation19_spill] sm:$0xff] %v6855_v25  ;;  %7627 = vst [vmem:[#allocation20_spill] sm:$0xff] %v6859_v24 }
 0xb1d   :  { %4689 = vst [vmem:[%s7124_s7 + $0x10] sm:$0xff] %v3423_v28  ;;  %3559 = vmatmul.mubr.f32.vlgmr.msra.gmra.mxu0 %v3423_v28  ;;  %3630 = vmatmul.mubr.f32.vlgmr.msra.gmra.mxu1 %v3423_v28  ;;  %v6861_v28 = vld [vmem:[#allocation8 + $0x38] sm:$0xff] }
 0xb1e   :  { %3735 = vmatpush1.msra.mxu0 %v6620_v33  ;;  %3806 = vmatpush1.msra.mxu1 %v6622_v27  ;;  %7628 = vst [vmem:[#allocation22_spill] sm:$0xff] %v6861_v28 }
 0xb1f   :  { %3736 = vmatprep.subr.mxu0 %v6626_v42  ;;  %3807 = vmatprep.subr.mxu1 %v6628_v29 }
 0xb20   :  { %3737 = vmatpush1.msra.mxu0 %v6632_v16  ;;  %3808 = vmatpush1.msra.mxu1 %v6634_v22 }
 0xb21   :  { %3738 = vmatprep.subr.mxu0 %v6638_v17  ;;  %3809 = vmatprep.subr.mxu1 %v6640_v20 }
 0xb22   :  { %3739 = vmatpush1.msra.mxu0 %v6644_v47  ;;  %3810 = vmatpush1.msra.mxu1 %v6646_v37 }
 0xb23   :  { %3740 = vmatprep.subr.mxu0 %v6650_v49  ;;  %3811 = vmatprep.subr.mxu1 %v6652_v56 }
 0xb24   :  { %3741 = vmatpush1.msra.mxu0 %v6656_v12  ;;  %3812 = vmatpush1.msra.mxu1 %v6658_v40 }
 0xb25   :  { %3742 = vmatprep.subr.mxu0 %v6662_v45  ;;  %3813 = vmatprep.subr.mxu1 %v6664_v53 }
 0xb26   :  { %3743 = vmatpush1.msra.mxu0 %v6668_v26  ;;  %3814 = vmatpush1.msra.mxu1 %v6670_v46 }
 0xb27   :  { %3744 = vmatprep.subr.mxu0 %v6674_v54  ;;  %3815 = vmatprep.subr.mxu1 %v6676_v38 }
 0xb28   :  { %3745 = vmatpush1.msra.mxu0 %v7608_v21  ;;  %3816 = vmatpush1.msra.mxu1 %v7609_v34 }
 0xb29   :  { %3746 = vmatprep.subr.mxu0 %v7610_v35  ;;  %3817 = vmatprep.subr.mxu1 %v7611_v31 }
 0xb2a   :  { %3747 = vmatpush1.msra.mxu0 %v6692_v41  ;;  %3818 = vmatpush1.msra.mxu1 %v7612_v57 }
 0xb2b   :  { %3748 = vmatprep.subr.mxu0 %v6696_v6  ;;  %3819 = vmatprep.subr.mxu1 %v6700_v51 }
 0xb2c   :  { %3749 = vmatpush1.msra.mxu0 %v6702_v58  ;;  %3820 = vmatpush1.msra.mxu1 %v6704_v39 }
 0xb2d   :  { %3750 = vmatprep.subr.mxu0 %v6708_v36  ;;  %3821 = vmatprep.subr.mxu1 %v6710_v43 }
 0xb2e   :  { %3751 = vmatpush1.msra.mxu0 %v6712_v50  ;;  %3822 = vmatpush1.msra.mxu1 %v6716_v32 }
 0xb2f   :  { %3798 = vmatprep.mubr.f32.mxu0 %v7613_v48  ;;  %3869 = vmatprep.mubr.f32.mxu1 %v7613_v48  ;;  %v6865_v48 = vld [vmem:[#allocation8 + $0x20] sm:$0xff] }
 0xb30   :  { %3752 = vmatprep.subr.mxu0 %v6803_v59  ;;  %3823 = vmatprep.subr.mxu1 %v6805_v61  ;;  %7629 = vst [vmem:[#allocation32_spill] sm:$0xff] %v6865_v48 }
 0xb31   :  { %3753 = vmatpush1.msra.mxu0 %v6807_v62  ;;  %3824 = vmatpush1.msra.mxu1 %v6811_v63 }
 0xb32   :  { %3754 = vmatprep.subr.mxu0 %v6813_v1  ;;  %3825 = vmatprep.subr.mxu1 %v6815_v2 }
 0xb33   :  { %3755 = vmatpush1.msra.mxu0 %v6819_v3  ;;  %3826 = vmatpush1.msra.mxu1 %v6821_v4 }
 0xb34   :  { %3756 = vmatprep.subr.mxu0 %v6823_v5  ;;  %3827 = vmatprep.subr.mxu1 %v6827_v7  ;;  %v7638_v7 = vld [vmem:[#allocation29_spill] sm:$0xff] }
 0xb35   :  { %3757 = vmatpush1.msra.mxu0 %v6829_v8  ;;  %3828 = vmatpush1.msra.mxu1 %v6831_v9 }
 0xb36   :  { %3758 = vmatprep.subr.mxu0 %v6835_v10  ;;  %3829 = vmatprep.subr.mxu1 %v6837_v11  ;;  %v6867_v10 = vld [vmem:[#allocation8 + $0x30] sm:$0xff]  ;;  %v6871_v11 = vld [vmem:[#allocation8 + $0x8] sm:$0xff] }
 0xb37   :  { %3759 = vmatpush1.msra.mxu0 %v6841_v14  ;;  %3830 = vmatpush1.msra.mxu1 %v6843_v15  ;;  %7630 = vst [vmem:[#allocation23_spill] sm:$0xff] %v6867_v10  ;;  %7631 = vst [vmem:[#allocation21_spill] sm:$0xff] %v6871_v11  ;;  %v6873_v14 = vld [vmem:[#allocation8 + $0x18] sm:$0xff]  ;;  %v6877_v15 = vld [vmem:[#allocation8] sm:$0xff] }
 0xb38   :  { %3760 = vmatprep.subr.mxu0 %v6847_v13  ;;  %3831 = vmatprep.subr.mxu1 %v6849_v23  ;;  %7632 = vst [vmem:[#allocation24_spill] sm:$0xff] %v6873_v14  ;;  %7633 = vst [vmem:[#allocation26_spill] sm:$0xff] %v6877_v15  ;;  %v6879_v13 = vld [vmem:[#allocation8 + $0x10] sm:$0xff] }
 0xb39   :  { %3761 = vmatpush1.msra.mxu0 %v6853_v60  ;;  %3832 = vmatpush1.msra.mxu1 %v6855_v25  ;;  %7634 = vst [vmem:[#allocation27_spill] sm:$0xff] %v6879_v13 }
 0xb3a   :  { %3762 = vmatprep.subr.mxu0 %v6859_v24  ;;  %3833 = vmatprep.subr.mxu1 %v6861_v28  ;;  %v7635_v28 = vld [vmem:[#allocation28_spill] sm:$0xff] }
 0xb3b   :  { %3763 = vmatpush1.msra.mxu0 %v6865_v48  ;;  %3834 = vmatpush1.msra.mxu1 %v6867_v10  ;;  %v2534_v24 = vadd.f32 %v7635_v28, %v6499_v52  ;;  %v7636_v48 = vld [vmem:[#allocation30_spill] sm:$0xff]  ;;  %v2647_v28 = vadd.f32 %v7638_v7, %v6524_v44  ;;  %v7641_v7 = vld [vmem:[#allocation13_spill] sm:$0xff] }
 0xb3c   :  { %3764 = vmatprep.subr.mxu0 %v6871_v11  ;;  %3835 = vmatprep.subr.mxu1 %v6873_v14  ;;  %v2536_v60 = vadd.f32 %v7636_v48, %v6507_v30 }
 0xb3d   :  { %3765 = vmatpush1.msra.mxu0 %v6877_v15  ;;  %3836 = vmatpush1.msra.mxu1 %v6879_v13 }
 0xb3e   :  { %3974 = vmatprep.subr.mxu0 %v6614_v18  ;;  %4045 = vmatprep.subr.mxu1 %v6616_v55  ;;  %v7637_v18 = vld [vmem:[#allocation48_spill] sm:$0xff] }
 0xb3f   :  { %v2649_v8 = vadd.f32 %v7637_v18, %v7594_v19 }
 0xbdd   :  { %v3560_v25 = vpop.f32.mrf.mxu0  ;;  %v3631_v14 = vpop.f32.mrf.mxu1 }
 0xbde   :  { %v3636_v10 = vadd.f32 %v3560_v25, %v2534_v24  ;;  %v3638_v52 = vadd.f32 %v3631_v14, %v2647_v28  ;;  %v7642_v14 = vld [vmem:[#allocation44_spill] sm:$0xff]  ;;  %v7643_v24 = vld [vmem:[#allocation46_spill] sm:$0xff]  ;;  %v7644_v28 = vld [vmem:[#allocation47_spill] sm:$0xff] }
 0xbdf   :  { %v3562_v23 = vpop.f32.mrf.mxu0  ;;  %v3633_v13 = vpop.f32.mrf.mxu1 }
 0xbe0   :  { %v4690_v11 = vmul.f32 -1.442695, %v3636_v10  ;;  %v3637_v9 = vadd.f32 %v3562_v23, %v2536_v60  ;;  %v3639_v55 = vadd.f32 %v3633_v13, %v2649_v8 }
 0xbe2   :  { %4892 = vpow2.f32 %v4690_v11  ;;  %v4691_v15 = vmul.f32 -1.442695, %v3637_v9  ;;  %v4692_v5 = vmul.f32 -1.442695, %v3639_v55 }
 0xbe4   :  { %4894 = vpow2.f32 %v4691_v15 }
 0xbe5   :  { %4896 = vtanh.f32 %v3638_v52 }
 0xbe6   :  { %4898 = vpow2.f32 %v4692_v5  ;;  %v7640_v5 = vld [vmem:[#allocation12_spill] sm:$0xff] }
 0xbef   :  { %v4893_v4 = vpop.eup %4892 }
 0xbf0   :  { %v3643_v48 = vadd.f32 1.0, %v4893_v4 }
 0xbf1   :  { %v4895_v25 = vpop.eup %4894 }
 0xbf2   :  { %4900 = vrcp.f32 %v3643_v48  ;;  %v3649_v10 = vadd.f32 1.0, %v4895_v25  ;;  %v4897_v9 = vpop.eup %4896  ;;  %v7645_v48 = vld [vmem:[#allocation45_spill] sm:$0xff]  ;;  %v7646_v25 = vld [vmem:[#allocation14_spill] sm:$0xff] }
 0xbf3   :  { %v4899_v11 = vpop.eup %4898 }
 0xbf4   :  { %4902 = vrcp.f32 %v3649_v10  ;;  %v3656_v18 = vadd.f32 1.0, %v4899_v11  ;;  %v7647_v10 = vld [vmem:[#allocation15_spill] sm:$0xff]  ;;  %v7649_v11 = vld [vmem:[#allocation17_spill] sm:$0xff] }
 0xbf6   :  { %4904 = vrcp.f32 %v3656_v18  ;;  %v7653_v18 = vld [vmem:[#allocation22_spill] sm:$0xff] }
 0xbff   :  { %v4901_v15 = vpop.eup %4900 }
 0xc00   :  { %v3660_v23 = vmul.f32 %v4901_v15, %v4897_v9  ;;  %v7648_v9 = vld [vmem:[#allocation16_spill] sm:$0xff]  ;;  %v7650_v15 = vld [vmem:[#allocation18_spill] sm:$0xff] }
 0xc01   :  { %v4903_v60 = vpop.eup %4902 }
 0xc02   :  { %v3659_v8 = vmul.f32 %v4903_v60, %v6761_v0  ;;  %v7639_v0 = vld [vmem:[#allocation41_spill] sm:$0xff]  ;;  %v7652_v60 = vld [vmem:[#allocation20_spill] sm:$0xff] }
 0xc03   :  { %v4905_v55 = vpop.eup %4904 }
 0xc04   :  { %v6898_v13 = vadd.f32 %v3660_v23, %v3659_v8  ;;  %v7651_v23 = vld [vmem:[#allocation19_spill] sm:$0xff]  ;;  %v7654_v8 = vld [vmem:[#allocation32_spill] sm:$0xff] }
 0xc06   :  { %4906 = vtanh.f32 %v6898_v13 }
 0xc13   :  { %v4907_v52 = vpop.eup %4906 }
 0xc14   :  { %v3663_v4 = vmul.f32 %v4907_v52, %v4905_v55  ;;  %v7655_v55 = vld [vmem:[#allocation23_spill] sm:$0xff]  ;;  %v7656_v52 = vld [vmem:[#allocation21_spill] sm:$0xff] }
 0xc16   :  { %4693 = vst [vmem:[%s7124_s7 + $0x18] sm:$0xff] %v3663_v4  ;;  %3799 = vmatmul.mubr.f32.vlgmr.msra.gmra.mxu0 %v3663_v4  ;;  %3870 = vmatmul.mubr.f32.vlgmr.msra.gmra.mxu1 %v3663_v4  ;;  %v7657_v4 = vld [vmem:[#allocation24_spill] sm:$0xff] }
 0xc17   :  { %3975 = vmatpush1.msra.mxu0 %v6620_v33  ;;  %4046 = vmatpush1.msra.mxu1 %v6622_v27 }
 0xc18   :  { %3976 = vmatprep.subr.mxu0 %v6626_v42  ;;  %4047 = vmatprep.subr.mxu1 %v6628_v29 }
 0xc19   :  { %3977 = vmatpush1.msra.mxu0 %v6632_v16  ;;  %4048 = vmatpush1.msra.mxu1 %v6634_v22 }
 0xc1a   :  { %3978 = vmatprep.subr.mxu0 %v6638_v17  ;;  %4049 = vmatprep.subr.mxu1 %v6640_v20 }
 0xc1b   :  { %3979 = vmatpush1.msra.mxu0 %v6644_v47  ;;  %4050 = vmatpush1.msra.mxu1 %v6646_v37 }
 0xc1c   :  { %3980 = vmatprep.subr.mxu0 %v6650_v49  ;;  %4051 = vmatprep.subr.mxu1 %v6652_v56 }
 0xc1d   :  { %3981 = vmatpush1.msra.mxu0 %v6656_v12  ;;  %4052 = vmatpush1.msra.mxu1 %v6658_v40 }
 0xc1e   :  { %3982 = vmatprep.subr.mxu0 %v6662_v45  ;;  %4053 = vmatprep.subr.mxu1 %v6664_v53 }
 0xc1f   :  { %3983 = vmatpush1.msra.mxu0 %v6668_v26  ;;  %4054 = vmatpush1.msra.mxu1 %v6670_v46 }
 0xc20   :  { %3984 = vmatprep.subr.mxu0 %v6674_v54  ;;  %4055 = vmatprep.subr.mxu1 %v6676_v38 }
 0xc21   :  { %3985 = vmatpush1.msra.mxu0 %v7608_v21  ;;  %4056 = vmatpush1.msra.mxu1 %v7609_v34 }
 0xc22   :  { %3986 = vmatprep.subr.mxu0 %v7610_v35  ;;  %4057 = vmatprep.subr.mxu1 %v7611_v31 }
 0xc23   :  { %3987 = vmatpush1.msra.mxu0 %v6692_v41  ;;  %4058 = vmatpush1.msra.mxu1 %v7612_v57 }
 0xc24   :  { %3988 = vmatprep.subr.mxu0 %v6696_v6  ;;  %4059 = vmatprep.subr.mxu1 %v6700_v51 }
 0xc25   :  { %3989 = vmatpush1.msra.mxu0 %v6702_v58  ;;  %4060 = vmatpush1.msra.mxu1 %v6704_v39 }
 0xc26   :  { %3990 = vmatprep.subr.mxu0 %v6708_v36  ;;  %4061 = vmatprep.subr.mxu1 %v6710_v43 }
 0xc27   :  { %3991 = vmatpush1.msra.mxu0 %v6712_v50  ;;  %4062 = vmatpush1.msra.mxu1 %v6716_v32 }
 0xc28   :  { %3992 = vmatprep.subr.mxu0 %v6803_v59  ;;  %4063 = vmatprep.subr.mxu1 %v6805_v61 }
 0xc29   :  { %3993 = vmatpush1.msra.mxu0 %v6807_v62  ;;  %4064 = vmatpush1.msra.mxu1 %v6811_v63 }
 0xc2a   :  { %3994 = vmatprep.subr.mxu0 %v6813_v1  ;;  %4065 = vmatprep.subr.mxu1 %v6815_v2 }
 0xc2b   :  { %3995 = vmatpush1.msra.mxu0 %v6819_v3  ;;  %4066 = vmatpush1.msra.mxu1 %v7639_v0 }
 0xc2c   :  { %3996 = vmatprep.subr.mxu0 %v7640_v5  ;;  %4067 = vmatprep.subr.mxu1 %v7641_v7  ;;  %v7667_v7 = vld [vmem:[#allocation51_spill] sm:$0xff] }
 0xc2d   :  { %3997 = vmatpush1.msra.mxu0 %v7642_v14  ;;  %4068 = vmatpush1.msra.mxu1 %v7643_v24 }
 0xc2e   :  { %3998 = vmatprep.subr.mxu0 %v7644_v28  ;;  %4069 = vmatprep.subr.mxu1 %v7645_v48 }
 0xc2f   :  { %3999 = vmatpush1.msra.mxu0 %v7646_v25  ;;  %4070 = vmatpush1.msra.mxu1 %v7647_v10  ;;  %v7658_v10 = vld [vmem:[#allocation26_spill] sm:$0xff] }
 0xc30   :  { %4000 = vmatprep.subr.mxu0 %v7648_v9  ;;  %4071 = vmatprep.subr.mxu1 %v7649_v11  ;;  %v7659_v9 = vmov 0.0   ;;  %v7660_v11 = vld [vmem:[#allocation27_spill] sm:$0xff] }
 0xc31   :  { %4001 = vmatpush1.msra.mxu0 %v7650_v15  ;;  %4072 = vmatpush1.msra.mxu1 %v7651_v23  ;;  %v7661_v23 = vld [vmem:[#allocation36_spill] sm:$0xff] }
 0xc32   :  { %4002 = vmatprep.subr.mxu0 %v7652_v60  ;;  %4073 = vmatprep.subr.mxu1 %v7653_v18  ;;  %v7662_v60 = vld [vmem:[#allocation38_spill] sm:$0xff]  ;;  %v7663_v18 = vld [vmem:[#allocation56_spill] sm:$0xff] }
 0xc33   :  { %4003 = vmatpush1.msra.mxu0 %v7654_v8  ;;  %4074 = vmatpush1.msra.mxu1 %v7655_v55  ;;  %v7664_v8 = vld [vmem:[#allocation50_spill] sm:$0xff] }
 0xc34   :  { %4004 = vmatprep.subr.mxu0 %v7656_v52  ;;  %4075 = vmatprep.subr.mxu1 %v7657_v4  ;;  %v2540_v15 = vadd.f32 %v7664_v8, %v7663_v18  ;;  %v7665_v52 = vld [vmem:[#allocation49_spill] sm:$0xff]  ;;  %v2653_v8 = vadd.f32 %v7667_v7, %v6524_v44 }
 0xc35   :  { %4005 = vmatpush1.msra.mxu0 %v7658_v10  ;;  %4038 = vmatprep.mubr.f32.mxu0 %v7659_v9  ;;  %v2542_v25 = vadd.f32 %v7665_v52, %v6507_v30 }
 0xc36   :  { %4076 = vmatpush1.msra.mxu1 %v7660_v11  ;;  %4109 = vmatprep.mubr.f32.mxu1 %v7659_v9 }
 0xc37   :  { %4214 = vmatprep.subr.mxu0 %v7661_v23  ;;  %4285 = vmatprep.subr.mxu1 %v7662_v60  ;;  %v7666_v23 = vld [vmem:[#allocation52_spill] sm:$0xff] }
 0xc38   :  { %v2655_v14 = vadd.f32 %v7666_v23, %v7594_v19 }
 0xcd6   :  { %v3800_v55 = vpop.f32.mrf.mxu0  ;;  %v3871_v24 = vpop.f32.mrf.mxu1 }
 0xcd7   :  { %v3876_v4 = vadd.f32 %v3800_v55, %v2540_v15  ;;  %v3878_v18 = vadd.f32 %v3871_v24, %v2653_v8 }
 0xcd8   :  { %v3802_v48 = vpop.f32.mrf.mxu0  ;;  %v3873_v9 = vpop.f32.mrf.mxu1 }
 0xcd9   :  { %v4694_v10 = vmul.f32 -1.442695, %v3876_v4  ;;  %v3877_v28 = vadd.f32 %v3802_v48, %v2542_v25  ;;  %v3879_v60 = vadd.f32 %v3873_v9, %v2655_v14 }
 0xcdb   :  { %4908 = vpow2.f32 %v4694_v10  ;;  %v4695_v11 = vmul.f32 -1.442695, %v3877_v28  ;;  %v4696_v5 = vmul.f32 -1.442695, %v3879_v60  ;;  %v7694_v60 = vld [vmem:[#allocation55_spill] sm:$0xff] }
 0xcdc   :  { %v2659_v8 = vadd.f32 %v7694_v60, %v6524_v44  ;;  %v4441_v60 = vld [vmem:[#allocation8 + $0x198] sm:$0xff] }
 0xcdd   :  { %4910 = vpow2.f32 %v4695_v11 }
 0xcde   :  { %4912 = vtanh.f32 %v3878_v18 }
 0xcdf   :  { %4914 = vpow2.f32 %v4696_v5  ;;  %v7693_v5 = vld [vmem:[#allocation60_spill] sm:$0xff] }
 0xce0   :  { %v2661_v18 = vadd.f32 %v7693_v5, %v7594_v19  ;;  %v4445_v5 = vld [vmem:[#allocation8 + $0x1b8] sm:$0xff] }
 0xce8   :  { %v4909_v0 = vpop.eup %4908 }
 0xce9   :  { %v3883_v52 = vadd.f32 1.0, %v4909_v0 }
 0xcea   :  { %v4911_v15 = vpop.eup %4910 }
 0xceb   :  { %4916 = vrcp.f32 %v3883_v52  ;;  %v3889_v48 = vadd.f32 1.0, %v4911_v15  ;;  %v4913_v28 = vpop.eup %4912 }
 0xcec   :  { %v4915_v25 = vpop.eup %4914 }
 0xced   :  { %4918 = vrcp.f32 %v3889_v48  ;;  %v3896_v4 = vadd.f32 1.0, %v4915_v25 }
 0xcef   :  { %4920 = vrcp.f32 %v3896_v4 }
 0xcf8   :  { %v4917_v10 = vpop.eup %4916 }
 0xcf9   :  { %v3900_v11 = vmul.f32 %v4917_v10, %v4913_v28 }
 0xcfa   :  { %v4919_v55 = vpop.eup %4918 }
 0xcfb   :  { %v3899_v14 = vmul.f32 %v4919_v55, %v6898_v13 }
 0xcfc   :  { %v4921_v0 = vpop.eup %4920 }
 0xcfd   :  { %v6979_v9 = vadd.f32 %v3900_v11, %v3899_v14 }
 0xcff   :  { %4922 = vtanh.f32 %v6979_v9 }
 0xd0c   :  { %v4923_v7 = vpop.eup %4922 }
 0xd0d   :  { %v3903_v24 = vmul.f32 %v4923_v7, %v4921_v0 }
 0xd0f   :  { %4697 = vst [vmem:[%s7124_s7 + $0x20] sm:$0xff] %v3903_v24  ;;  %4039 = vmatmul.mubr.f32.vlgmr.msra.gmra.mxu0 %v3903_v24  ;;  %4110 = vmatmul.mubr.f32.vlgmr.msra.gmra.mxu1 %v3903_v24 }
 0xd10   :  { %4215 = vmatpush1.msra.mxu0 %v6620_v33  ;;  %4286 = vmatpush1.msra.mxu1 %v6622_v27  ;;  %v7669_v33 = vld [vmem:[#allocation12_spill] sm:$0xff]  ;;  %v7670_v27 = vld [vmem:[#allocation13_spill] sm:$0xff] }
 0xd11   :  { %4216 = vmatprep.subr.mxu0 %v6626_v42  ;;  %4287 = vmatprep.subr.mxu1 %v6628_v29  ;;  %v7671_v42 = vld [vmem:[#allocation44_spill] sm:$0xff]  ;;  %v7672_v29 = vld [vmem:[#allocation46_spill] sm:$0xff] }
 0xd12   :  { %4217 = vmatpush1.msra.mxu0 %v6632_v16  ;;  %4288 = vmatpush1.msra.mxu1 %v6634_v22  ;;  %v7673_v16 = vld [vmem:[#allocation47_spill] sm:$0xff]  ;;  %v7674_v22 = vld [vmem:[#allocation45_spill] sm:$0xff] }
 0xd13   :  { %4218 = vmatprep.subr.mxu0 %v6638_v17  ;;  %4289 = vmatprep.subr.mxu1 %v6640_v20  ;;  %v7675_v17 = vld [vmem:[#allocation14_spill] sm:$0xff]  ;;  %v7676_v20 = vld [vmem:[#allocation15_spill] sm:$0xff] }
 0xd14   :  { %4219 = vmatpush1.msra.mxu0 %v6644_v47  ;;  %4290 = vmatpush1.msra.mxu1 %v6646_v37  ;;  %v7677_v47 = vld [vmem:[#allocation16_spill] sm:$0xff]  ;;  %v7678_v37 = vld [vmem:[#allocation17_spill] sm:$0xff] }
 0xd15   :  { %4220 = vmatprep.subr.mxu0 %v6650_v49  ;;  %4291 = vmatprep.subr.mxu1 %v6652_v56  ;;  %v7679_v49 = vld [vmem:[#allocation18_spill] sm:$0xff]  ;;  %v7680_v56 = vld [vmem:[#allocation19_spill] sm:$0xff] }
 0xd16   :  { %4221 = vmatpush1.msra.mxu0 %v6656_v12  ;;  %4292 = vmatpush1.msra.mxu1 %v6658_v40  ;;  %v7681_v12 = vld [vmem:[#allocation20_spill] sm:$0xff]  ;;  %v7682_v40 = vld [vmem:[#allocation22_spill] sm:$0xff] }
 0xd17   :  { %4222 = vmatprep.subr.mxu0 %v6662_v45  ;;  %4293 = vmatprep.subr.mxu1 %v6664_v53  ;;  %v7683_v45 = vld [vmem:[#allocation32_spill] sm:$0xff]  ;;  %v7684_v53 = vld [vmem:[#allocation23_spill] sm:$0xff] }
 0xd18   :  { %4223 = vmatpush1.msra.mxu0 %v6668_v26  ;;  %4294 = vmatpush1.msra.mxu1 %v6670_v46  ;;  %v7685_v26 = vld [vmem:[#allocation21_spill] sm:$0xff]  ;;  %v7686_v46 = vld [vmem:[#allocation24_spill] sm:$0xff] }
 0xd19   :  { %4224 = vmatprep.subr.mxu0 %v6674_v54  ;;  %4295 = vmatprep.subr.mxu1 %v6676_v38  ;;  %v7687_v54 = vld [vmem:[#allocation26_spill] sm:$0xff]  ;;  %v7688_v38 = vmov 0.0  }
 0xd1a   :  { %4225 = vmatpush1.msra.mxu0 %v7608_v21  ;;  %4296 = vmatpush1.msra.mxu1 %v7609_v34 }
 0xd1b   :  { %4226 = vmatprep.subr.mxu0 %v7610_v35  ;;  %4297 = vmatprep.subr.mxu1 %v7611_v31 }
 0xd1c   :  { %4227 = vmatpush1.msra.mxu0 %v6692_v41  ;;  %4298 = vmatpush1.msra.mxu1 %v7612_v57 }
 0xd1d   :  { %4228 = vmatprep.subr.mxu0 %v6696_v6  ;;  %4299 = vmatprep.subr.mxu1 %v6700_v51 }
 0xd1e   :  { %4229 = vmatpush1.msra.mxu0 %v6702_v58  ;;  %4300 = vmatpush1.msra.mxu1 %v6704_v39  ;;  %v7668_v58 = vld [vmem:[#allocation41_spill] sm:$0xff]  ;;  %v7690_v39 = vld [vmem:[#allocation56_spill] sm:$0xff] }
 0xd1f   :  { %4230 = vmatprep.subr.mxu0 %v6708_v36  ;;  %4301 = vmatprep.subr.mxu1 %v6710_v43  ;;  %v7691_v43 = vld [vmem:[#allocation54_spill] sm:$0xff] }
 0xd20   :  { %4231 = vmatpush1.msra.mxu0 %v6712_v50  ;;  %4302 = vmatpush1.msra.mxu1 %v6716_v32  ;;  %v7689_v50 = vld [vmem:[#allocation27_spill] sm:$0xff]  ;;  %v2546_v36 = vadd.f32 %v7691_v43, %v7690_v39  ;;  %v7692_v32 = vld [vmem:[#allocation53_spill] sm:$0xff] }
 0xd21   :  { %4232 = vmatprep.subr.mxu0 %v6803_v59  ;;  %4303 = vmatprep.subr.mxu1 %v6805_v61  ;;  %v2548_v6 = vadd.f32 %v7692_v32, %v6507_v30 }
 0xd22   :  { %4233 = vmatpush1.msra.mxu0 %v6807_v62  ;;  %4304 = vmatpush1.msra.mxu1 %v6811_v63 }
 0xd23   :  { %4234 = vmatprep.subr.mxu0 %v6813_v1  ;;  %4305 = vmatprep.subr.mxu1 %v6815_v2 }
 0xd24   :  { %4235 = vmatpush1.msra.mxu0 %v6819_v3  ;;  %4306 = vmatpush1.msra.mxu1 %v7668_v58 }
 0xd25   :  { %4236 = vmatprep.subr.mxu0 %v7669_v33  ;;  %4307 = vmatprep.subr.mxu1 %v7670_v27 }
 0xd26   :  { %4237 = vmatpush1.msra.mxu0 %v7671_v42  ;;  %4308 = vmatpush1.msra.mxu1 %v7672_v29 }
 0xd27   :  { %4238 = vmatprep.subr.mxu0 %v7673_v16  ;;  %4309 = vmatprep.subr.mxu1 %v7674_v22 }
 0xd28   :  { %4239 = vmatpush1.msra.mxu0 %v7675_v17  ;;  %4310 = vmatpush1.msra.mxu1 %v7676_v20 }
 0xd29   :  { %4240 = vmatprep.subr.mxu0 %v7677_v47  ;;  %4311 = vmatprep.subr.mxu1 %v7678_v37 }
 0xd2a   :  { %4241 = vmatpush1.msra.mxu0 %v7679_v49  ;;  %4312 = vmatpush1.msra.mxu1 %v7680_v56 }
 0xd2b   :  { %4242 = vmatprep.subr.mxu0 %v7681_v12  ;;  %4313 = vmatprep.subr.mxu1 %v7682_v40 }
 0xd2c   :  { %4243 = vmatpush1.msra.mxu0 %v7683_v45  ;;  %4314 = vmatpush1.msra.mxu1 %v7684_v53 }
 0xd2d   :  { %4244 = vmatprep.subr.mxu0 %v7685_v26  ;;  %4315 = vmatprep.subr.mxu1 %v7686_v46 }
 0xd2e   :  { %4245 = vmatpush1.msra.mxu0 %v7687_v54  ;;  %4278 = vmatprep.mubr.f32.mxu0 %v7688_v38 }
 0xd2f   :  { %4316 = vmatpush1.msra.mxu1 %v7689_v50  ;;  %4349 = vmatprep.mubr.f32.mxu1 %v7688_v38 }
 0xdcf   :  { %v4040_v41 = vpop.f32.mrf.mxu0  ;;  %v4111_v31 = vpop.f32.mrf.mxu1 }
 0xdd0   :  { %v4116_v51 = vadd.f32 %v4040_v41, %v2546_v36  ;;  %v4118_v52 = vadd.f32 %v4111_v31, %v2659_v8  ;;  %v4446_v31 = vld [vmem:[#allocation8 + $0x1c0] sm:$0xff] }
 0xdd1   :  { %v4042_v21 = vpop.f32.mrf.mxu0  ;;  %v4113_v13 = vpop.f32.mrf.mxu1  ;;  %v4438_v8 = vld [vmem:[#allocation8 + $0x180] sm:$0xff] }
 0xdd2   :  { %v4698_v34 = vmul.f32 -1.442695, %v4116_v51  ;;  %v4117_v35 = vadd.f32 %v4042_v21, %v2548_v6  ;;  %v4119_v23 = vadd.f32 %v4113_v13, %v2661_v18  ;;  %v4451_v6 = vld [vmem:[#allocation8 + $0x1e8] sm:$0xff]  ;;  %v4450_v51 = vld [vmem:[#allocation8 + $0x1e0] sm:$0xff]  ;;  %v4452_v21 = vld [vmem:[#allocation8 + $0x1f0] sm:$0xff] }
 0xdd3   :  { %4454 = vmatprep.subr.mxu0 %v4451_v6  ;;  %v4443_v13 = vld [vmem:[#allocation8 + $0x1a8] sm:$0xff]  ;;  %v4444_v18 = vld [vmem:[#allocation8 + $0x1b0] sm:$0xff] }
 0xdd4   :  { %4924 = vpow2.f32 %v4698_v34  ;;  %v4699_v57 = vmul.f32 -1.442695, %v4117_v35  ;;  %v4700_v15 = vmul.f32 -1.442695, %v4119_v23  ;;  %v4447_v34 = vld [vmem:[#allocation8 + $0x1c8] sm:$0xff]  ;;  %v4449_v35 = vld [vmem:[#allocation8 + $0x1d8] sm:$0xff] }
 0xdd5   :  { %v4439_v23 = vld [vmem:[#allocation8 + $0x188] sm:$0xff]  ;;  %v4424_v6 = vld [vmem:[#allocation8 + $0x110] sm:$0xff] }
 0xdd6   :  { %4926 = vpow2.f32 %v4699_v57  ;;  %v4448_v57 = vld [vmem:[#allocation8 + $0x1d0] sm:$0xff] }
 0xdd7   :  { %4928 = vtanh.f32 %v4118_v52  ;;  %v4440_v52 = vld [vmem:[#allocation8 + $0x190] sm:$0xff] }
 0xdd8   :  { %4930 = vpow2.f32 %v4700_v15  ;;  %v4435_v15 = vld [vmem:[#allocation8 + $0x168] sm:$0xff] }
 0xde1   :  { %v4925_v48 = vpop.eup %4924 }
 0xde2   :  { %v4123_v28 = vadd.f32 1.0, %v4925_v48  ;;  %v4437_v48 = vld [vmem:[#allocation8 + $0x178] sm:$0xff] }
 0xde3   :  { %v4927_v25 = vpop.eup %4926 }
 0xde4   :  { %4932 = vrcp.f32 %v4123_v28  ;;  %v4129_v10 = vadd.f32 1.0, %v4927_v25  ;;  %v4929_v11 = vpop.eup %4928  ;;  %v4434_v28 = vld [vmem:[#allocation8 + $0x160] sm:$0xff]  ;;  %v4436_v25 = vld [vmem:[#allocation8 + $0x170] sm:$0xff] }
 0xde5   :  { %v4931_v55 = vpop.eup %4930 }
 0xde6   :  { %4934 = vrcp.f32 %v4129_v10  ;;  %v4136_v7 = vadd.f32 1.0, %v4931_v55  ;;  %v4431_v10 = vld [vmem:[#allocation8 + $0x148] sm:$0xff]  ;;  %v4430_v55 = vld [vmem:[#allocation8 + $0x140] sm:$0xff] }
 0xde8   :  { %4936 = vrcp.f32 %v4136_v7  ;;  %v4426_v7 = vld [vmem:[#allocation8 + $0x120] sm:$0xff] }
 0xdf1   :  { %v4933_v4 = vpop.eup %4932 }
 0xdf2   :  { %v4140_v14 = vmul.f32 %v4933_v4, %v4929_v11  ;;  %v4433_v11 = vld [vmem:[#allocation8 + $0x158] sm:$0xff]  ;;  %v4432_v4 = vld [vmem:[#allocation8 + $0x150] sm:$0xff] }
 0xdf3   :  { %v4935_v0 = vpop.eup %4934 }
 0xdf4   :  { %v4139_v24 = vmul.f32 %v4935_v0, %v6979_v9  ;;  %v4453_v9 = vld [vmem:[#allocation8 + $0x1f8] sm:$0xff] }
 0xdf5   :  { %v4937_v36 = vpop.eup %4936  ;;  %4525 = vmatprep.subr.mxu1 %v4453_v9  ;;  %v4429_v0 = vld [vmem:[#allocation8 + $0x138] sm:$0xff]  ;;  %v4419_v9 = vld [vmem:[#allocation8 + $0xe8] sm:$0xff] }
 0xdf6   :  { %v7058_v43 = vadd.f32 %v4140_v14, %v4139_v24  ;;  %v4427_v14 = vld [vmem:[#allocation8 + $0x128] sm:$0xff]  ;;  %v4428_v24 = vld [vmem:[#allocation8 + $0x130] sm:$0xff] }
 0xdf8   :  { %4938 = vtanh.f32 %v7058_v43 }
 0xe05   :  { %v4939_v41 = vpop.eup %4938 }
 0xe06   :  { %v4143_v32 = vmul.f32 %v4939_v41, %v4937_v36  ;;  %v4423_v36 = vld [vmem:[#allocation8 + $0x108] sm:$0xff]  ;;  %v4425_v41 = vld [vmem:[#allocation8 + $0x118] sm:$0xff] }
 0xe08   :  { %4701 = vst [vmem:[%s7124_s7 + $0x28] sm:$0xff] %v4143_v32  ;;  %4279 = vmatmul.mubr.f32.vlgmr.msra.gmra.mxu0 %v4143_v32  ;;  %4350 = vmatmul.mubr.f32.vlgmr.msra.gmra.mxu1 %v4143_v32  ;;  %v4422_v32 = vld [vmem:[#allocation8 + $0x100] sm:$0xff] }
 0xe09   :  { %4518 = vmatprep.mubr.f32.mxu0 %v7688_v38  ;;  %4589 = vmatprep.mubr.f32.mxu1 %v7688_v38  ;;  %v4442_v38 = vld [vmem:[#allocation8 + $0x1a0] sm:$0xff] }
 0xe0a   :  { %4455 = vmatpush1.msra.mxu0 %v4450_v51  ;;  %4526 = vmatpush1.msra.mxu1 %v4452_v21  ;;  %v4421_v51 = vld [vmem:[#allocation8 + $0xf8] sm:$0xff]  ;;  %v4418_v21 = vld [vmem:[#allocation8 + $0xe0] sm:$0xff] }
 0xe0b   :  { %4456 = vmatprep.subr.mxu0 %v4447_v34  ;;  %4527 = vmatprep.subr.mxu1 %v4449_v35  ;;  %v4420_v34 = vld [vmem:[#allocation8 + $0xf0] sm:$0xff] }
 0xe0c   :  { %4457 = vmatpush1.msra.mxu0 %v4446_v31  ;;  %4528 = vmatpush1.msra.mxu1 %v4448_v57 }
 0xe0d   :  { %4458 = vmatprep.subr.mxu0 %v4443_v13  ;;  %4529 = vmatprep.subr.mxu1 %v4445_v5 }
 0xe0e   :  { %4459 = vmatpush1.msra.mxu0 %v4442_v38  ;;  %4530 = vmatpush1.msra.mxu1 %v4444_v18  ;;  %v7699_v18 = vld [vmem:[#allocation59_spill] sm:$0xff] }
 0xe0f   :  { %4460 = vmatprep.subr.mxu0 %v4439_v23  ;;  %4531 = vmatprep.subr.mxu1 %v4441_v60  ;;  %v2558_v23 = vadd.f32 %v7699_v18, %v7690_v39 }
 0xe10   :  { %4461 = vmatpush1.msra.mxu0 %v4438_v8  ;;  %4532 = vmatpush1.msra.mxu1 %v4440_v52  ;;  %v7700_v8 = vld [vmem:[#allocation35_spill] sm:$0xff] }
 0xe11   :  { %4462 = vmatprep.subr.mxu0 %v4435_v15  ;;  %4533 = vmatprep.subr.mxu1 %v4437_v48  ;;  %v2560_v52 = vadd.f32 %v7700_v8, %v6507_v30 }
 0xe12   :  { %4463 = vmatpush1.msra.mxu0 %v4434_v28  ;;  %4534 = vmatpush1.msra.mxu1 %v4436_v25 }
 0xe13   :  { %4464 = vmatprep.subr.mxu0 %v4431_v10  ;;  %4535 = vmatprep.subr.mxu1 %v4433_v11 }
 0xe14   :  { %4465 = vmatpush1.msra.mxu0 %v4430_v55  ;;  %4536 = vmatpush1.msra.mxu1 %v4432_v4  ;;  %v7701_v55 = vld [vmem:[#allocation33_spill] sm:$0xff] }
 0xe15   :  { %4466 = vmatprep.subr.mxu0 %v4427_v14  ;;  %4537 = vmatprep.subr.mxu1 %v4429_v0  ;;  %v2673_v4 = vadd.f32 %v7701_v55, %v7594_v19  ;;  %v7702_v0 = vld [vmem:[#allocation57_spill] sm:$0xff] }
 0xe16   :  { %4467 = vmatpush1.msra.mxu0 %v4426_v7  ;;  %4538 = vmatpush1.msra.mxu1 %v4428_v24 }
 0xe17   :  { %4468 = vmatprep.subr.mxu0 %v4423_v36  ;;  %4539 = vmatprep.subr.mxu1 %v4425_v41 }
 0xe18   :  { %4469 = vmatpush1.msra.mxu0 %v4422_v32  ;;  %4540 = vmatpush1.msra.mxu1 %v4424_v6 }
 0xe19   :  { %4470 = vmatprep.subr.mxu0 %v4419_v9  ;;  %4541 = vmatprep.subr.mxu1 %v4421_v51 }
 0xe1a   :  { %4471 = vmatpush1.msra.mxu0 %v4418_v21  ;;  %4542 = vmatpush1.msra.mxu1 %v4420_v34 }
 0xe1b   :  { %4472 = vmatprep.subr.mxu0 %v6803_v59  ;;  %4543 = vmatprep.subr.mxu1 %v6805_v61  ;;  %v7695_v59 = vld [vmem:[#allocation11_spill] sm:$0xff] }
 0xe1c   :  { %4473 = vmatpush1.msra.mxu0 %v6807_v62  ;;  %4544 = vmatpush1.msra.mxu1 %v6811_v63  ;;  %v2552_v61 = vadd.f32 %v7695_v59, %v7690_v39  ;;  %v7696_v63 = vld [vmem:[#allocation34_spill] sm:$0xff]  ;;  %v2671_v39 = vadd.f32 %v7702_v0, %v6524_v44 }
 0xe1d   :  { %4474 = vmatprep.subr.mxu0 %v6813_v1  ;;  %4545 = vmatprep.subr.mxu1 %v6815_v2  ;;  %v2554_v1 = vadd.f32 %v7696_v63, %v6507_v30 }
 0xe1e   :  { %4475 = vmatpush1.msra.mxu0 %v6819_v3  ;;  %4546 = vmatpush1.msra.mxu1 %v7668_v58 }
 0xe1f   :  { %4476 = vmatprep.subr.mxu0 %v7669_v33  ;;  %4547 = vmatprep.subr.mxu1 %v7670_v27 }
 0xe20   :  { %4477 = vmatpush1.msra.mxu0 %v7671_v42  ;;  %4548 = vmatpush1.msra.mxu1 %v7672_v29 }
 0xe21   :  { %4478 = vmatprep.subr.mxu0 %v7673_v16  ;;  %4549 = vmatprep.subr.mxu1 %v7674_v22  ;;  %v7697_v16 = vld [vmem:[#allocation58_spill] sm:$0xff] }
 0xe22   :  { %4479 = vmatpush1.msra.mxu0 %v7675_v17  ;;  %4550 = vmatpush1.msra.mxu1 %v7676_v20  ;;  %v2667_v22 = vadd.f32 %v7697_v16, %v7594_v19  ;;  %v7698_v20 = vld [vmem:[#allocation31_spill] sm:$0xff] }
 0xe23   :  { %4480 = vmatprep.subr.mxu0 %v7677_v47  ;;  %4551 = vmatprep.subr.mxu1 %v7678_v37  ;;  %v2665_v47 = vadd.f32 %v7698_v20, %v6524_v44 }
 0xe24   :  { %4481 = vmatpush1.msra.mxu0 %v7679_v49  ;;  %4552 = vmatpush1.msra.mxu1 %v7680_v56 }
 0xe25   :  { %4482 = vmatprep.subr.mxu0 %v7681_v12  ;;  %4553 = vmatprep.subr.mxu1 %v7682_v40 }
 0xe26   :  { %4483 = vmatpush1.msra.mxu0 %v7683_v45  ;;  %4554 = vmatpush1.msra.mxu1 %v7684_v53 }
 0xe27   :  { %4484 = vmatprep.subr.mxu0 %v7685_v26  ;;  %4555 = vmatprep.subr.mxu1 %v7686_v46 }
 0xe28   :  { %4485 = vmatpush1.msra.mxu0 %v7687_v54  ;;  %4556 = vmatpush1.msra.mxu1 %v7689_v50 }
 0xec8   :  { %v4280_v62 = vpop.f32.mrf.mxu0  ;;  %v4351_v27 = vpop.f32.mrf.mxu1 }
 0xec9   :  { %v4356_v2 = vadd.f32 %v4280_v62, %v2552_v61  ;;  %v4358_v37 = vadd.f32 %v4351_v27, %v2665_v47 }
 0xeca   :  { %v4282_v3 = vpop.f32.mrf.mxu0  ;;  %v4353_v29 = vpop.f32.mrf.mxu1 }
 0xecb   :  { %v4702_v58 = vmul.f32 -1.442695, %v4356_v2  ;;  %v4357_v33 = vadd.f32 %v4282_v3, %v2554_v1  ;;  %v4359_v17 = vadd.f32 %v4353_v29, %v2667_v22 }
 0xecd   :  { %4940 = vpow2.f32 %v4702_v58  ;;  %v4703_v42 = vmul.f32 -1.442695, %v4357_v33  ;;  %v4704_v49 = vmul.f32 -1.442695, %v4359_v17 }
 0xecf   :  { %4942 = vpow2.f32 %v4703_v42 }
 0xed0   :  { %4944 = vtanh.f32 %v4358_v37 }
 0xed1   :  { %4946 = vpow2.f32 %v4704_v49 }
 0xeda   :  { %v4941_v56 = vpop.eup %4940 }
 0xedb   :  { %v4363_v12 = vadd.f32 1.0, %v4941_v56 }
 0xedc   :  { %v4943_v40 = vpop.eup %4942 }
 0xedd   :  { %4948 = vrcp.f32 %v4363_v12  ;;  %v4369_v45 = vadd.f32 1.0, %v4943_v40  ;;  %v4945_v53 = vpop.eup %4944 }
 0xede   :  { %v4947_v26 = vpop.eup %4946 }
 0xedf   :  { %4950 = vrcp.f32 %v4369_v45  ;;  %v4376_v35 = vadd.f32 1.0, %v4947_v26 }
 0xee1   :  { %4952 = vrcp.f32 %v4376_v35 }
 0xeea   :  { %v4949_v46 = vpop.eup %4948 }
 0xeeb   :  { %v4380_v54 = vmul.f32 %v4949_v46, %v4945_v53 }
 0xeec   :  { %v4951_v50 = vpop.eup %4950 }
 0xeed   :  { %v4379_v31 = vmul.f32 %v4951_v50, %v7058_v43 }
 0xeee   :  { %v4953_v13 = vpop.eup %4952 }
 0xeef   :  { %v4381_v57 = vadd.f32 %v4380_v54, %v4379_v31 }
 0xef1   :  { %4954 = vtanh.f32 %v4381_v57 }
 0xefe   :  { %v4955_v5 = vpop.eup %4954 }
 0xeff   :  { %v4383_v38 = vmul.f32 %v4955_v5, %v4953_v13 }
 0xf01   :  { %4705 = vst [vmem:[%s7124_s7 + $0x30] sm:$0xff] %v4383_v38  ;;  %4519 = vmatmul.mubr.f32.vlgmr.msra.gmra.mxu0 %v4383_v38  ;;  %4590 = vmatmul.mubr.f32.vlgmr.msra.gmra.mxu1 %v4383_v38 }
 0xfc1   :  { %v4520_v60 = vpop.f32.mrf.mxu0  ;;  %v4591_v25 = vpop.f32.mrf.mxu1 }
 0xfc2   :  { %v4596_v43 = vadd.f32 %v4520_v60, %v2558_v23  ;;  %v4598_v7 = vadd.f32 %v4591_v25, %v2671_v39 }
 0xfc3   :  { %v4522_v15 = vpop.f32.mrf.mxu0  ;;  %v4593_v11 = vpop.f32.mrf.mxu1 }
 0xfc4   :  { %v4706_v48 = vmul.f32 -1.442695, %v4596_v43  ;;  %v4597_v28 = vadd.f32 %v4522_v15, %v2560_v52  ;;  %v4599_v14 = vadd.f32 %v4593_v11, %v2673_v4 }
 0xfc6   :  { %4956 = vpow2.f32 %v4706_v48  ;;  %v4707_v10 = vmul.f32 -1.442695, %v4597_v28  ;;  %v4708_v24 = vmul.f32 -1.442695, %v4599_v14 }
 0xfc8   :  { %4958 = vpow2.f32 %v4707_v10 }
 0xfc9   :  { %4960 = vtanh.f32 %v4598_v7 }
 0xfca   :  { %4962 = vpow2.f32 %v4708_v24 }
 0xfd3   :  { %v4957_v36 = vpop.eup %4956 }
 0xfd4   :  { %v4603_v30 = vadd.f32 1.0, %v4957_v36 }
 0xfd5   :  { %v4959_v41 = vpop.eup %4958 }
 0xfd6   :  { %4964 = vrcp.f32 %v4603_v30  ;;  %v4609_v32 = vadd.f32 1.0, %v4959_v41  ;;  %v4961_v6 = vpop.eup %4960 }
 0xfd7   :  { %v4963_v9 = vpop.eup %4962 }
 0xfd8   :  { %4966 = vrcp.f32 %v4609_v32  ;;  %v4616_v19 = vadd.f32 1.0, %v4963_v9 }
 0xfda   :  { %4968 = vrcp.f32 %v4616_v19 }
 0xfe3   :  { %v4965_v51 = vpop.eup %4964 }
 0xfe4   :  { %v4620_v21 = vmul.f32 %v4965_v51, %v4961_v6 }
 0xfe5   :  { %v4967_v34 = vpop.eup %4966 }
 0xfe6   :  { %v4619_v59 = vmul.f32 %v4967_v34, %v4381_v57 }
 0xfe7   :  { %v4969_v44 = vpop.eup %4968 }
 0xfe8   :  { %v4621_v61 = vadd.f32 %v4620_v21, %v4619_v59 }
 0xfea   :  { %4970 = vtanh.f32 %v4621_v61 }
 0xff7   :  { %v4971_v62 = vpop.eup %4970 }
 0xff8   :  { %v4623_v63 = vmul.f32 %v4971_v62, %v4969_v44 }
 0xffa   :  { %4709 = vst [vmem:[%s7124_s7 + $0x38] sm:$0xff] %v4623_v63 }
 0xffb   :  { %4630 = vsyncpa [#allocation5], 1 }
 0xffc   :  { %4631 = vsyncpa [#allocation7], 1 }

</bundles_post_ra>
